<compile_context>
chip_gen: v5e
topology: v5e:2x2
jax: 0.10.0
libtpu: 0.0.40
codegen_flags: <defaults>
</compile_context>

<pallas_src>
import jax
import jax.numpy as jnp
from jax.experimental import pallas as pl
from jax.experimental.pallas import tpu as pltpu


_TILE_M_MAX = 1024      # max rows per im2col GEMM block (stride-2 layers)
_ROW_TILE_MAX = 16      # max output rows per grid step (stride-1 halo kernel)


# ---------------------------------------------------------------------------
# Stride-1 3x3 conv + bias + PReLU: in-kernel patch formation from a halo'd
# NHWC row tile (no materialized im2col).
# ---------------------------------------------------------------------------
def _halo_conv_s1_kernel(alpha_ref, xm_ref, xt_ref, xb_ref, w_ref, b_ref, o_ref):
    _, TH, W, Cin = xm_ref.shape
    h = pl.program_id(1)
    nh = pl.num_programs(1)

    wmat = w_ref[...]                                    # (9*Cin, Cout) bf16
    bias = b_ref[...]                                    # (1, Cout) f32
    alpha = alpha_ref[0]                                 # scalar f32 PReLU slope
    zcol = jnp.zeros((1, Cin), dtype=xm_ref.dtype)

    # One-row halos; zeroed at the image boundary (padding=1 semantics).
    top = jnp.where(h > 0, xt_ref[0, 0], jnp.zeros((W, Cin), xm_ref.dtype))
    bot = jnp.where(h < nh - 1, xb_ref[0, 0], jnp.zeros((W, Cin), xm_ref.dtype))

    def in_row(j):                                       # tile-relative input row j
        if j < 0:
            return top
        if j >= TH:
            return bot
        return xm_ref[0, j]                              # (W, Cin)

    for r in range(TH):                                  # static unroll over rows
        taps = []
        for kh in range(3):
            v = in_row(r + kh - 1)
            taps.append(jnp.concatenate([zcol, v[:-1]], axis=0))   # kw = 0
            taps.append(v)                                          # kw = 1
            taps.append(jnp.concatenate([v[1:], zcol], axis=0))     # kw = 2
        # (W, 9*Cin); K ordering (kh, kw, ci) matches the reshaped weights.
        p = jnp.concatenate(taps, axis=1)
        y = jnp.dot(p, wmat, preferred_element_type=jnp.float32) + bias
        y = jnp.where(y >= 0.0, y, alpha * y)
        o_ref[0, r] = y.astype(o_ref.dtype)


def _largest_row_tile(h):
    for t in range(min(_ROW_TILE_MAX, h), 0, -1):
        if h % t == 0:
            return t
    return 1


def conv3x3_s1_prelu(x, w_oihw, bias, alpha):
    """3x3 / stride-1 / padding-1 conv + PReLU on an NHWC bf16 activation."""
    N, H, W, Cin = x.shape
    Cout = w_oihw.shape[0]
    K = 9 * Cin
    TH = _largest_row_tile(H)
    Ht = H // TH

    w2 = jnp.transpose(w_oihw, (2, 3, 1, 0)).reshape(K, Cout).astype(jnp.bfloat16)
    b2 = bias.reshape(1, Cout).astype(jnp.float32)
    a1 = jnp.reshape(alpha, (1,)).astype(jnp.float32)

    return pl.pallas_call(
        _halo_conv_s1_kernel,
        out_shape=jax.ShapeDtypeStruct((N, H, W, Cout), jnp.bfloat16),
        grid=(N, Ht),
        in_specs=[
            pl.BlockSpec(memory_space=pltpu.MemorySpace.SMEM),            # alpha
            pl.BlockSpec((1, TH, W, Cin), lambda n, h: (n, h, 0, 0)),     # main rows
            pl.BlockSpec((1, 1, W, Cin),                                  # top halo row
                         lambda n, h: (n, jnp.maximum(h * TH - 1, 0), 0, 0)),
            pl.BlockSpec((1, 1, W, Cin),                                  # bottom halo row
                         lambda n, h: (n, jnp.minimum(h * TH + TH, H - 1), 0, 0)),
            pl.BlockSpec((K, Cout), lambda n, h: (0, 0)),                 # weights
            pl.BlockSpec((1, Cout), lambda n, h: (0, 0)),                 # bias
        ],
        out_specs=pl.BlockSpec((1, TH, W, Cout), lambda n, h: (n, h, 0, 0)),
        compiler_params=pltpu.CompilerParams(
            dimension_semantics=("parallel", "parallel")),
    )(a1, x, x, x, w2, b2)


# ---------------------------------------------------------------------------
# Stride-2 3x3 conv + bias + PReLU: row-tiled im2col GEMM (amplification is
# only 2.25x for stride 2), fused bias + PReLU.
# ---------------------------------------------------------------------------
def _gemm_bias_prelu_kernel(alpha_ref, p_ref, w_ref, b_ref, o_ref):
    y = jnp.dot(p_ref[...], w_ref[...], preferred_element_type=jnp.float32)
    y = y + b_ref[...]
    alpha = alpha_ref[0]
    y = jnp.where(y >= 0.0, y, alpha * y)
    o_ref[...] = y.astype(o_ref.dtype)


def _im2col_s2(x):
    """3x3 / padding=1 / stride=2 patches, tap-major (kh, kw, ci) layout."""
    N, H, W, C = x.shape
    xp = jnp.pad(x, ((0, 0), (1, 1), (1, 1), (0, 0)))
    Ho = (H - 1) // 2 + 1
    Wo = (W - 1) // 2 + 1
    taps = []
    for kh in range(3):
        for kw in range(3):
            taps.append(xp[:, kh:kh + 2 * (Ho - 1) + 1:2,
                            kw:kw + 2 * (Wo - 1) + 1:2, :])
    patches = jnp.stack(taps, axis=3)                    # (N, Ho, Wo, 9, C)
    return patches.reshape(N, Ho * Wo, 9 * C), Ho, Wo


def _pick_tile_m(rows, cap=_TILE_M_MAX, target_tiles=8):
    """Largest divisor of rows <= min(cap, ~rows/target_tiles) that keeps the
    block sublane-aligned (multiple of 8) or covers the whole array."""
    desired = min(cap, max(8, -(-rows // target_tiles)))
    for t in range(min(desired, rows), 0, -1):
        if rows % t == 0 and (t % 8 == 0 or t == rows):
            return t
    return rows


def conv3x3_s2_prelu(x, w_oihw, bias, alpha):
    """3x3 / stride-2 / padding-1 conv + PReLU (row-tiled im2col GEMM)."""
    N, H, W, Cin = x.shape
    Cout = w_oihw.shape[0]
    K = 9 * Cin

    patches, Ho, Wo = _im2col_s2(x)
    rows = N * Ho * Wo
    patches = patches.reshape(rows, K)
    tile_m = _pick_tile_m(rows)

    w2 = jnp.transpose(w_oihw, (2, 3, 1, 0)).reshape(K, Cout).astype(jnp.bfloat16)
    b2 = bias.reshape(1, Cout).astype(jnp.float32)
    a1 = jnp.reshape(alpha, (1,)).astype(jnp.float32)

    out = pl.pallas_call(
        _gemm_bias_prelu_kernel,
        out_shape=jax.ShapeDtypeStruct((rows, Cout), jnp.bfloat16),
        grid=(rows // tile_m,),
        in_specs=[
            pl.BlockSpec(memory_space=pltpu.MemorySpace.SMEM),   # PReLU alpha
            pl.BlockSpec((tile_m, K), lambda i: (i, 0)),         # im2col patches
            pl.BlockSpec((K, Cout), lambda i: (0, 0)),           # weights
            pl.BlockSpec((1, Cout), lambda i: (0, 0)),           # bias
        ],
        out_specs=pl.BlockSpec((tile_m, Cout), lambda i: (i, 0)),
        compiler_params=pltpu.CompilerParams(
            dimension_semantics=("parallel",),
            # Let XLA fuse the pad/stack/reshape im2col producer into the
            # patches operand instead of materializing it in HBM.
            allow_input_fusion=[False, True, False, False]),
    )(a1, patches, w2, b2)

    return out.reshape(N, Ho, Wo, Cout)


# ---------------------------------------------------------------------------
# Model assembly.
# ---------------------------------------------------------------------------
# (cin, cout, stride) for conv1..conv6 as in the PyTorch module.
_LAYER_SPECS = ((3, 32, 2), (32, 32, 1), (32, 64, 2),
                (64, 64, 1), (64, 96, 2), (96, 96, 1))


def init_params(key):
    """Deterministic synthetic parameters (shapes match the PyTorch module)."""
    params = []
    for cin, cout, _ in _LAYER_SPECS:
        key, kw, kb = jax.random.split(key, 3)
        fan_in = cin * 9
        w = jax.random.normal(kw, (cout, cin, 3, 3), jnp.float32) / jnp.sqrt(
            jnp.float32(fan_in))
        b = jax.random.normal(kb, (cout,), jnp.float32) * 0.01
        a = jnp.full((1,), 0.25, jnp.float32)  # nn.PReLU(): 1 shared param, init 0.25
        params.append((w, b, a))
    return params


def feature_extractor(x_nchw, params):
    """Forward pass: returns (x1, x2, x3) in f32 NCHW, like the PyTorch module."""
    x = jnp.transpose(x_nchw, (0, 2, 3, 1)).astype(jnp.bfloat16)   # NHWC bf16
    feats = []
    for i, ((w, b, a), (_, _, stride)) in enumerate(zip(params, _LAYER_SPECS)):
        if stride == 1:
            x = conv3x3_s1_prelu(x, w, b, a)
        else:
            x = conv3x3_s2_prelu(x, w, b, a)
        if i in (1, 3, 5):                                          # after conv2/4/6
            feats.append(jnp.transpose(x, (0, 3, 1, 2)).astype(jnp.float32))
    return tuple(feats)


def _reference(x_nchw, params):
    """Pure-JAX f32 reference (XLA conv) of the PyTorch forward."""
    x = x_nchw
    feats = []
    for i, ((w, b, a), (_, _, s)) in enumerate(zip(params, _LAYER_SPECS)):
        y = jax.lax.conv_general_dilated(
            x, w, window_strides=(s, s), padding=((1, 1), (1, 1)),
            dimension_numbers=("NCHW", "OIHW", "NCHW"))
        y = y + b.reshape(1, -1, 1, 1)
        x = jnp.where(y >= 0, y, a[0] * y)
        if i in (1, 3, 5):
            feats.append(x)
    return tuple(feats)


if __name__ == "__main__":
    key = jax.random.PRNGKey(0)
    kx, kp = jax.random.split(key)
    x = jax.random.normal(kx, (2, 3, 16, 16), jnp.float32)   # NCHW like PyTorch
    params = init_params(kp)

    x1, x2, x3 = jax.jit(feature_extractor)(x, params)
    jax.block_until_ready((x1, x2, x3))

    assert x1.shape == (2, 32, 8, 8), x1.shape
    assert x2.shape == (2, 64, 4, 4), x2.shape
    assert x3.shape == (2, 96, 2, 2), x3.shape
    assert x1.dtype == x2.dtype == x3.dtype == jnp.float32

    r1, r2, r3 = _reference(x, params)
    for got, ref in ((x1, r1), (x2, r2), (x3, r3)):
        err = float(jnp.max(jnp.abs(got - ref)))
        assert err < 0.25, f"max abs error vs f32 reference too large: {err}"

    print("KERNEL_OK")
</pallas_src>

<mosaic_0001>
module attributes {stable_mosaic.version = 11 : i64} {
  func.func @_gemm_bias_prelu_kernel(%arg0: i32, %arg1: memref<1xf32, #tpu.memory_space<smem>>, %arg2: memref<16x27xbf16, #tpu.memory_space<vmem>>, %arg3: memref<27x32xbf16, #tpu.memory_space<vmem>>, %arg4: memref<1x32xf32, #tpu.memory_space<vmem>>, %arg5: memref<16x32xbf16, #tpu.memory_space<vmem>>) attributes {dimension_semantics = [#tpu.dimension_semantics<parallel>], iteration_bounds = array<i64: 8>, scalar_prefetch = 0 : i64, scratch_operands = 0 : i64, tpu.core_type = #tpu.core_type<tc>, window_params = [{transform_indices = @transform_0, window_bounds = array<i64: 1>}, {transform_indices = @transform_1, window_bounds = array<i64: 16, 27>}, {pipeline_mode = #tpu.pipeline_mode<synchronous>, transform_indices = @transform_2, window_bounds = array<i64: 27, 32>}, {pipeline_mode = #tpu.pipeline_mode<synchronous>, transform_indices = @transform_3, window_bounds = array<i64: 1, 32>}, {transform_indices = @transform_4, window_bounds = array<i64: 16, 32>}]} {
    %c0 = arith.constant 0 : index
    %c0_0 = arith.constant 0 : index
    %0 = vector.load %arg2[%c0, %c0_0] : memref<16x27xbf16, #tpu.memory_space<vmem>>, vector<16x27xbf16>
    %c0_1 = arith.constant 0 : index
    %c0_2 = arith.constant 0 : index
    %1 = vector.load %arg3[%c0_1, %c0_2] : memref<27x32xbf16, #tpu.memory_space<vmem>>, vector<27x32xbf16>
    %cst = arith.constant dense<0.000000e+00> : vector<16x32xf32>
    %2 = tpu.matmul %0, %1, %cst {dimension_numbers = #tpu.dot_dimension_numbers<[1], [0], [0], [1], [0, 0, 1, 1], [], []>} : vector<16x27xbf16>, vector<27x32xbf16>, vector<16x32xf32> -> vector<16x32xf32>
    %c0_3 = arith.constant 0 : index
    %c0_4 = arith.constant 0 : index
    %3 = vector.load %arg4[%c0_3, %c0_4] : memref<1x32xf32, #tpu.memory_space<vmem>>, vector<1x32xf32>
    %4 = vector.broadcast %3 : vector<1x32xf32> to vector<16x32xf32>
    %5 = arith.addf %2, %4 : vector<16x32xf32>
    %c0_5 = arith.constant 0 : index
    %6 = memref.load %arg1[%c0_5] : memref<1xf32, #tpu.memory_space<smem>>
    %cst_6 = arith.constant 0.000000e+00 : f32
    %7 = vector.broadcast %cst_6 : f32 to vector<16x32xf32>
    %8 = arith.cmpf oge, %5, %7 : vector<16x32xf32>
    %9 = vector.broadcast %6 : f32 to vector<16x32xf32>
    %10 = arith.mulf %9, %5 : vector<16x32xf32>
    %11 = arith.select %8, %5, %10 : vector<16x32xi1>, vector<16x32xf32>
    %12 = arith.truncf %11 : vector<16x32xf32> to vector<16x32xbf16>
    %c0_7 = arith.constant 0 : index
    %c0_8 = arith.constant 0 : index
    %13 = vector.load %arg5[%c0_7, %c0_8] : memref<16x32xbf16, #tpu.memory_space<vmem>>, vector<16x32xbf16>
    tpu.vector_store %arg5[%c0_7, %c0_8], %12 {strides = array<i32>} : memref<16x32xbf16, #tpu.memory_space<vmem>>, vector<16x32xbf16>,
    return
  }
  func.func @transform_0(%arg0: i32) -> i32 {
    %c0_i32 = arith.constant 0 : i32
    %c0_i32_0 = arith.constant 0 : i32
    return %c0_i32 : i32
  }
  func.func @transform_1(%arg0: i32) -> (i32, i32) {
    %c0_i32 = arith.constant 0 : i32
    %c0_i32_0 = arith.constant 0 : i32
    return %arg0, %c0_i32 : i32, i32
  }
  func.func @transform_2(%arg0: i32) -> (i32, i32) {
    %c0_i32 = arith.constant 0 : i32
    %c0_i32_0 = arith.constant 0 : i32
    %c0_i32_1 = arith.constant 0 : i32
    return %c0_i32, %c0_i32_0 : i32, i32
  }
  func.func @transform_3(%arg0: i32) -> (i32, i32) {
    %c0_i32 = arith.constant 0 : i32
    %c0_i32_0 = arith.constant 0 : i32
    %c0_i32_1 = arith.constant 0 : i32
    return %c0_i32, %c0_i32_0 : i32, i32
  }
  func.func @transform_4(%arg0: i32) -> (i32, i32) {
    %c0_i32 = arith.constant 0 : i32
    %c0_i32_0 = arith.constant 0 : i32
    return %arg0, %c0_i32 : i32, i32
  }
}

module attributes {stable_mosaic.version = 11 : i64} {
  func.func @_halo_conv_s1_kernel(%arg0: i32, %arg1: i32, %arg2: memref<1xf32, #tpu.memory_space<smem>>, %arg3: memref<1x8x8x32xbf16, #tpu.memory_space<vmem>>, %arg4: memref<1x1x8x32xbf16, #tpu.memory_space<vmem>>, %arg5: memref<1x1x8x32xbf16, #tpu.memory_space<vmem>>, %arg6: memref<288x32xbf16, #tpu.memory_space<vmem>>, %arg7: memref<1x32xf32, #tpu.memory_space<vmem>>, %arg8: memref<1x8x8x32xbf16, #tpu.memory_space<vmem>>) attributes {dimension_semantics = [#tpu.dimension_semantics<parallel>, #tpu.dimension_semantics<parallel>], iteration_bounds = array<i64: 2, 1>, scalar_prefetch = 0 : i64, scratch_operands = 0 : i64, tpu.core_type = #tpu.core_type<tc>, window_params = [{transform_indices = @transform_0, window_bounds = array<i64: 1>}, {transform_indices = @transform_1, window_bounds = array<i64: 1, 8, 8, 32>}, {transform_indices = @transform_2, window_bounds = array<i64: 1, 1, 8, 32>}, {transform_indices = @transform_3, window_bounds = array<i64: 1, 1, 8, 32>}, {pipeline_mode = #tpu.pipeline_mode<synchronous>, transform_indices = @transform_4, window_bounds = array<i64: 288, 32>}, {pipeline_mode = #tpu.pipeline_mode<synchronous>, transform_indices = @transform_5, window_bounds = array<i64: 1, 32>}, {transform_indices = @transform_6, window_bounds = array<i64: 1, 8, 8, 32>}]} {
    %c0 = arith.constant 0 : index
    %c0_0 = arith.constant 0 : index
    %0 = vector.load %arg6[%c0, %c0_0] : memref<288x32xbf16, #tpu.memory_space<vmem>>, vector<288x32xbf16>
    %c0_1 = arith.constant 0 : index
    %c0_2 = arith.constant 0 : index
    %1 = vector.load %arg7[%c0_1, %c0_2] : memref<1x32xf32, #tpu.memory_space<vmem>>, vector<1x32xf32>
    %c0_3 = arith.constant 0 : index
    %2 = memref.load %arg2[%c0_3] : memref<1xf32, #tpu.memory_space<smem>>
    %cst = arith.constant 0.000000e+00 : bf16
    %3 = vector.broadcast %cst : bf16 to vector<1x32xbf16>
    %c0_i32 = arith.constant 0 : i32
    %4 = arith.cmpi sgt, %arg1, %c0_i32 : i32
    %c0_4 = arith.constant 0 : index
    %c0_5 = arith.constant 0 : index
    %c0_6 = arith.constant 0 : index
    %c0_7 = arith.constant 0 : index
    %5 = vector.load %arg4[%c0_4, %c0_5, %c0_6, %c0_7] : memref<1x1x8x32xbf16, #tpu.memory_space<vmem>>, vector<1x1x8x32xbf16>
    %6 = vector.shape_cast %5 : vector<1x1x8x32xbf16> to vector<8x32xbf16>
    %cst_8 = arith.constant 0.000000e+00 : bf16
    %7 = vector.broadcast %cst_8 : bf16 to vector<8x32xbf16>
    %8 = arith.select %4, %6, %7 : vector<8x32xbf16>
    %c0_i32_9 = arith.constant 0 : i32
    %9 = arith.cmpi slt, %arg1, %c0_i32_9 : i32
    %c0_10 = arith.constant 0 : index
    %c0_11 = arith.constant 0 : index
    %c0_12 = arith.constant 0 : index
    %c0_13 = arith.constant 0 : index
    %10 = vector.load %arg5[%c0_10, %c0_11, %c0_12, %c0_13] : memref<1x1x8x32xbf16, #tpu.memory_space<vmem>>, vector<1x1x8x32xbf16>
    %11 = vector.shape_cast %10 : vector<1x1x8x32xbf16> to vector<8x32xbf16>
    %cst_14 = arith.constant 0.000000e+00 : bf16
    %12 = vector.broadcast %cst_14 : bf16 to vector<8x32xbf16>
    %13 = arith.select %9, %11, %12 : vector<8x32xbf16>
    %14 = vector.extract_strided_slice %8 {offsets = [0, 0], sizes = [7, 32], strides = [1, 1]} : vector<8x32xbf16> to vector<7x32xbf16>
    %15 = tpu.concatenate %3, %14 in 0 : vector<1x32xbf16>, vector<7x32xbf16> -> vector<8x32xbf16>
    %16 = vector.extract_strided_slice %8 {offsets = [1, 0], sizes = [7, 32], strides = [1, 1]} : vector<8x32xbf16> to vector<7x32xbf16>
    %17 = tpu.concatenate %16, %3 in 0 : vector<7x32xbf16>, vector<1x32xbf16> -> vector<8x32xbf16>
    %c0_15 = arith.constant 0 : index
    %c0_16 = arith.constant 0 : index
    %c0_17 = arith.constant 0 : index
    %c0_18 = arith.constant 0 : index
    %18 = vector.load %arg3[%c0_15, %c0_16, %c0_17, %c0_18] : memref<1x8x8x32xbf16, #tpu.memory_space<vmem>>, vector<1x1x8x32xbf16>
    %19 = vector.shape_cast %18 : vector<1x1x8x32xbf16> to vector<8x32xbf16>
    %20 = vector.extract_strided_slice %19 {offsets = [0, 0], sizes = [7, 32], strides = [1, 1]} : vector<8x32xbf16> to vector<7x32xbf16>
    %21 = tpu.concatenate %3, %20 in 0 : vector<1x32xbf16>, vector<7x32xbf16> -> vector<8x32xbf16>
    %22 = vector.extract_strided_slice %19 {offsets = [1, 0], sizes = [7, 32], strides = [1, 1]} : vector<8x32xbf16> to vector<7x32xbf16>
    %23 = tpu.concatenate %22, %3 in 0 : vector<7x32xbf16>, vector<1x32xbf16> -> vector<8x32xbf16>
    %c0_19 = arith.constant 0 : index
    %c1 = arith.constant 1 : index
    %c0_20 = arith.constant 0 : index
    %c0_21 = arith.constant 0 : index
    %24 = vector.load %arg3[%c0_19, %c1, %c0_20, %c0_21] : memref<1x8x8x32xbf16, #tpu.memory_space<vmem>>, vector<1x1x8x32xbf16>
    %25 = vector.shape_cast %24 : vector<1x1x8x32xbf16> to vector<8x32xbf16>
    %26 = vector.extract_strided_slice %25 {offsets = [0, 0], sizes = [7, 32], strides = [1, 1]} : vector<8x32xbf16> to vector<7x32xbf16>
    %27 = tpu.concatenate %3, %26 in 0 : vector<1x32xbf16>, vector<7x32xbf16> -> vector<8x32xbf16>
    %28 = vector.extract_strided_slice %25 {offsets = [1, 0], sizes = [7, 32], strides = [1, 1]} : vector<8x32xbf16> to vector<7x32xbf16>
    %29 = tpu.concatenate %28, %3 in 0 : vector<7x32xbf16>, vector<1x32xbf16> -> vector<8x32xbf16>
    %30 = tpu.concatenate %15, %8, %17, %21, %19, %23, %27, %25, %29 in 1 : vector<8x32xbf16>, vector<8x32xbf16>, vector<8x32xbf16>, vector<8x32xbf16>, vector<8x32xbf16>, vector<8x32xbf16>, vector<8x32xbf16>, vector<8x32xbf16>, vector<8x32xbf16> -> vector<8x288xbf16>
    %cst_22 = arith.constant dense<0.000000e+00> : vector<8x32xf32>
    %31 = tpu.matmul %30, %0, %cst_22 {dimension_numbers = #tpu.dot_dimension_numbers<[1], [0], [0], [1], [0, 0, 1, 1], [], []>} : vector<8x288xbf16>, vector<288x32xbf16>, vector<8x32xf32> -> vector<8x32xf32>
    %32 = vector.broadcast %1 : vector<1x32xf32> to vector<8x32xf32>
    %33 = arith.addf %31, %32 : vector<8x32xf32>
    %cst_23 = arith.constant 0.000000e+00 : f32
    %34 = vector.broadcast %cst_23 : f32 to vector<8x32xf32>
    %35 = arith.cmpf oge, %33, %34 : vector<8x32xf32>
    %36 = vector.broadcast %2 : f32 to vector<8x32xf32>
    %37 = arith.mulf %36, %33 : vector<8x32xf32>
    %38 = arith.select %35, %33, %37 : vector<8x32xi1>, vector<8x32xf32>
    %39 = arith.truncf %38 : vector<8x32xf32> to vector<8x32xbf16>
    %c0_24 = arith.constant 0 : index
    %c0_25 = arith.constant 0 : index
    %c0_26 = arith.constant 0 : index
    %c0_27 = arith.constant 0 : index
    %40 = vector.load %arg8[%c0_24, %c0_25, %c0_26, %c0_27] : memref<1x8x8x32xbf16, #tpu.memory_space<vmem>>, vector<1x1x8x32xbf16>
    %41 = vector.shape_cast %40 : vector<1x1x8x32xbf16> to vector<8x32xbf16>
    %42 = vector.shape_cast %39 : vector<8x32xbf16> to vector<1x1x8x32xbf16>
    tpu.vector_store %arg8[%c0_24, %c0_25, %c0_26, %c0_27], %42 {strides = array<i32>} : memref<1x8x8x32xbf16, #tpu.memory_space<vmem>>, vector<1x1x8x32xbf16>,
    %c0_28 = arith.constant 0 : index
    %c0_29 = arith.constant 0 : index
    %c0_30 = arith.constant 0 : index
    %c0_31 = arith.constant 0 : index
    %43 = vector.load %arg3[%c0_28, %c0_29, %c0_30, %c0_31] : memref<1x8x8x32xbf16, #tpu.memory_space<vmem>>, vector<1x1x8x32xbf16>
    %44 = vector.shape_cast %43 : vector<1x1x8x32xbf16> to vector<8x32xbf16>
    %45 = vector.extract_strided_slice %44 {offsets = [0, 0], sizes = [7, 32], strides = [1, 1]} : vector<8x32xbf16> to vector<7x32xbf16>
    %46 = tpu.concatenate %3, %45 in 0 : vector<1x32xbf16>, vector<7x32xbf16> -> vector<8x32xbf16>
    %47 = vector.extract_strided_slice %44 {offsets = [1, 0], sizes = [7, 32], strides = [1, 1]} : vector<8x32xbf16> to vector<7x32xbf16>
    %48 = tpu.concatenate %47, %3 in 0 : vector<7x32xbf16>, vector<1x32xbf16> -> vector<8x32xbf16>
    %c0_32 = arith.constant 0 : index
    %c1_33 = arith.constant 1 : index
    %c0_34 = arith.constant 0 : index
    %c0_35 = arith.constant 0 : index
    %49 = vector.load %arg3[%c0_32, %c1_33, %c0_34, %c0_35] : memref<1x8x8x32xbf16, #tpu.memory_space<vmem>>, vector<1x1x8x32xbf16>
    %50 = vector.shape_cast %49 : vector<1x1x8x32xbf16> to vector<8x32xbf16>
    %51 = vector.extract_strided_slice %50 {offsets = [0, 0], sizes = [7, 32], strides = [1, 1]} : vector<8x32xbf16> to vector<7x32xbf16>
    %52 = tpu.concatenate %3, %51 in 0 : vector<1x32xbf16>, vector<7x32xbf16> -> vector<8x32xbf16>
    %53 = vector.extract_strided_slice %50 {offsets = [1, 0], sizes = [7, 32], strides = [1, 1]} : vector<8x32xbf16> to vector<7x32xbf16>
    %54 = tpu.concatenate %53, %3 in 0 : vector<7x32xbf16>, vector<1x32xbf16> -> vector<8x32xbf16>
    %c0_36 = arith.constant 0 : index
    %c2 = arith.constant 2 : index
    %c0_37 = arith.constant 0 : index
    %c0_38 = arith.constant 0 : index
    %55 = vector.load %arg3[%c0_36, %c2, %c0_37, %c0_38] : memref<1x8x8x32xbf16, #tpu.memory_space<vmem>>, vector<1x1x8x32xbf16>
    %56 = vector.shape_cast %55 : vector<1x1x8x32xbf16> to vector<8x32xbf16>
    %57 = vector.extract_strided_slice %56 {offsets = [0, 0], sizes = [7, 32], strides = [1, 1]} : vector<8x32xbf16> to vector<7x32xbf16>
    %58 = tpu.concatenate %3, %57 in 0 : vector<1x32xbf16>, vector<7x32xbf16> -> vector<8x32xbf16>
    %59 = vector.extract_strided_slice %56 {offsets = [1, 0], sizes = [7, 32], strides = [1, 1]} : vector<8x32xbf16> to vector<7x32xbf16>
    %60 = tpu.concatenate %59, %3 in 0 : vector<7x32xbf16>, vector<1x32xbf16> -> vector<8x32xbf16>
    %61 = tpu.concatenate %46, %44, %48, %52, %50, %54, %58, %56, %60 in 1 : vector<8x32xbf16>, vector<8x32xbf16>, vector<8x32xbf16>, vector<8x32xbf16>, vector<8x32xbf16>, vector<8x32xbf16>, vector<8x32xbf16>, vector<8x32xbf16>, vector<8x32xbf16> -> vector<8x288xbf16>
    %cst_39 = arith.constant dense<0.000000e+00> : vector<8x32xf32>
    %62 = tpu.matmul %61, %0, %cst_39 {dimension_numbers = #tpu.dot_dimension_numbers<[1], [0], [0], [1], [0, 0, 1, 1], [], []>} : vector<8x288xbf16>, vector<288x32xbf16>, vector<8x32xf32> -> vector<8x32xf32>
    %63 = vector.broadcast %1 : vector<1x32xf32> to vector<8x32xf32>
    %64 = arith.addf %62, %63 : vector<8x32xf32>
    %cst_40 = arith.constant 0.000000e+00 : f32
    %65 = vector.broadcast %cst_40 : f32 to vector<8x32xf32>
    %66 = arith.cmpf oge, %64, %65 : vector<8x32xf32>
    %67 = vector.broadcast %2 : f32 to vector<8x32xf32>
    %68 = arith.mulf %67, %64 : vector<8x32xf32>
    %69 = arith.select %66, %64, %68 : vector<8x32xi1>, vector<8x32xf32>
    %70 = arith.truncf %69 : vector<8x32xf32> to vector<8x32xbf16>
    %c0_41 = arith.constant 0 : index
    %c1_42 = arith.constant 1 : index
    %c0_43 = arith.constant 0 : index
    %c0_44 = arith.constant 0 : index
    %71 = vector.load %arg8[%c0_41, %c1_42, %c0_43, %c0_44] : memref<1x8x8x32xbf16, #tpu.memory_space<vmem>>, vector<1x1x8x32xbf16>
    %72 = vector.shape_cast %71 : vector<1x1x8x32xbf16> to vector<8x32xbf16>
    %73 = vector.shape_cast %70 : vector<8x32xbf16> to vector<1x1x8x32xbf16>
    tpu.vector_store %arg8[%c0_41, %c1_42, %c0_43, %c0_44], %73 {strides = array<i32>} : memref<1x8x8x32xbf16, #tpu.memory_space<vmem>>, vector<1x1x8x32xbf16>,
    %c0_45 = arith.constant 0 : index
    %c1_46 = arith.constant 1 : index
    %c0_47 = arith.constant 0 : index
    %c0_48 = arith.constant 0 : index
    %74 = vector.load %arg3[%c0_45, %c1_46, %c0_47, %c0_48] : memref<1x8x8x32xbf16, #tpu.memory_space<vmem>>, vector<1x1x8x32xbf16>
    %75 = vector.shape_cast %74 : vector<1x1x8x32xbf16> to vector<8x32xbf16>
    %76 = vector.extract_strided_slice %75 {offsets = [0, 0], sizes = [7, 32], strides = [1, 1]} : vector<8x32xbf16> to vector<7x32xbf16>
    %77 = tpu.concatenate %3, %76 in 0 : vector<1x32xbf16>, vector<7x32xbf16> -> vector<8x32xbf16>
    %78 = vector.extract_strided_slice %75 {offsets = [1, 0], sizes = [7, 32], strides = [1, 1]} : vector<8x32xbf16> to vector<7x32xbf16>
    %79 = tpu.concatenate %78, %3 in 0 : vector<7x32xbf16>, vector<1x32xbf16> -> vector<8x32xbf16>
    %c0_49 = arith.constant 0 : index
    %c2_50 = arith.constant 2 : index
    %c0_51 = arith.constant 0 : index
    %c0_52 = arith.constant 0 : index
    %80 = vector.load %arg3[%c0_49, %c2_50, %c0_51, %c0_52] : memref<1x8x8x32xbf16, #tpu.memory_space<vmem>>, vector<1x1x8x32xbf16>
    %81 = vector.shape_cast %80 : vector<1x1x8x32xbf16> to vector<8x32xbf16>
    %82 = vector.extract_strided_slice %81 {offsets = [0, 0], sizes = [7, 32], strides = [1, 1]} : vector<8x32xbf16> to vector<7x32xbf16>
    %83 = tpu.concatenate %3, %82 in 0 : vector<1x32xbf16>, vector<7x32xbf16> -> vector<8x32xbf16>
    %84 = vector.extract_strided_slice %81 {offsets = [1, 0], sizes = [7, 32], strides = [1, 1]} : vector<8x32xbf16> to vector<7x32xbf16>
    %85 = tpu.concatenate %84, %3 in 0 : vector<7x32xbf16>, vector<1x32xbf16> -> vector<8x32xbf16>
    %c0_53 = arith.constant 0 : index
    %c3 = arith.constant 3 : index
    %c0_54 = arith.constant 0 : index
    %c0_55 = arith.constant 0 : index
    %86 = vector.load %arg3[%c0_53, %c3, %c0_54, %c0_55] : memref<1x8x8x32xbf16, #tpu.memory_space<vmem>>, vector<1x1x8x32xbf16>
    %87 = vector.shape_cast %86 : vector<1x1x8x32xbf16> to vector<8x32xbf16>
    %88 = vector.extract_strided_slice %87 {offsets = [0, 0], sizes = [7, 32], strides = [1, 1]} : vector<8x32xbf16> to vector<7x32xbf16>
    %89 = tpu.concatenate %3, %88 in 0 : vector<1x32xbf16>, vector<7x32xbf16> -> vector<8x32xbf16>
    %90 = vector.extract_strided_slice %87 {offsets = [1, 0], sizes = [7, 32], strides = [1, 1]} : vector<8x32xbf16> to vector<7x32xbf16>
    %91 = tpu.concatenate %90, %3 in 0 : vector<7x32xbf16>, vector<1x32xbf16> -> vector<8x32xbf16>
    %92 = tpu.concatenate %77, %75, %79, %83, %81, %85, %89, %87, %91 in 1 : vector<8x32xbf16>, vector<8x32xbf16>, vector<8x32xbf16>, vector<8x32xbf16>, vector<8x32xbf16>, vector<8x32xbf16>, vector<8x32xbf16>, vector<8x32xbf16>, vector<8x32xbf16> -> vector<8x288xbf16>
    %cst_56 = arith.constant dense<0.000000e+00> : vector<8x32xf32>
    %93 = tpu.matmul %92, %0, %cst_56 {dimension_numbers = #tpu.dot_dimension_numbers<[1], [0], [0], [1], [0, 0, 1, 1], [], []>} : vector<8x288xbf16>, vector<288x32xbf16>, vector<8x32xf32> -> vector<8x32xf32>
    %94 = vector.broadcast %1 : vector<1x32xf32> to vector<8x32xf32>
    %95 = arith.addf %93, %94 : vector<8x32xf32>
    %cst_57 = arith.constant 0.000000e+00 : f32
    %96 = vector.broadcast %cst_57 : f32 to vector<8x32xf32>
    %97 = arith.cmpf oge, %95, %96 : vector<8x32xf32>
    %98 = vector.broadcast %2 : f32 to vector<8x32xf32>
    %99 = arith.mulf %98, %95 : vector<8x32xf32>
    %100 = arith.select %97, %95, %99 : vector<8x32xi1>, vector<8x32xf32>
    %101 = arith.truncf %100 : vector<8x32xf32> to vector<8x32xbf16>
    %c0_58 = arith.constant 0 : index
    %c2_59 = arith.constant 2 : index
    %c0_60 = arith.constant 0 : index
    %c0_61 = arith.constant 0 : index
    %102 = vector.load %arg8[%c0_58, %c2_59, %c0_60, %c0_61] : memref<1x8x8x32xbf16, #tpu.memory_space<vmem>>, vector<1x1x8x32xbf16>
    %103 = vector.shape_cast %102 : vector<1x1x8x32xbf16> to vector<8x32xbf16>
    %104 = vector.shape_cast %101 : vector<8x32xbf16> to vector<1x1x8x32xbf16>
    tpu.vector_store %arg8[%c0_58, %c2_59, %c0_60, %c0_61], %104 {strides = array<i32>} : memref<1x8x8x32xbf16, #tpu.memory_space<vmem>>, vector<1x1x8x32xbf16>,
    %c0_62 = arith.constant 0 : index
    %c2_63 = arith.constant 2 : index
    %c0_64 = arith.constant 0 : index
    %c0_65 = arith.constant 0 : index
    %105 = vector.load %arg3[%c0_62, %c2_63, %c0_64, %c0_65] : memref<1x8x8x32xbf16, #tpu.memory_space<vmem>>, vector<1x1x8x32xbf16>
    %106 = vector.shape_cast %105 : vector<1x1x8x32xbf16> to vector<8x32xbf16>
    %107 = vector.extract_strided_slice %106 {offsets = [0, 0], sizes = [7, 32], strides = [1, 1]} : vector<8x32xbf16> to vector<7x32xbf16>
    %108 = tpu.concatenate %3, %107 in 0 : vector<1x32xbf16>, vector<7x32xbf16> -> vector<8x32xbf16>
    %109 = vector.extract_strided_slice %106 {offsets = [1, 0], sizes = [7, 32], strides = [1, 1]} : vector<8x32xbf16> to vector<7x32xbf16>
    %110 = tpu.concatenate %109, %3 in 0 : vector<7x32xbf16>, vector<1x32xbf16> -> vector<8x32xbf16>
    %c0_66 = arith.constant 0 : index
    %c3_67 = arith.constant 3 : index
    %c0_68 = arith.constant 0 : index
    %c0_69 = arith.constant 0 : index
    %111 = vector.load %arg3[%c0_66, %c3_67, %c0_68, %c0_69] : memref<1x8x8x32xbf16, #tpu.memory_space<vmem>>, vector<1x1x8x32xbf16>
    %112 = vector.shape_cast %111 : vector<1x1x8x32xbf16> to vector<8x32xbf16>
    %113 = vector.extract_strided_slice %112 {offsets = [0, 0], sizes = [7, 32], strides = [1, 1]} : vector<8x32xbf16> to vector<7x32xbf16>
    %114 = tpu.concatenate %3, %113 in 0 : vector<1x32xbf16>, vector<7x32xbf16> -> vector<8x32xbf16>
    %115 = vector.extract_strided_slice %112 {offsets = [1, 0], sizes = [7, 32], strides = [1, 1]} : vector<8x32xbf16> to vector<7x32xbf16>
    %116 = tpu.concatenate %115, %3 in 0 : vector<7x32xbf16>, vector<1x32xbf16> -> vector<8x32xbf16>
    %c0_70 = arith.constant 0 : index
    %c4 = arith.constant 4 : index
    %c0_71 = arith.constant 0 : index
    %c0_72 = arith.constant 0 : index
    %117 = vector.load %arg3[%c0_70, %c4, %c0_71, %c0_72] : memref<1x8x8x32xbf16, #tpu.memory_space<vmem>>, vector<1x1x8x32xbf16>
    %118 = vector.shape_cast %117 : vector<1x1x8x32xbf16> to vector<8x32xbf16>
    %119 = vector.extract_strided_slice %118 {offsets = [0, 0], sizes = [7, 32], strides = [1, 1]} : vector<8x32xbf16> to vector<7x32xbf16>
    %120 = tpu.concatenate %3, %119 in 0 : vector<1x32xbf16>, vector<7x32xbf16> -> vector<8x32xbf16>
    %121 = vector.extract_strided_slice %118 {offsets = [1, 0], sizes = [7, 32], strides = [1, 1]} : vector<8x32xbf16> to vector<7x32xbf16>
    %122 = tpu.concatenate %121, %3 in 0 : vector<7x32xbf16>, vector<1x32xbf16> -> vector<8x32xbf16>
    %123 = tpu.concatenate %108, %106, %110, %114, %112, %116, %120, %118, %122 in 1 : vector<8x32xbf16>, vector<8x32xbf16>, vector<8x32xbf16>, vector<8x32xbf16>, vector<8x32xbf16>, vector<8x32xbf16>, vector<8x32xbf16>, vector<8x32xbf16>, vector<8x32xbf16> -> vector<8x288xbf16>
    %cst_73 = arith.constant dense<0.000000e+00> : vector<8x32xf32>
    %124 = tpu.matmul %123, %0, %cst_73 {dimension_numbers = #tpu.dot_dimension_numbers<[1], [0], [0], [1], [0, 0, 1, 1], [], []>} : vector<8x288xbf16>, vector<288x32xbf16>, vector<8x32xf32> -> vector<8x32xf32>
    %125 = vector.broadcast %1 : vector<1x32xf32> to vector<8x32xf32>
    %126 = arith.addf %124, %125 : vector<8x32xf32>
    %cst_74 = arith.constant 0.000000e+00 : f32
    %127 = vector.broadcast %cst_74 : f32 to vector<8x32xf32>
    %128 = arith.cmpf oge, %126, %127 : vector<8x32xf32>
    %129 = vector.broadcast %2 : f32 to vector<8x32xf32>
    %130 = arith.mulf %129, %126 : vector<8x32xf32>
    %131 = arith.select %128, %126, %130 : vector<8x32xi1>, vector<8x32xf32>
    %132 = arith.truncf %131 : vector<8x32xf32> to vector<8x32xbf16>
    %c0_75 = arith.constant 0 : index
    %c3_76 = arith.constant 3 : index
    %c0_77 = arith.constant 0 : index
    %c0_78 = arith.constant 0 : index
    %133 = vector.load %arg8[%c0_75, %c3_76, %c0_77, %c0_78] : memref<1x8x8x32xbf16, #tpu.memory_space<vmem>>, vector<1x1x8x32xbf16>
    %134 = vector.shape_cast %133 : vector<1x1x8x32xbf16> to vector<8x32xbf16>
    %135 = vector.shape_cast %132 : vector<8x32xbf16> to vector<1x1x8x32xbf16>
    tpu.vector_store %arg8[%c0_75, %c3_76, %c0_77, %c0_78], %135 {strides = array<i32>} : memref<1x8x8x32xbf16, #tpu.memory_space<vmem>>, vector<1x1x8x32xbf16>,
    %c0_79 = arith.constant 0 : index
    %c3_80 = arith.constant 3 : index
    %c0_81 = arith.constant 0 : index
    %c0_82 = arith.constant 0 : index
    %136 = vector.load %arg3[%c0_79, %c3_80, %c0_81, %c0_82] : memref<1x8x8x32xbf16, #tpu.memory_space<vmem>>, vector<1x1x8x32xbf16>
    %137 = vector.shape_cast %136 : vector<1x1x8x32xbf16> to vector<8x32xbf16>
    %138 = vector.extract_strided_slice %137 {offsets = [0, 0], sizes = [7, 32], strides = [1, 1]} : vector<8x32xbf16> to vector<7x32xbf16>
    %139 = tpu.concatenate %3, %138 in 0 : vector<1x32xbf16>, vector<7x32xbf16> -> vector<8x32xbf16>
    %140 = vector.extract_strided_slice %137 {offsets = [1, 0], sizes = [7, 32], strides = [1, 1]} : vector<8x32xbf16> to vector<7x32xbf16>
    %141 = tpu.concatenate %140, %3 in 0 : vector<7x32xbf16>, vector<1x32xbf16> -> vector<8x32xbf16>
    %c0_83 = arith.constant 0 : index
    %c4_84 = arith.constant 4 : index
    %c0_85 = arith.constant 0 : index
    %c0_86 = arith.constant 0 : index
    %142 = vector.load %arg3[%c0_83, %c4_84, %c0_85, %c0_86] : memref<1x8x8x32xbf16, #tpu.memory_space<vmem>>, vector<1x1x8x32xbf16>
    %143 = vector.shape_cast %142 : vector<1x1x8x32xbf16> to vector<8x32xbf16>
    %144 = vector.extract_strided_slice %143 {offsets = [0, 0], sizes = [7, 32], strides = [1, 1]} : vector<8x32xbf16> to vector<7x32xbf16>
    %145 = tpu.concatenate %3, %144 in 0 : vector<1x32xbf16>, vector<7x32xbf16> -> vector<8x32xbf16>
    %146 = vector.extract_strided_slice %143 {offsets = [1, 0], sizes = [7, 32], strides = [1, 1]} : vector<8x32xbf16> to vector<7x32xbf16>
    %147 = tpu.concatenate %146, %3 in 0 : vector<7x32xbf16>, vector<1x32xbf16> -> vector<8x32xbf16>
    %c0_87 = arith.constant 0 : index
    %c5 = arith.constant 5 : index
    %c0_88 = arith.constant 0 : index
    %c0_89 = arith.constant 0 : index
    %148 = vector.load %arg3[%c0_87, %c5, %c0_88, %c0_89] : memref<1x8x8x32xbf16, #tpu.memory_space<vmem>>, vector<1x1x8x32xbf16>
    %149 = vector.shape_cast %148 : vector<1x1x8x32xbf16> to vector<8x32xbf16>
    %150 = vector.extract_strided_slice %149 {offsets = [0, 0], sizes = [7, 32], strides = [1, 1]} : vector<8x32xbf16> to vector<7x32xbf16>
    %151 = tpu.concatenate %3, %150 in 0 : vector<1x32xbf16>, vector<7x32xbf16> -> vector<8x32xbf16>
    %152 = vector.extract_strided_slice %149 {offsets = [1, 0], sizes = [7, 32], strides = [1, 1]} : vector<8x32xbf16> to vector<7x32xbf16>
    %153 = tpu.concatenate %152, %3 in 0 : vector<7x32xbf16>, vector<1x32xbf16> -> vector<8x32xbf16>
    %154 = tpu.concatenate %139, %137, %141, %145, %143, %147, %151, %149, %153 in 1 : vector<8x32xbf16>, vector<8x32xbf16>, vector<8x32xbf16>, vector<8x32xbf16>, vector<8x32xbf16>, vector<8x32xbf16>, vector<8x32xbf16>, vector<8x32xbf16>, vector<8x32xbf16> -> vector<8x288xbf16>
    %cst_90 = arith.constant dense<0.000000e+00> : vector<8x32xf32>
    %155 = tpu.matmul %154, %0, %cst_90 {dimension_numbers = #tpu.dot_dimension_numbers<[1], [0], [0], [1], [0, 0, 1, 1], [], []>} : vector<8x288xbf16>, vector<288x32xbf16>, vector<8x32xf32> -> vector<8x32xf32>
    %156 = vector.broadcast %1 : vector<1x32xf32> to vector<8x32xf32>
    %157 = arith.addf %155, %156 : vector<8x32xf32>
    %cst_91 = arith.constant 0.000000e+00 : f32
    %158 = vector.broadcast %cst_91 : f32 to vector<8x32xf32>
    %159 = arith.cmpf oge, %157, %158 : vector<8x32xf32>
    %160 = vector.broadcast %2 : f32 to vector<8x32xf32>
    %161 = arith.mulf %160, %157 : vector<8x32xf32>
    %162 = arith.select %159, %157, %161 : vector<8x32xi1>, vector<8x32xf32>
    %163 = arith.truncf %162 : vector<8x32xf32> to vector<8x32xbf16>
    %c0_92 = arith.constant 0 : index
    %c4_93 = arith.constant 4 : index
    %c0_94 = arith.constant 0 : index
    %c0_95 = arith.constant 0 : index
    %164 = vector.load %arg8[%c0_92, %c4_93, %c0_94, %c0_95] : memref<1x8x8x32xbf16, #tpu.memory_space<vmem>>, vector<1x1x8x32xbf16>
    %165 = vector.shape_cast %164 : vector<1x1x8x32xbf16> to vector<8x32xbf16>
    %166 = vector.shape_cast %163 : vector<8x32xbf16> to vector<1x1x8x32xbf16>
    tpu.vector_store %arg8[%c0_92, %c4_93, %c0_94, %c0_95], %166 {strides = array<i32>} : memref<1x8x8x32xbf16, #tpu.memory_space<vmem>>, vector<1x1x8x32xbf16>,
    %c0_96 = arith.constant 0 : index
    %c4_97 = arith.constant 4 : index
    %c0_98 = arith.constant 0 : index
    %c0_99 = arith.constant 0 : index
    %167 = vector.load %arg3[%c0_96, %c4_97, %c0_98, %c0_99] : memref<1x8x8x32xbf16, #tpu.memory_space<vmem>>, vector<1x1x8x32xbf16>
    %168 = vector.shape_cast %167 : vector<1x1x8x32xbf16> to vector<8x32xbf16>
    %169 = vector.extract_strided_slice %168 {offsets = [0, 0], sizes = [7, 32], strides = [1, 1]} : vector<8x32xbf16> to vector<7x32xbf16>
    %170 = tpu.concatenate %3, %169 in 0 : vector<1x32xbf16>, vector<7x32xbf16> -> vector<8x32xbf16>
    %171 = vector.extract_strided_slice %168 {offsets = [1, 0], sizes = [7, 32], strides = [1, 1]} : vector<8x32xbf16> to vector<7x32xbf16>
    %172 = tpu.concatenate %171, %3 in 0 : vector<7x32xbf16>, vector<1x32xbf16> -> vector<8x32xbf16>
    %c0_100 = arith.constant 0 : index
    %c5_101 = arith.constant 5 : index
    %c0_102 = arith.constant 0 : index
    %c0_103 = arith.constant 0 : index
    %173 = vector.load %arg3[%c0_100, %c5_101, %c0_102, %c0_103] : memref<1x8x8x32xbf16, #tpu.memory_space<vmem>>, vector<1x1x8x32xbf16>
    %174 = vector.shape_cast %173 : vector<1x1x8x32xbf16> to vector<8x32xbf16>
    %175 = vector.extract_strided_slice %174 {offsets = [0, 0], sizes = [7, 32], strides = [1, 1]} : vector<8x32xbf16> to vector<7x32xbf16>
    %176 = tpu.concatenate %3, %175 in 0 : vector<1x32xbf16>, vector<7x32xbf16> -> vector<8x32xbf16>
    %177 = vector.extract_strided_slice %174 {offsets = [1, 0], sizes = [7, 32], strides = [1, 1]} : vector<8x32xbf16> to vector<7x32xbf16>
    %178 = tpu.concatenate %177, %3 in 0 : vector<7x32xbf16>, vector<1x32xbf16> -> vector<8x32xbf16>
    %c0_104 = arith.constant 0 : index
    %c6 = arith.constant 6 : index
    %c0_105 = arith.constant 0 : index
    %c0_106 = arith.constant 0 : index
    %179 = vector.load %arg3[%c0_104, %c6, %c0_105, %c0_106] : memref<1x8x8x32xbf16, #tpu.memory_space<vmem>>, vector<1x1x8x32xbf16>
    %180 = vector.shape_cast %179 : vector<1x1x8x32xbf16> to vector<8x32xbf16>
    %181 = vector.extract_strided_slice %180 {offsets = [0, 0], sizes = [7, 32], strides = [1, 1]} : vector<8x32xbf16> to vector<7x32xbf16>
    %182 = tpu.concatenate %3, %181 in 0 : vector<1x32xbf16>, vector<7x32xbf16> -> vector<8x32xbf16>
    %183 = vector.extract_strided_slice %180 {offsets = [1, 0], sizes = [7, 32], strides = [1, 1]} : vector<8x32xbf16> to vector<7x32xbf16>
    %184 = tpu.concatenate %183, %3 in 0 : vector<7x32xbf16>, vector<1x32xbf16> -> vector<8x32xbf16>
    %185 = tpu.concatenate %170, %168, %172, %176, %174, %178, %182, %180, %184 in 1 : vector<8x32xbf16>, vector<8x32xbf16>, vector<8x32xbf16>, vector<8x32xbf16>, vector<8x32xbf16>, vector<8x32xbf16>, vector<8x32xbf16>, vector<8x32xbf16>, vector<8x32xbf16> -> vector<8x288xbf16>
    %cst_107 = arith.constant dense<0.000000e+00> : vector<8x32xf32>
    %186 = tpu.matmul %185, %0, %cst_107 {dimension_numbers = #tpu.dot_dimension_numbers<[1], [0], [0], [1], [0, 0, 1, 1], [], []>} : vector<8x288xbf16>, vector<288x32xbf16>, vector<8x32xf32> -> vector<8x32xf32>
    %187 = vector.broadcast %1 : vector<1x32xf32> to vector<8x32xf32>
    %188 = arith.addf %186, %187 : vector<8x32xf32>
    %cst_108 = arith.constant 0.000000e+00 : f32
    %189 = vector.broadcast %cst_108 : f32 to vector<8x32xf32>
    %190 = arith.cmpf oge, %188, %189 : vector<8x32xf32>
    %191 = vector.broadcast %2 : f32 to vector<8x32xf32>
    %192 = arith.mulf %191, %188 : vector<8x32xf32>
    %193 = arith.select %190, %188, %192 : vector<8x32xi1>, vector<8x32xf32>
    %194 = arith.truncf %193 : vector<8x32xf32> to vector<8x32xbf16>
    %c0_109 = arith.constant 0 : index
    %c5_110 = arith.constant 5 : index
    %c0_111 = arith.constant 0 : index
    %c0_112 = arith.constant 0 : index
    %195 = vector.load %arg8[%c0_109, %c5_110, %c0_111, %c0_112] : memref<1x8x8x32xbf16, #tpu.memory_space<vmem>>, vector<1x1x8x32xbf16>
    %196 = vector.shape_cast %195 : vector<1x1x8x32xbf16> to vector<8x32xbf16>
    %197 = vector.shape_cast %194 : vector<8x32xbf16> to vector<1x1x8x32xbf16>
    tpu.vector_store %arg8[%c0_109, %c5_110, %c0_111, %c0_112], %197 {strides = array<i32>} : memref<1x8x8x32xbf16, #tpu.memory_space<vmem>>, vector<1x1x8x32xbf16>,
    %c0_113 = arith.constant 0 : index
    %c5_114 = arith.constant 5 : index
    %c0_115 = arith.constant 0 : index
    %c0_116 = arith.constant 0 : index
    %198 = vector.load %arg3[%c0_113, %c5_114, %c0_115, %c0_116] : memref<1x8x8x32xbf16, #tpu.memory_space<vmem>>, vector<1x1x8x32xbf16>
    %199 = vector.shape_cast %198 : vector<1x1x8x32xbf16> to vector<8x32xbf16>
    %200 = vector.extract_strided_slice %199 {offsets = [0, 0], sizes = [7, 32], strides = [1, 1]} : vector<8x32xbf16> to vector<7x32xbf16>
    %201 = tpu.concatenate %3, %200 in 0 : vector<1x32xbf16>, vector<7x32xbf16> -> vector<8x32xbf16>
    %202 = vector.extract_strided_slice %199 {offsets = [1, 0], sizes = [7, 32], strides = [1, 1]} : vector<8x32xbf16> to vector<7x32xbf16>
    %203 = tpu.concatenate %202, %3 in 0 : vector<7x32xbf16>, vector<1x32xbf16> -> vector<8x32xbf16>
    %c0_117 = arith.constant 0 : index
    %c6_118 = arith.constant 6 : index
    %c0_119 = arith.constant 0 : index
    %c0_120 = arith.constant 0 : index
    %204 = vector.load %arg3[%c0_117, %c6_118, %c0_119, %c0_120] : memref<1x8x8x32xbf16, #tpu.memory_space<vmem>>, vector<1x1x8x32xbf16>
    %205 = vector.shape_cast %204 : vector<1x1x8x32xbf16> to vector<8x32xbf16>
    %206 = vector.extract_strided_slice %205 {offsets = [0, 0], sizes = [7, 32], strides = [1, 1]} : vector<8x32xbf16> to vector<7x32xbf16>
    %207 = tpu.concatenate %3, %206 in 0 : vector<1x32xbf16>, vector<7x32xbf16> -> vector<8x32xbf16>
    %208 = vector.extract_strided_slice %205 {offsets = [1, 0], sizes = [7, 32], strides = [1, 1]} : vector<8x32xbf16> to vector<7x32xbf16>
    %209 = tpu.concatenate %208, %3 in 0 : vector<7x32xbf16>, vector<1x32xbf16> -> vector<8x32xbf16>
    %c0_121 = arith.constant 0 : index
    %c7 = arith.constant 7 : index
    %c0_122 = arith.constant 0 : index
    %c0_123 = arith.constant 0 : index
    %210 = vector.load %arg3[%c0_121, %c7, %c0_122, %c0_123] : memref<1x8x8x32xbf16, #tpu.memory_space<vmem>>, vector<1x1x8x32xbf16>
    %211 = vector.shape_cast %210 : vector<1x1x8x32xbf16> to vector<8x32xbf16>
    %212 = vector.extract_strided_slice %211 {offsets = [0, 0], sizes = [7, 32], strides = [1, 1]} : vector<8x32xbf16> to vector<7x32xbf16>
    %213 = tpu.concatenate %3, %212 in 0 : vector<1x32xbf16>, vector<7x32xbf16> -> vector<8x32xbf16>
    %214 = vector.extract_strided_slice %211 {offsets = [1, 0], sizes = [7, 32], strides = [1, 1]} : vector<8x32xbf16> to vector<7x32xbf16>
    %215 = tpu.concatenate %214, %3 in 0 : vector<7x32xbf16>, vector<1x32xbf16> -> vector<8x32xbf16>
    %216 = tpu.concatenate %201, %199, %203, %207, %205, %209, %213, %211, %215 in 1 : vector<8x32xbf16>, vector<8x32xbf16>, vector<8x32xbf16>, vector<8x32xbf16>, vector<8x32xbf16>, vector<8x32xbf16>, vector<8x32xbf16>, vector<8x32xbf16>, vector<8x32xbf16> -> vector<8x288xbf16>
    %cst_124 = arith.constant dense<0.000000e+00> : vector<8x32xf32>
    %217 = tpu.matmul %216, %0, %cst_124 {dimension_numbers = #tpu.dot_dimension_numbers<[1], [0], [0], [1], [0, 0, 1, 1], [], []>} : vector<8x288xbf16>, vector<288x32xbf16>, vector<8x32xf32> -> vector<8x32xf32>
    %218 = vector.broadcast %1 : vector<1x32xf32> to vector<8x32xf32>
    %219 = arith.addf %217, %218 : vector<8x32xf32>
    %cst_125 = arith.constant 0.000000e+00 : f32
    %220 = vector.broadcast %cst_125 : f32 to vector<8x32xf32>
    %221 = arith.cmpf oge, %219, %220 : vector<8x32xf32>
    %222 = vector.broadcast %2 : f32 to vector<8x32xf32>
    %223 = arith.mulf %222, %219 : vector<8x32xf32>
    %224 = arith.select %221, %219, %223 : vector<8x32xi1>, vector<8x32xf32>
    %225 = arith.truncf %224 : vector<8x32xf32> to vector<8x32xbf16>
    %c0_126 = arith.constant 0 : index
    %c6_127 = arith.constant 6 : index
    %c0_128 = arith.constant 0 : index
    %c0_129 = arith.constant 0 : index
    %226 = vector.load %arg8[%c0_126, %c6_127, %c0_128, %c0_129] : memref<1x8x8x32xbf16, #tpu.memory_space<vmem>>, vector<1x1x8x32xbf16>
    %227 = vector.shape_cast %226 : vector<1x1x8x32xbf16> to vector<8x32xbf16>
    %228 = vector.shape_cast %225 : vector<8x32xbf16> to vector<1x1x8x32xbf16>
    tpu.vector_store %arg8[%c0_126, %c6_127, %c0_128, %c0_129], %228 {strides = array<i32>} : memref<1x8x8x32xbf16, #tpu.memory_space<vmem>>, vector<1x1x8x32xbf16>,
    %c0_130 = arith.constant 0 : index
    %c6_131 = arith.constant 6 : index
    %c0_132 = arith.constant 0 : index
    %c0_133 = arith.constant 0 : index
    %229 = vector.load %arg3[%c0_130, %c6_131, %c0_132, %c0_133] : memref<1x8x8x32xbf16, #tpu.memory_space<vmem>>, vector<1x1x8x32xbf16>
    %230 = vector.shape_cast %229 : vector<1x1x8x32xbf16> to vector<8x32xbf16>
    %231 = vector.extract_strided_slice %230 {offsets = [0, 0], sizes = [7, 32], strides = [1, 1]} : vector<8x32xbf16> to vector<7x32xbf16>
    %232 = tpu.concatenate %3, %231 in 0 : vector<1x32xbf16>, vector<7x32xbf16> -> vector<8x32xbf16>
    %233 = vector.extract_strided_slice %230 {offsets = [1, 0], sizes = [7, 32], strides = [1, 1]} : vector<8x32xbf16> to vector<7x32xbf16>
    %234 = tpu.concatenate %233, %3 in 0 : vector<7x32xbf16>, vector<1x32xbf16> -> vector<8x32xbf16>
    %c0_134 = arith.constant 0 : index
    %c7_135 = arith.constant 7 : index
    %c0_136 = arith.constant 0 : index
    %c0_137 = arith.constant 0 : index
    %235 = vector.load %arg3[%c0_134, %c7_135, %c0_136, %c0_137] : memref<1x8x8x32xbf16, #tpu.memory_space<vmem>>, vector<1x1x8x32xbf16>
    %236 = vector.shape_cast %235 : vector<1x1x8x32xbf16> to vector<8x32xbf16>
    %237 = vector.extract_strided_slice %236 {offsets = [0, 0], sizes = [7, 32], strides = [1, 1]} : vector<8x32xbf16> to vector<7x32xbf16>
    %238 = tpu.concatenate %3, %237 in 0 : vector<1x32xbf16>, vector<7x32xbf16> -> vector<8x32xbf16>
    %239 = vector.extract_strided_slice %236 {offsets = [1, 0], sizes = [7, 32], strides = [1, 1]} : vector<8x32xbf16> to vector<7x32xbf16>
    %240 = tpu.concatenate %239, %3 in 0 : vector<7x32xbf16>, vector<1x32xbf16> -> vector<8x32xbf16>
    %241 = vector.extract_strided_slice %13 {offsets = [0, 0], sizes = [7, 32], strides = [1, 1]} : vector<8x32xbf16> to vector<7x32xbf16>
    %242 = tpu.concatenate %3, %241 in 0 : vector<1x32xbf16>, vector<7x32xbf16> -> vector<8x32xbf16>
    %243 = vector.extract_strided_slice %13 {offsets = [1, 0], sizes = [7, 32], strides = [1, 1]} : vector<8x32xbf16> to vector<7x32xbf16>
    %244 = tpu.concatenate %243, %3 in 0 : vector<7x32xbf16>, vector<1x32xbf16> -> vector<8x32xbf16>
    %245 = tpu.concatenate %232, %230, %234, %238, %236, %240, %242, %13, %244 in 1 : vector<8x32xbf16>, vector<8x32xbf16>, vector<8x32xbf16>, vector<8x32xbf16>, vector<8x32xbf16>, vector<8x32xbf16>, vector<8x32xbf16>, vector<8x32xbf16>, vector<8x32xbf16> -> vector<8x288xbf16>
    %cst_138 = arith.constant dense<0.000000e+00> : vector<8x32xf32>
    %246 = tpu.matmul %245, %0, %cst_138 {dimension_numbers = #tpu.dot_dimension_numbers<[1], [0], [0], [1], [0, 0, 1, 1], [], []>} : vector<8x288xbf16>, vector<288x32xbf16>, vector<8x32xf32> -> vector<8x32xf32>
    %247 = vector.broadcast %1 : vector<1x32xf32> to vector<8x32xf32>
    %248 = arith.addf %246, %247 : vector<8x32xf32>
    %cst_139 = arith.constant 0.000000e+00 : f32
    %249 = vector.broadcast %cst_139 : f32 to vector<8x32xf32>
    %250 = arith.cmpf oge, %248, %249 : vector<8x32xf32>
    %251 = vector.broadcast %2 : f32 to vector<8x32xf32>
    %252 = arith.mulf %251, %248 : vector<8x32xf32>
    %253 = arith.select %250, %248, %252 : vector<8x32xi1>, vector<8x32xf32>
    %254 = arith.truncf %253 : vector<8x32xf32> to vector<8x32xbf16>
    %c0_140 = arith.constant 0 : index
    %c7_141 = arith.constant 7 : index
    %c0_142 = arith.constant 0 : index
    %c0_143 = arith.constant 0 : index
    %255 = vector.load %arg8[%c0_140, %c7_141, %c0_142, %c0_143] : memref<1x8x8x32xbf16, #tpu.memory_space<vmem>>, vector<1x1x8x32xbf16>
    %256 = vector.shape_cast %255 : vector<1x1x8x32xbf16> to vector<8x32xbf16>
    %257 = vector.shape_cast %254 : vector<8x32xbf16> to vector<1x1x8x32xbf16>
    tpu.vector_store %arg8[%c0_140, %c7_141, %c0_142, %c0_143], %257 {strides = array<i32>} : memref<1x8x8x32xbf16, #tpu.memory_space<vmem>>, vector<1x1x8x32xbf16>,
    return
  }
  func.func @transform_0(%arg0: i32, %arg1: i32) -> i32 {
    %c0_i32 = arith.constant 0 : i32
    %c0_i32_0 = arith.constant 0 : i32
    return %c0_i32 : i32
  }
  func.func @transform_1(%arg0: i32, %arg1: i32) -> (i32, i32, i32, i32) {
    %c0_i32 = arith.constant 0 : i32
    %c0_i32_0 = arith.constant 0 : i32
    %c0_i32_1 = arith.constant 0 : i32
    return %arg0, %arg1, %c0_i32, %c0_i32_0 : i32, i32, i32, i32
  }
  func.func @transform_2(%arg0: i32, %arg1: i32) -> (i32, i32, i32, i32) {
    %c8_i32 = arith.constant 8 : i32
    %0 = arith.muli %arg1, %c8_i32 : i32
    %c1_i32 = arith.constant 1 : i32
    %1 = arith.subi %0, %c1_i32 : i32
    %c0_i32 = arith.constant 0 : i32
    %2 = arith.maxsi %1, %c0_i32 : i32
    %c0_i32_0 = arith.constant 0 : i32
    %c0_i32_1 = arith.constant 0 : i32
    %c0_i32_2 = arith.constant 0 : i32
    return %arg0, %2, %c0_i32_0, %c0_i32_1 : i32, i32, i32, i32
  }
  func.func @transform_3(%arg0: i32, %arg1: i32) -> (i32, i32, i32, i32) {
    %c8_i32 = arith.constant 8 : i32
    %0 = arith.muli %arg1, %c8_i32 : i32
    %c8_i32_0 = arith.constant 8 : i32
    %1 = arith.addi %0, %c8_i32_0 : i32
    %c7_i32 = arith.constant 7 : i32
    %2 = arith.minsi %1, %c7_i32 : i32
    %c0_i32 = arith.constant 0 : i32
    %c0_i32_1 = arith.constant 0 : i32
    %c0_i32_2 = arith.constant 0 : i32
    return %arg0, %2, %c0_i32, %c0_i32_1 : i32, i32, i32, i32
  }
  func.func @transform_4(%arg0: i32, %arg1: i32) -> (i32, i32) {
    %c0_i32 = arith.constant 0 : i32
    %c0_i32_0 = arith.constant 0 : i32
    %c0_i32_1 = arith.constant 0 : i32
    return %c0_i32, %c0_i32_0 : i32, i32
  }
  func.func @transform_5(%arg0: i32, %arg1: i32) -> (i32, i32) {
    %c0_i32 = arith.constant 0 : i32
    %c0_i32_0 = arith.constant 0 : i32
    %c0_i32_1 = arith.constant 0 : i32
    return %c0_i32, %c0_i32_0 : i32, i32
  }
  func.func @transform_6(%arg0: i32, %arg1: i32) -> (i32, i32, i32, i32) {
    %c0_i32 = arith.constant 0 : i32
    %c0_i32_0 = arith.constant 0 : i32
    %c0_i32_1 = arith.constant 0 : i32
    return %arg0, %arg1, %c0_i32, %c0_i32_0 : i32, i32, i32, i32
  }
}

module attributes {stable_mosaic.version = 11 : i64} {
  func.func @_gemm_bias_prelu_kernel(%arg0: i32, %arg1: memref<1xf32, #tpu.memory_space<smem>>, %arg2: memref<8x288xbf16, #tpu.memory_space<vmem>>, %arg3: memref<288x64xbf16, #tpu.memory_space<vmem>>, %arg4: memref<1x64xf32, #tpu.memory_space<vmem>>, %arg5: memref<8x64xbf16, #tpu.memory_space<vmem>>) attributes {dimension_semantics = [#tpu.dimension_semantics<parallel>], iteration_bounds = array<i64: 4>, scalar_prefetch = 0 : i64, scratch_operands = 0 : i64, tpu.core_type = #tpu.core_type<tc>, window_params = [{transform_indices = @transform_0, window_bounds = array<i64: 1>}, {transform_indices = @transform_1, window_bounds = array<i64: 8, 288>}, {pipeline_mode = #tpu.pipeline_mode<synchronous>, transform_indices = @transform_2, window_bounds = array<i64: 288, 64>}, {pipeline_mode = #tpu.pipeline_mode<synchronous>, transform_indices = @transform_3, window_bounds = array<i64: 1, 64>}, {transform_indices = @transform_4, window_bounds = array<i64: 8, 64>}]} {
    %c0 = arith.constant 0 : index
    %c0_0 = arith.constant 0 : index
    %0 = vector.load %arg2[%c0, %c0_0] : memref<8x288xbf16, #tpu.memory_space<vmem>>, vector<8x288xbf16>
    %c0_1 = arith.constant 0 : index
    %c0_2 = arith.constant 0 : index
    %1 = vector.load %arg3[%c0_1, %c0_2] : memref<288x64xbf16, #tpu.memory_space<vmem>>, vector<288x64xbf16>
    %cst = arith.constant dense<0.000000e+00> : vector<8x64xf32>
    %2 = tpu.matmul %0, %1, %cst {dimension_numbers = #tpu.dot_dimension_numbers<[1], [0], [0], [1], [0, 0, 1, 1], [], []>} : vector<8x288xbf16>, vector<288x64xbf16>, vector<8x64xf32> -> vector<8x64xf32>
    %c0_3 = arith.constant 0 : index
    %c0_4 = arith.constant 0 : index
    %3 = vector.load %arg4[%c0_3, %c0_4] : memref<1x64xf32, #tpu.memory_space<vmem>>, vector<1x64xf32>
    %4 = vector.broadcast %3 : vector<1x64xf32> to vector<8x64xf32>
    %5 = arith.addf %2, %4 : vector<8x64xf32>
    %c0_5 = arith.constant 0 : index
    %6 = memref.load %arg1[%c0_5] : memref<1xf32, #tpu.memory_space<smem>>
    %cst_6 = arith.constant 0.000000e+00 : f32
    %7 = vector.broadcast %cst_6 : f32 to vector<8x64xf32>
    %8 = arith.cmpf oge, %5, %7 : vector<8x64xf32>
    %9 = vector.broadcast %6 : f32 to vector<8x64xf32>
    %10 = arith.mulf %9, %5 : vector<8x64xf32>
    %11 = arith.select %8, %5, %10 : vector<8x64xi1>, vector<8x64xf32>
    %12 = arith.truncf %11 : vector<8x64xf32> to vector<8x64xbf16>
    %c0_7 = arith.constant 0 : index
    %c0_8 = arith.constant 0 : index
    %13 = vector.load %arg5[%c0_7, %c0_8] : memref<8x64xbf16, #tpu.memory_space<vmem>>, vector<8x64xbf16>
    tpu.vector_store %arg5[%c0_7, %c0_8], %12 {strides = array<i32>} : memref<8x64xbf16, #tpu.memory_space<vmem>>, vector<8x64xbf16>,
    return
  }
  func.func @transform_0(%arg0: i32) -> i32 {
    %c0_i32 = arith.constant 0 : i32
    %c0_i32_0 = arith.constant 0 : i32
    return %c0_i32 : i32
  }
  func.func @transform_1(%arg0: i32) -> (i32, i32) {
    %c0_i32 = arith.constant 0 : i32
    %c0_i32_0 = arith.constant 0 : i32
    return %arg0, %c0_i32 : i32, i32
  }
  func.func @transform_2(%arg0: i32) -> (i32, i32) {
    %c0_i32 = arith.constant 0 : i32
    %c0_i32_0 = arith.constant 0 : i32
    %c0_i32_1 = arith.constant 0 : i32
    return %c0_i32, %c0_i32_0 : i32, i32
  }
  func.func @transform_3(%arg0: i32) -> (i32, i32) {
    %c0_i32 = arith.constant 0 : i32
    %c0_i32_0 = arith.constant 0 : i32
    %c0_i32_1 = arith.constant 0 : i32
    return %c0_i32, %c0_i32_0 : i32, i32
  }
  func.func @transform_4(%arg0: i32) -> (i32, i32) {
    %c0_i32 = arith.constant 0 : i32
    %c0_i32_0 = arith.constant 0 : i32
    return %arg0, %c0_i32 : i32, i32
  }
}

module attributes {stable_mosaic.version = 11 : i64} {
  func.func @_halo_conv_s1_kernel(%arg0: i32, %arg1: i32, %arg2: memref<1xf32, #tpu.memory_space<smem>>, %arg3: memref<1x4x4x64xbf16, #tpu.memory_space<vmem>>, %arg4: memref<1x1x4x64xbf16, #tpu.memory_space<vmem>>, %arg5: memref<1x1x4x64xbf16, #tpu.memory_space<vmem>>, %arg6: memref<576x64xbf16, #tpu.memory_space<vmem>>, %arg7: memref<1x64xf32, #tpu.memory_space<vmem>>, %arg8: memref<1x4x4x64xbf16, #tpu.memory_space<vmem>>) attributes {dimension_semantics = [#tpu.dimension_semantics<parallel>, #tpu.dimension_semantics<parallel>], iteration_bounds = array<i64: 2, 1>, scalar_prefetch = 0 : i64, scratch_operands = 0 : i64, tpu.core_type = #tpu.core_type<tc>, window_params = [{transform_indices = @transform_0, window_bounds = array<i64: 1>}, {transform_indices = @transform_1, window_bounds = array<i64: 1, 4, 4, 64>}, {transform_indices = @transform_2, window_bounds = array<i64: 1, 1, 4, 64>}, {transform_indices = @transform_3, window_bounds = array<i64: 1, 1, 4, 64>}, {pipeline_mode = #tpu.pipeline_mode<synchronous>, transform_indices = @transform_4, window_bounds = array<i64: 576, 64>}, {pipeline_mode = #tpu.pipeline_mode<synchronous>, transform_indices = @transform_5, window_bounds = array<i64: 1, 64>}, {transform_indices = @transform_6, window_bounds = array<i64: 1, 4, 4, 64>}]} {
    %c0 = arith.constant 0 : index
    %c0_0 = arith.constant 0 : index
    %0 = vector.load %arg6[%c0, %c0_0] : memref<576x64xbf16, #tpu.memory_space<vmem>>, vector<576x64xbf16>
    %c0_1 = arith.constant 0 : index
    %c0_2 = arith.constant 0 : index
    %1 = vector.load %arg7[%c0_1, %c0_2] : memref<1x64xf32, #tpu.memory_space<vmem>>, vector<1x64xf32>
    %c0_3 = arith.constant 0 : index
    %2 = memref.load %arg2[%c0_3] : memref<1xf32, #tpu.memory_space<smem>>
    %cst = arith.constant 0.000000e+00 : bf16
    %3 = vector.broadcast %cst : bf16 to vector<1x64xbf16>
    %c0_i32 = arith.constant 0 : i32
    %4 = arith.cmpi sgt, %arg1, %c0_i32 : i32
    %c0_4 = arith.constant 0 : index
    %c0_5 = arith.constant 0 : index
    %c0_6 = arith.constant 0 : index
    %c0_7 = arith.constant 0 : index
    %5 = vector.load %arg4[%c0_4, %c0_5, %c0_6, %c0_7] : memref<1x1x4x64xbf16, #tpu.memory_space<vmem>>, vector<1x1x4x64xbf16>
    %6 = vector.shape_cast %5 : vector<1x1x4x64xbf16> to vector<4x64xbf16>
    %cst_8 = arith.constant 0.000000e+00 : bf16
    %7 = vector.broadcast %cst_8 : bf16 to vector<4x64xbf16>
    %8 = arith.select %4, %6, %7 : vector<4x64xbf16>
    %c0_i32_9 = arith.constant 0 : i32
    %9 = arith.cmpi slt, %arg1, %c0_i32_9 : i32
    %c0_10 = arith.constant 0 : index
    %c0_11 = arith.constant 0 : index
    %c0_12 = arith.constant 0 : index
    %c0_13 = arith.constant 0 : index
    %10 = vector.load %arg5[%c0_10, %c0_11, %c0_12, %c0_13] : memref<1x1x4x64xbf16, #tpu.memory_space<vmem>>, vector<1x1x4x64xbf16>
    %11 = vector.shape_cast %10 : vector<1x1x4x64xbf16> to vector<4x64xbf16>
    %cst_14 = arith.constant 0.000000e+00 : bf16
    %12 = vector.broadcast %cst_14 : bf16 to vector<4x64xbf16>
    %13 = arith.select %9, %11, %12 : vector<4x64xbf16>
    %14 = vector.extract_strided_slice %8 {offsets = [0, 0], sizes = [3, 64], strides = [1, 1]} : vector<4x64xbf16> to vector<3x64xbf16>
    %15 = tpu.concatenate %3, %14 in 0 : vector<1x64xbf16>, vector<3x64xbf16> -> vector<4x64xbf16>
    %16 = vector.extract_strided_slice %8 {offsets = [1, 0], sizes = [3, 64], strides = [1, 1]} : vector<4x64xbf16> to vector<3x64xbf16>
    %17 = tpu.concatenate %16, %3 in 0 : vector<3x64xbf16>, vector<1x64xbf16> -> vector<4x64xbf16>
    %c0_15 = arith.constant 0 : index
    %c0_16 = arith.constant 0 : index
    %c0_17 = arith.constant 0 : index
    %c0_18 = arith.constant 0 : index
    %18 = vector.load %arg3[%c0_15, %c0_16, %c0_17, %c0_18] : memref<1x4x4x64xbf16, #tpu.memory_space<vmem>>, vector<1x1x4x64xbf16>
    %19 = vector.shape_cast %18 : vector<1x1x4x64xbf16> to vector<4x64xbf16>
    %20 = vector.extract_strided_slice %19 {offsets = [0, 0], sizes = [3, 64], strides = [1, 1]} : vector<4x64xbf16> to vector<3x64xbf16>
    %21 = tpu.concatenate %3, %20 in 0 : vector<1x64xbf16>, vector<3x64xbf16> -> vector<4x64xbf16>
    %22 = vector.extract_strided_slice %19 {offsets = [1, 0], sizes = [3, 64], strides = [1, 1]} : vector<4x64xbf16> to vector<3x64xbf16>
    %23 = tpu.concatenate %22, %3 in 0 : vector<3x64xbf16>, vector<1x64xbf16> -> vector<4x64xbf16>
    %c0_19 = arith.constant 0 : index
    %c1 = arith.constant 1 : index
    %c0_20 = arith.constant 0 : index
    %c0_21 = arith.constant 0 : index
    %24 = vector.load %arg3[%c0_19, %c1, %c0_20, %c0_21] : memref<1x4x4x64xbf16, #tpu.memory_space<vmem>>, vector<1x1x4x64xbf16>
    %25 = vector.shape_cast %24 : vector<1x1x4x64xbf16> to vector<4x64xbf16>
    %26 = vector.extract_strided_slice %25 {offsets = [0, 0], sizes = [3, 64], strides = [1, 1]} : vector<4x64xbf16> to vector<3x64xbf16>
    %27 = tpu.concatenate %3, %26 in 0 : vector<1x64xbf16>, vector<3x64xbf16> -> vector<4x64xbf16>
    %28 = vector.extract_strided_slice %25 {offsets = [1, 0], sizes = [3, 64], strides = [1, 1]} : vector<4x64xbf16> to vector<3x64xbf16>
    %29 = tpu.concatenate %28, %3 in 0 : vector<3x64xbf16>, vector<1x64xbf16> -> vector<4x64xbf16>
    %30 = tpu.concatenate %15, %8, %17, %21, %19, %23, %27, %25, %29 in 1 : vector<4x64xbf16>, vector<4x64xbf16>, vector<4x64xbf16>, vector<4x64xbf16>, vector<4x64xbf16>, vector<4x64xbf16>, vector<4x64xbf16>, vector<4x64xbf16>, vector<4x64xbf16> -> vector<4x576xbf16>
    %cst_22 = arith.constant dense<0.000000e+00> : vector<4x64xf32>
    %31 = tpu.matmul %30, %0, %cst_22 {dimension_numbers = #tpu.dot_dimension_numbers<[1], [0], [0], [1], [0, 0, 1, 1], [], []>} : vector<4x576xbf16>, vector<576x64xbf16>, vector<4x64xf32> -> vector<4x64xf32>
    %32 = vector.broadcast %1 : vector<1x64xf32> to vector<4x64xf32>
    %33 = arith.addf %31, %32 : vector<4x64xf32>
    %cst_23 = arith.constant 0.000000e+00 : f32
    %34 = vector.broadcast %cst_23 : f32 to vector<4x64xf32>
    %35 = arith.cmpf oge, %33, %34 : vector<4x64xf32>
    %36 = vector.broadcast %2 : f32 to vector<4x64xf32>
    %37 = arith.mulf %36, %33 : vector<4x64xf32>
    %38 = arith.select %35, %33, %37 : vector<4x64xi1>, vector<4x64xf32>
    %39 = arith.truncf %38 : vector<4x64xf32> to vector<4x64xbf16>
    %c0_24 = arith.constant 0 : index
    %c0_25 = arith.constant 0 : index
    %c0_26 = arith.constant 0 : index
    %c0_27 = arith.constant 0 : index
    %40 = vector.load %arg8[%c0_24, %c0_25, %c0_26, %c0_27] : memref<1x4x4x64xbf16, #tpu.memory_space<vmem>>, vector<1x1x4x64xbf16>
    %41 = vector.shape_cast %40 : vector<1x1x4x64xbf16> to vector<4x64xbf16>
    %42 = vector.shape_cast %39 : vector<4x64xbf16> to vector<1x1x4x64xbf16>
    tpu.vector_store %arg8[%c0_24, %c0_25, %c0_26, %c0_27], %42 {strides = array<i32>} : memref<1x4x4x64xbf16, #tpu.memory_space<vmem>>, vector<1x1x4x64xbf16>,
    %c0_28 = arith.constant 0 : index
    %c0_29 = arith.constant 0 : index
    %c0_30 = arith.constant 0 : index
    %c0_31 = arith.constant 0 : index
    %43 = vector.load %arg3[%c0_28, %c0_29, %c0_30, %c0_31] : memref<1x4x4x64xbf16, #tpu.memory_space<vmem>>, vector<1x1x4x64xbf16>
    %44 = vector.shape_cast %43 : vector<1x1x4x64xbf16> to vector<4x64xbf16>
    %45 = vector.extract_strided_slice %44 {offsets = [0, 0], sizes = [3, 64], strides = [1, 1]} : vector<4x64xbf16> to vector<3x64xbf16>
    %46 = tpu.concatenate %3, %45 in 0 : vector<1x64xbf16>, vector<3x64xbf16> -> vector<4x64xbf16>
    %47 = vector.extract_strided_slice %44 {offsets = [1, 0], sizes = [3, 64], strides = [1, 1]} : vector<4x64xbf16> to vector<3x64xbf16>
    %48 = tpu.concatenate %47, %3 in 0 : vector<3x64xbf16>, vector<1x64xbf16> -> vector<4x64xbf16>
    %c0_32 = arith.constant 0 : index
    %c1_33 = arith.constant 1 : index
    %c0_34 = arith.constant 0 : index
    %c0_35 = arith.constant 0 : index
    %49 = vector.load %arg3[%c0_32, %c1_33, %c0_34, %c0_35] : memref<1x4x4x64xbf16, #tpu.memory_space<vmem>>, vector<1x1x4x64xbf16>
    %50 = vector.shape_cast %49 : vector<1x1x4x64xbf16> to vector<4x64xbf16>
    %51 = vector.extract_strided_slice %50 {offsets = [0, 0], sizes = [3, 64], strides = [1, 1]} : vector<4x64xbf16> to vector<3x64xbf16>
    %52 = tpu.concatenate %3, %51 in 0 : vector<1x64xbf16>, vector<3x64xbf16> -> vector<4x64xbf16>
    %53 = vector.extract_strided_slice %50 {offsets = [1, 0], sizes = [3, 64], strides = [1, 1]} : vector<4x64xbf16> to vector<3x64xbf16>
    %54 = tpu.concatenate %53, %3 in 0 : vector<3x64xbf16>, vector<1x64xbf16> -> vector<4x64xbf16>
    %c0_36 = arith.constant 0 : index
    %c2 = arith.constant 2 : index
    %c0_37 = arith.constant 0 : index
    %c0_38 = arith.constant 0 : index
    %55 = vector.load %arg3[%c0_36, %c2, %c0_37, %c0_38] : memref<1x4x4x64xbf16, #tpu.memory_space<vmem>>, vector<1x1x4x64xbf16>
    %56 = vector.shape_cast %55 : vector<1x1x4x64xbf16> to vector<4x64xbf16>
    %57 = vector.extract_strided_slice %56 {offsets = [0, 0], sizes = [3, 64], strides = [1, 1]} : vector<4x64xbf16> to vector<3x64xbf16>
    %58 = tpu.concatenate %3, %57 in 0 : vector<1x64xbf16>, vector<3x64xbf16> -> vector<4x64xbf16>
    %59 = vector.extract_strided_slice %56 {offsets = [1, 0], sizes = [3, 64], strides = [1, 1]} : vector<4x64xbf16> to vector<3x64xbf16>
    %60 = tpu.concatenate %59, %3 in 0 : vector<3x64xbf16>, vector<1x64xbf16> -> vector<4x64xbf16>
    %61 = tpu.concatenate %46, %44, %48, %52, %50, %54, %58, %56, %60 in 1 : vector<4x64xbf16>, vector<4x64xbf16>, vector<4x64xbf16>, vector<4x64xbf16>, vector<4x64xbf16>, vector<4x64xbf16>, vector<4x64xbf16>, vector<4x64xbf16>, vector<4x64xbf16> -> vector<4x576xbf16>
    %cst_39 = arith.constant dense<0.000000e+00> : vector<4x64xf32>
    %62 = tpu.matmul %61, %0, %cst_39 {dimension_numbers = #tpu.dot_dimension_numbers<[1], [0], [0], [1], [0, 0, 1, 1], [], []>} : vector<4x576xbf16>, vector<576x64xbf16>, vector<4x64xf32> -> vector<4x64xf32>
    %63 = vector.broadcast %1 : vector<1x64xf32> to vector<4x64xf32>
    %64 = arith.addf %62, %63 : vector<4x64xf32>
    %cst_40 = arith.constant 0.000000e+00 : f32
    %65 = vector.broadcast %cst_40 : f32 to vector<4x64xf32>
    %66 = arith.cmpf oge, %64, %65 : vector<4x64xf32>
    %67 = vector.broadcast %2 : f32 to vector<4x64xf32>
    %68 = arith.mulf %67, %64 : vector<4x64xf32>
    %69 = arith.select %66, %64, %68 : vector<4x64xi1>, vector<4x64xf32>
    %70 = arith.truncf %69 : vector<4x64xf32> to vector<4x64xbf16>
    %c0_41 = arith.constant 0 : index
    %c1_42 = arith.constant 1 : index
    %c0_43 = arith.constant 0 : index
    %c0_44 = arith.constant 0 : index
    %71 = vector.load %arg8[%c0_41, %c1_42, %c0_43, %c0_44] : memref<1x4x4x64xbf16, #tpu.memory_space<vmem>>, vector<1x1x4x64xbf16>
    %72 = vector.shape_cast %71 : vector<1x1x4x64xbf16> to vector<4x64xbf16>
    %73 = vector.shape_cast %70 : vector<4x64xbf16> to vector<1x1x4x64xbf16>
    tpu.vector_store %arg8[%c0_41, %c1_42, %c0_43, %c0_44], %73 {strides = array<i32>} : memref<1x4x4x64xbf16, #tpu.memory_space<vmem>>, vector<1x1x4x64xbf16>,
    %c0_45 = arith.constant 0 : index
    %c1_46 = arith.constant 1 : index
    %c0_47 = arith.constant 0 : index
    %c0_48 = arith.constant 0 : index
    %74 = vector.load %arg3[%c0_45, %c1_46, %c0_47, %c0_48] : memref<1x4x4x64xbf16, #tpu.memory_space<vmem>>, vector<1x1x4x64xbf16>
    %75 = vector.shape_cast %74 : vector<1x1x4x64xbf16> to vector<4x64xbf16>
    %76 = vector.extract_strided_slice %75 {offsets = [0, 0], sizes = [3, 64], strides = [1, 1]} : vector<4x64xbf16> to vector<3x64xbf16>
    %77 = tpu.concatenate %3, %76 in 0 : vector<1x64xbf16>, vector<3x64xbf16> -> vector<4x64xbf16>
    %78 = vector.extract_strided_slice %75 {offsets = [1, 0], sizes = [3, 64], strides = [1, 1]} : vector<4x64xbf16> to vector<3x64xbf16>
    %79 = tpu.concatenate %78, %3 in 0 : vector<3x64xbf16>, vector<1x64xbf16> -> vector<4x64xbf16>
    %c0_49 = arith.constant 0 : index
    %c2_50 = arith.constant 2 : index
    %c0_51 = arith.constant 0 : index
    %c0_52 = arith.constant 0 : index
    %80 = vector.load %arg3[%c0_49, %c2_50, %c0_51, %c0_52] : memref<1x4x4x64xbf16, #tpu.memory_space<vmem>>, vector<1x1x4x64xbf16>
    %81 = vector.shape_cast %80 : vector<1x1x4x64xbf16> to vector<4x64xbf16>
    %82 = vector.extract_strided_slice %81 {offsets = [0, 0], sizes = [3, 64], strides = [1, 1]} : vector<4x64xbf16> to vector<3x64xbf16>
    %83 = tpu.concatenate %3, %82 in 0 : vector<1x64xbf16>, vector<3x64xbf16> -> vector<4x64xbf16>
    %84 = vector.extract_strided_slice %81 {offsets = [1, 0], sizes = [3, 64], strides = [1, 1]} : vector<4x64xbf16> to vector<3x64xbf16>
    %85 = tpu.concatenate %84, %3 in 0 : vector<3x64xbf16>, vector<1x64xbf16> -> vector<4x64xbf16>
    %c0_53 = arith.constant 0 : index
    %c3 = arith.constant 3 : index
    %c0_54 = arith.constant 0 : index
    %c0_55 = arith.constant 0 : index
    %86 = vector.load %arg3[%c0_53, %c3, %c0_54, %c0_55] : memref<1x4x4x64xbf16, #tpu.memory_space<vmem>>, vector<1x1x4x64xbf16>
    %87 = vector.shape_cast %86 : vector<1x1x4x64xbf16> to vector<4x64xbf16>
    %88 = vector.extract_strided_slice %87 {offsets = [0, 0], sizes = [3, 64], strides = [1, 1]} : vector<4x64xbf16> to vector<3x64xbf16>
    %89 = tpu.concatenate %3, %88 in 0 : vector<1x64xbf16>, vector<3x64xbf16> -> vector<4x64xbf16>
    %90 = vector.extract_strided_slice %87 {offsets = [1, 0], sizes = [3, 64], strides = [1, 1]} : vector<4x64xbf16> to vector<3x64xbf16>
    %91 = tpu.concatenate %90, %3 in 0 : vector<3x64xbf16>, vector<1x64xbf16> -> vector<4x64xbf16>
    %92 = tpu.concatenate %77, %75, %79, %83, %81, %85, %89, %87, %91 in 1 : vector<4x64xbf16>, vector<4x64xbf16>, vector<4x64xbf16>, vector<4x64xbf16>, vector<4x64xbf16>, vector<4x64xbf16>, vector<4x64xbf16>, vector<4x64xbf16>, vector<4x64xbf16> -> vector<4x576xbf16>
    %cst_56 = arith.constant dense<0.000000e+00> : vector<4x64xf32>
    %93 = tpu.matmul %92, %0, %cst_56 {dimension_numbers = #tpu.dot_dimension_numbers<[1], [0], [0], [1], [0, 0, 1, 1], [], []>} : vector<4x576xbf16>, vector<576x64xbf16>, vector<4x64xf32> -> vector<4x64xf32>
    %94 = vector.broadcast %1 : vector<1x64xf32> to vector<4x64xf32>
    %95 = arith.addf %93, %94 : vector<4x64xf32>
    %cst_57 = arith.constant 0.000000e+00 : f32
    %96 = vector.broadcast %cst_57 : f32 to vector<4x64xf32>
    %97 = arith.cmpf oge, %95, %96 : vector<4x64xf32>
    %98 = vector.broadcast %2 : f32 to vector<4x64xf32>
    %99 = arith.mulf %98, %95 : vector<4x64xf32>
    %100 = arith.select %97, %95, %99 : vector<4x64xi1>, vector<4x64xf32>
    %101 = arith.truncf %100 : vector<4x64xf32> to vector<4x64xbf16>
    %c0_58 = arith.constant 0 : index
    %c2_59 = arith.constant 2 : index
    %c0_60 = arith.constant 0 : index
    %c0_61 = arith.constant 0 : index
    %102 = vector.load %arg8[%c0_58, %c2_59, %c0_60, %c0_61] : memref<1x4x4x64xbf16, #tpu.memory_space<vmem>>, vector<1x1x4x64xbf16>
    %103 = vector.shape_cast %102 : vector<1x1x4x64xbf16> to vector<4x64xbf16>
    %104 = vector.shape_cast %101 : vector<4x64xbf16> to vector<1x1x4x64xbf16>
    tpu.vector_store %arg8[%c0_58, %c2_59, %c0_60, %c0_61], %104 {strides = array<i32>} : memref<1x4x4x64xbf16, #tpu.memory_space<vmem>>, vector<1x1x4x64xbf16>,
    %c0_62 = arith.constant 0 : index
    %c2_63 = arith.constant 2 : index
    %c0_64 = arith.constant 0 : index
    %c0_65 = arith.constant 0 : index
    %105 = vector.load %arg3[%c0_62, %c2_63, %c0_64, %c0_65] : memref<1x4x4x64xbf16, #tpu.memory_space<vmem>>, vector<1x1x4x64xbf16>
    %106 = vector.shape_cast %105 : vector<1x1x4x64xbf16> to vector<4x64xbf16>
    %107 = vector.extract_strided_slice %106 {offsets = [0, 0], sizes = [3, 64], strides = [1, 1]} : vector<4x64xbf16> to vector<3x64xbf16>
    %108 = tpu.concatenate %3, %107 in 0 : vector<1x64xbf16>, vector<3x64xbf16> -> vector<4x64xbf16>
    %109 = vector.extract_strided_slice %106 {offsets = [1, 0], sizes = [3, 64], strides = [1, 1]} : vector<4x64xbf16> to vector<3x64xbf16>
    %110 = tpu.concatenate %109, %3 in 0 : vector<3x64xbf16>, vector<1x64xbf16> -> vector<4x64xbf16>
    %c0_66 = arith.constant 0 : index
    %c3_67 = arith.constant 3 : index
    %c0_68 = arith.constant 0 : index
    %c0_69 = arith.constant 0 : index
    %111 = vector.load %arg3[%c0_66, %c3_67, %c0_68, %c0_69] : memref<1x4x4x64xbf16, #tpu.memory_space<vmem>>, vector<1x1x4x64xbf16>
    %112 = vector.shape_cast %111 : vector<1x1x4x64xbf16> to vector<4x64xbf16>
    %113 = vector.extract_strided_slice %112 {offsets = [0, 0], sizes = [3, 64], strides = [1, 1]} : vector<4x64xbf16> to vector<3x64xbf16>
    %114 = tpu.concatenate %3, %113 in 0 : vector<1x64xbf16>, vector<3x64xbf16> -> vector<4x64xbf16>
    %115 = vector.extract_strided_slice %112 {offsets = [1, 0], sizes = [3, 64], strides = [1, 1]} : vector<4x64xbf16> to vector<3x64xbf16>
    %116 = tpu.concatenate %115, %3 in 0 : vector<3x64xbf16>, vector<1x64xbf16> -> vector<4x64xbf16>
    %117 = vector.extract_strided_slice %13 {offsets = [0, 0], sizes = [3, 64], strides = [1, 1]} : vector<4x64xbf16> to vector<3x64xbf16>
    %118 = tpu.concatenate %3, %117 in 0 : vector<1x64xbf16>, vector<3x64xbf16> -> vector<4x64xbf16>
    %119 = vector.extract_strided_slice %13 {offsets = [1, 0], sizes = [3, 64], strides = [1, 1]} : vector<4x64xbf16> to vector<3x64xbf16>
    %120 = tpu.concatenate %119, %3 in 0 : vector<3x64xbf16>, vector<1x64xbf16> -> vector<4x64xbf16>
    %121 = tpu.concatenate %108, %106, %110, %114, %112, %116, %118, %13, %120 in 1 : vector<4x64xbf16>, vector<4x64xbf16>, vector<4x64xbf16>, vector<4x64xbf16>, vector<4x64xbf16>, vector<4x64xbf16>, vector<4x64xbf16>, vector<4x64xbf16>, vector<4x64xbf16> -> vector<4x576xbf16>
    %cst_70 = arith.constant dense<0.000000e+00> : vector<4x64xf32>
    %122 = tpu.matmul %121, %0, %cst_70 {dimension_numbers = #tpu.dot_dimension_numbers<[1], [0], [0], [1], [0, 0, 1, 1], [], []>} : vector<4x576xbf16>, vector<576x64xbf16>, vector<4x64xf32> -> vector<4x64xf32>
    %123 = vector.broadcast %1 : vector<1x64xf32> to vector<4x64xf32>
    %124 = arith.addf %122, %123 : vector<4x64xf32>
    %cst_71 = arith.constant 0.000000e+00 : f32
    %125 = vector.broadcast %cst_71 : f32 to vector<4x64xf32>
    %126 = arith.cmpf oge, %124, %125 : vector<4x64xf32>
    %127 = vector.broadcast %2 : f32 to vector<4x64xf32>
    %128 = arith.mulf %127, %124 : vector<4x64xf32>
    %129 = arith.select %126, %124, %128 : vector<4x64xi1>, vector<4x64xf32>
    %130 = arith.truncf %129 : vector<4x64xf32> to vector<4x64xbf16>
    %c0_72 = arith.constant 0 : index
    %c3_73 = arith.constant 3 : index
    %c0_74 = arith.constant 0 : index
    %c0_75 = arith.constant 0 : index
    %131 = vector.load %arg8[%c0_72, %c3_73, %c0_74, %c0_75] : memref<1x4x4x64xbf16, #tpu.memory_space<vmem>>, vector<1x1x4x64xbf16>
    %132 = vector.shape_cast %131 : vector<1x1x4x64xbf16> to vector<4x64xbf16>
    %133 = vector.shape_cast %130 : vector<4x64xbf16> to vector<1x1x4x64xbf16>
    tpu.vector_store %arg8[%c0_72, %c3_73, %c0_74, %c0_75], %133 {strides = array<i32>} : memref<1x4x4x64xbf16, #tpu.memory_space<vmem>>, vector<1x1x4x64xbf16>,
    return
  }
  func.func @transform_0(%arg0: i32, %arg1: i32) -> i32 {
    %c0_i32 = arith.constant 0 : i32
    %c0_i32_0 = arith.constant 0 : i32
    return %c0_i32 : i32
  }
  func.func @transform_1(%arg0: i32, %arg1: i32) -> (i32, i32, i32, i32) {
    %c0_i32 = arith.constant 0 : i32
    %c0_i32_0 = arith.constant 0 : i32
    %c0_i32_1 = arith.constant 0 : i32
    return %arg0, %arg1, %c0_i32, %c0_i32_0 : i32, i32, i32, i32
  }
  func.func @transform_2(%arg0: i32, %arg1: i32) -> (i32, i32, i32, i32) {
    %c4_i32 = arith.constant 4 : i32
    %0 = arith.muli %arg1, %c4_i32 : i32
    %c1_i32 = arith.constant 1 : i32
    %1 = arith.subi %0, %c1_i32 : i32
    %c0_i32 = arith.constant 0 : i32
    %2 = arith.maxsi %1, %c0_i32 : i32
    %c0_i32_0 = arith.constant 0 : i32
    %c0_i32_1 = arith.constant 0 : i32
    %c0_i32_2 = arith.constant 0 : i32
    return %arg0, %2, %c0_i32_0, %c0_i32_1 : i32, i32, i32, i32
  }
  func.func @transform_3(%arg0: i32, %arg1: i32) -> (i32, i32, i32, i32) {
    %c4_i32 = arith.constant 4 : i32
    %0 = arith.muli %arg1, %c4_i32 : i32
    %c4_i32_0 = arith.constant 4 : i32
    %1 = arith.addi %0, %c4_i32_0 : i32
    %c3_i32 = arith.constant 3 : i32
    %2 = arith.minsi %1, %c3_i32 : i32
    %c0_i32 = arith.constant 0 : i32
    %c0_i32_1 = arith.constant 0 : i32
    %c0_i32_2 = arith.constant 0 : i32
    return %arg0, %2, %c0_i32, %c0_i32_1 : i32, i32, i32, i32
  }
  func.func @transform_4(%arg0: i32, %arg1: i32) -> (i32, i32) {
    %c0_i32 = arith.constant 0 : i32
    %c0_i32_0 = arith.constant 0 : i32
    %c0_i32_1 = arith.constant 0 : i32
    return %c0_i32, %c0_i32_0 : i32, i32
  }
  func.func @transform_5(%arg0: i32, %arg1: i32) -> (i32, i32) {
    %c0_i32 = arith.constant 0 : i32
    %c0_i32_0 = arith.constant 0 : i32
    %c0_i32_1 = arith.constant 0 : i32
    return %c0_i32, %c0_i32_0 : i32, i32
  }
  func.func @transform_6(%arg0: i32, %arg1: i32) -> (i32, i32, i32, i32) {
    %c0_i32 = arith.constant 0 : i32
    %c0_i32_0 = arith.constant 0 : i32
    %c0_i32_1 = arith.constant 0 : i32
    return %arg0, %arg1, %c0_i32, %c0_i32_0 : i32, i32, i32, i32
  }
}

module attributes {stable_mosaic.version = 11 : i64} {
  func.func @_gemm_bias_prelu_kernel(%arg0: i32, %arg1: memref<1xf32, #tpu.memory_space<smem>>, %arg2: memref<8x576xbf16, #tpu.memory_space<vmem>>, %arg3: memref<576x96xbf16, #tpu.memory_space<vmem>>, %arg4: memref<1x96xf32, #tpu.memory_space<vmem>>, %arg5: memref<8x96xbf16, #tpu.memory_space<vmem>>) attributes {dimension_semantics = [#tpu.dimension_semantics<parallel>], iteration_bounds = array<i64: 1>, scalar_prefetch = 0 : i64, scratch_operands = 0 : i64, tpu.core_type = #tpu.core_type<tc>, window_params = [{transform_indices = @transform_0, window_bounds = array<i64: 1>}, {transform_indices = @transform_1, window_bounds = array<i64: 8, 576>}, {pipeline_mode = #tpu.pipeline_mode<synchronous>, transform_indices = @transform_2, window_bounds = array<i64: 576, 96>}, {pipeline_mode = #tpu.pipeline_mode<synchronous>, transform_indices = @transform_3, window_bounds = array<i64: 1, 96>}, {transform_indices = @transform_4, window_bounds = array<i64: 8, 96>}]} {
    %c0 = arith.constant 0 : index
    %c0_0 = arith.constant 0 : index
    %0 = vector.load %arg2[%c0, %c0_0] : memref<8x576xbf16, #tpu.memory_space<vmem>>, vector<8x576xbf16>
    %c0_1 = arith.constant 0 : index
    %c0_2 = arith.constant 0 : index
    %1 = vector.load %arg3[%c0_1, %c0_2] : memref<576x96xbf16, #tpu.memory_space<vmem>>, vector<576x96xbf16>
    %cst = arith.constant dense<0.000000e+00> : vector<8x96xf32>
    %2 = tpu.matmul %0, %1, %cst {dimension_numbers = #tpu.dot_dimension_numbers<[1], [0], [0], [1], [0, 0, 1, 1], [], []>} : vector<8x576xbf16>, vector<576x96xbf16>, vector<8x96xf32> -> vector<8x96xf32>
    %c0_3 = arith.constant 0 : index
    %c0_4 = arith.constant 0 : index
    %3 = vector.load %arg4[%c0_3, %c0_4] : memref<1x96xf32, #tpu.memory_space<vmem>>, vector<1x96xf32>
    %4 = vector.broadcast %3 : vector<1x96xf32> to vector<8x96xf32>
    %5 = arith.addf %2, %4 : vector<8x96xf32>
    %c0_5 = arith.constant 0 : index
    %6 = memref.load %arg1[%c0_5] : memref<1xf32, #tpu.memory_space<smem>>
    %cst_6 = arith.constant 0.000000e+00 : f32
    %7 = vector.broadcast %cst_6 : f32 to vector<8x96xf32>
    %8 = arith.cmpf oge, %5, %7 : vector<8x96xf32>
    %9 = vector.broadcast %6 : f32 to vector<8x96xf32>
    %10 = arith.mulf %9, %5 : vector<8x96xf32>
    %11 = arith.select %8, %5, %10 : vector<8x96xi1>, vector<8x96xf32>
    %12 = arith.truncf %11 : vector<8x96xf32> to vector<8x96xbf16>
    %c0_7 = arith.constant 0 : index
    %c0_8 = arith.constant 0 : index
    %13 = vector.load %arg5[%c0_7, %c0_8] : memref<8x96xbf16, #tpu.memory_space<vmem>>, vector<8x96xbf16>
    tpu.vector_store %arg5[%c0_7, %c0_8], %12 {strides = array<i32>} : memref<8x96xbf16, #tpu.memory_space<vmem>>, vector<8x96xbf16>,
    return
  }
  func.func @transform_0(%arg0: i32) -> i32 {
    %c0_i32 = arith.constant 0 : i32
    %c0_i32_0 = arith.constant 0 : i32
    return %c0_i32 : i32
  }
  func.func @transform_1(%arg0: i32) -> (i32, i32) {
    %c0_i32 = arith.constant 0 : i32
    %c0_i32_0 = arith.constant 0 : i32
    return %arg0, %c0_i32 : i32, i32
  }
  func.func @transform_2(%arg0: i32) -> (i32, i32) {
    %c0_i32 = arith.constant 0 : i32
    %c0_i32_0 = arith.constant 0 : i32
    %c0_i32_1 = arith.constant 0 : i32
    return %c0_i32, %c0_i32_0 : i32, i32
  }
  func.func @transform_3(%arg0: i32) -> (i32, i32) {
    %c0_i32 = arith.constant 0 : i32
    %c0_i32_0 = arith.constant 0 : i32
    %c0_i32_1 = arith.constant 0 : i32
    return %c0_i32, %c0_i32_0 : i32, i32
  }
  func.func @transform_4(%arg0: i32) -> (i32, i32) {
    %c0_i32 = arith.constant 0 : i32
    %c0_i32_0 = arith.constant 0 : i32
    return %arg0, %c0_i32 : i32, i32
  }
}

module attributes {stable_mosaic.version = 11 : i64} {
  func.func @_halo_conv_s1_kernel(%arg0: i32, %arg1: i32, %arg2: memref<1xf32, #tpu.memory_space<smem>>, %arg3: memref<1x2x2x96xbf16, #tpu.memory_space<vmem>>, %arg4: memref<1x1x2x96xbf16, #tpu.memory_space<vmem>>, %arg5: memref<1x1x2x96xbf16, #tpu.memory_space<vmem>>, %arg6: memref<864x96xbf16, #tpu.memory_space<vmem>>, %arg7: memref<1x96xf32, #tpu.memory_space<vmem>>, %arg8: memref<1x2x2x96xbf16, #tpu.memory_space<vmem>>) attributes {dimension_semantics = [#tpu.dimension_semantics<parallel>, #tpu.dimension_semantics<parallel>], iteration_bounds = array<i64: 2, 1>, scalar_prefetch = 0 : i64, scratch_operands = 0 : i64, tpu.core_type = #tpu.core_type<tc>, window_params = [{transform_indices = @transform_0, window_bounds = array<i64: 1>}, {transform_indices = @transform_1, window_bounds = array<i64: 1, 2, 2, 96>}, {transform_indices = @transform_2, window_bounds = array<i64: 1, 1, 2, 96>}, {transform_indices = @transform_3, window_bounds = array<i64: 1, 1, 2, 96>}, {pipeline_mode = #tpu.pipeline_mode<synchronous>, transform_indices = @transform_4, window_bounds = array<i64: 864, 96>}, {pipeline_mode = #tpu.pipeline_mode<synchronous>, transform_indices = @transform_5, window_bounds = array<i64: 1, 96>}, {transform_indices = @transform_6, window_bounds = array<i64: 1, 2, 2, 96>}]} {
    %c0 = arith.constant 0 : index
    %c0_0 = arith.constant 0 : index
    %0 = vector.load %arg6[%c0, %c0_0] : memref<864x96xbf16, #tpu.memory_space<vmem>>, vector<864x96xbf16>
    %c0_1 = arith.constant 0 : index
    %c0_2 = arith.constant 0 : index
    %1 = vector.load %arg7[%c0_1, %c0_2] : memref<1x96xf32, #tpu.memory_space<vmem>>, vector<1x96xf32>
    %c0_3 = arith.constant 0 : index
    %2 = memref.load %arg2[%c0_3] : memref<1xf32, #tpu.memory_space<smem>>
    %cst = arith.constant 0.000000e+00 : bf16
    %3 = vector.broadcast %cst : bf16 to vector<1x96xbf16>
    %c0_i32 = arith.constant 0 : i32
    %4 = arith.cmpi sgt, %arg1, %c0_i32 : i32
    %c0_4 = arith.constant 0 : index
    %c0_5 = arith.constant 0 : index
    %c0_6 = arith.constant 0 : index
    %c0_7 = arith.constant 0 : index
    %5 = vector.load %arg4[%c0_4, %c0_5, %c0_6, %c0_7] : memref<1x1x2x96xbf16, #tpu.memory_space<vmem>>, vector<1x1x2x96xbf16>
    %6 = vector.shape_cast %5 : vector<1x1x2x96xbf16> to vector<2x96xbf16>
    %cst_8 = arith.constant 0.000000e+00 : bf16
    %7 = vector.broadcast %cst_8 : bf16 to vector<2x96xbf16>
    %8 = arith.select %4, %6, %7 : vector<2x96xbf16>
    %c0_i32_9 = arith.constant 0 : i32
    %9 = arith.cmpi slt, %arg1, %c0_i32_9 : i32
    %c0_10 = arith.constant 0 : index
    %c0_11 = arith.constant 0 : index
    %c0_12 = arith.constant 0 : index
    %c0_13 = arith.constant 0 : index
    %10 = vector.load %arg5[%c0_10, %c0_11, %c0_12, %c0_13] : memref<1x1x2x96xbf16, #tpu.memory_space<vmem>>, vector<1x1x2x96xbf16>
    %11 = vector.shape_cast %10 : vector<1x1x2x96xbf16> to vector<2x96xbf16>
    %cst_14 = arith.constant 0.000000e+00 : bf16
    %12 = vector.broadcast %cst_14 : bf16 to vector<2x96xbf16>
    %13 = arith.select %9, %11, %12 : vector<2x96xbf16>
    %14 = vector.extract_strided_slice %8 {offsets = [0, 0], sizes = [1, 96], strides = [1, 1]} : vector<2x96xbf16> to vector<1x96xbf16>
    %15 = tpu.concatenate %3, %14 in 0 : vector<1x96xbf16>, vector<1x96xbf16> -> vector<2x96xbf16>
    %16 = vector.extract_strided_slice %8 {offsets = [1, 0], sizes = [1, 96], strides = [1, 1]} : vector<2x96xbf16> to vector<1x96xbf16>
    %17 = tpu.concatenate %16, %3 in 0 : vector<1x96xbf16>, vector<1x96xbf16> -> vector<2x96xbf16>
    %c0_15 = arith.constant 0 : index
    %c0_16 = arith.constant 0 : index
    %c0_17 = arith.constant 0 : index
    %c0_18 = arith.constant 0 : index
    %18 = vector.load %arg3[%c0_15, %c0_16, %c0_17, %c0_18] : memref<1x2x2x96xbf16, #tpu.memory_space<vmem>>, vector<1x1x2x96xbf16>
    %19 = vector.shape_cast %18 : vector<1x1x2x96xbf16> to vector<2x96xbf16>
    %20 = vector.extract_strided_slice %19 {offsets = [0, 0], sizes = [1, 96], strides = [1, 1]} : vector<2x96xbf16> to vector<1x96xbf16>
    %21 = tpu.concatenate %3, %20 in 0 : vector<1x96xbf16>, vector<1x96xbf16> -> vector<2x96xbf16>
    %22 = vector.extract_strided_slice %19 {offsets = [1, 0], sizes = [1, 96], strides = [1, 1]} : vector<2x96xbf16> to vector<1x96xbf16>
    %23 = tpu.concatenate %22, %3 in 0 : vector<1x96xbf16>, vector<1x96xbf16> -> vector<2x96xbf16>
    %c0_19 = arith.constant 0 : index
    %c1 = arith.constant 1 : index
    %c0_20 = arith.constant 0 : index
    %c0_21 = arith.constant 0 : index
    %24 = vector.load %arg3[%c0_19, %c1, %c0_20, %c0_21] : memref<1x2x2x96xbf16, #tpu.memory_space<vmem>>, vector<1x1x2x96xbf16>
    %25 = vector.shape_cast %24 : vector<1x1x2x96xbf16> to vector<2x96xbf16>
    %26 = vector.extract_strided_slice %25 {offsets = [0, 0], sizes = [1, 96], strides = [1, 1]} : vector<2x96xbf16> to vector<1x96xbf16>
    %27 = tpu.concatenate %3, %26 in 0 : vector<1x96xbf16>, vector<1x96xbf16> -> vector<2x96xbf16>
    %28 = vector.extract_strided_slice %25 {offsets = [1, 0], sizes = [1, 96], strides = [1, 1]} : vector<2x96xbf16> to vector<1x96xbf16>
    %29 = tpu.concatenate %28, %3 in 0 : vector<1x96xbf16>, vector<1x96xbf16> -> vector<2x96xbf16>
    %30 = tpu.concatenate %15, %8, %17, %21, %19, %23, %27, %25, %29 in 1 : vector<2x96xbf16>, vector<2x96xbf16>, vector<2x96xbf16>, vector<2x96xbf16>, vector<2x96xbf16>, vector<2x96xbf16>, vector<2x96xbf16>, vector<2x96xbf16>, vector<2x96xbf16> -> vector<2x864xbf16>
    %cst_22 = arith.constant dense<0.000000e+00> : vector<2x96xf32>
    %31 = tpu.matmul %30, %0, %cst_22 {dimension_numbers = #tpu.dot_dimension_numbers<[1], [0], [0], [1], [0, 0, 1, 1], [], []>} : vector<2x864xbf16>, vector<864x96xbf16>, vector<2x96xf32> -> vector<2x96xf32>
    %32 = vector.broadcast %1 : vector<1x96xf32> to vector<2x96xf32>
    %33 = arith.addf %31, %32 : vector<2x96xf32>
    %cst_23 = arith.constant 0.000000e+00 : f32
    %34 = vector.broadcast %cst_23 : f32 to vector<2x96xf32>
    %35 = arith.cmpf oge, %33, %34 : vector<2x96xf32>
    %36 = vector.broadcast %2 : f32 to vector<2x96xf32>
    %37 = arith.mulf %36, %33 : vector<2x96xf32>
    %38 = arith.select %35, %33, %37 : vector<2x96xi1>, vector<2x96xf32>
    %39 = arith.truncf %38 : vector<2x96xf32> to vector<2x96xbf16>
    %c0_24 = arith.constant 0 : index
    %c0_25 = arith.constant 0 : index
    %c0_26 = arith.constant 0 : index
    %c0_27 = arith.constant 0 : index
    %40 = vector.load %arg8[%c0_24, %c0_25, %c0_26, %c0_27] : memref<1x2x2x96xbf16, #tpu.memory_space<vmem>>, vector<1x1x2x96xbf16>
    %41 = vector.shape_cast %40 : vector<1x1x2x96xbf16> to vector<2x96xbf16>
    %42 = vector.shape_cast %39 : vector<2x96xbf16> to vector<1x1x2x96xbf16>
    tpu.vector_store %arg8[%c0_24, %c0_25, %c0_26, %c0_27], %42 {strides = array<i32>} : memref<1x2x2x96xbf16, #tpu.memory_space<vmem>>, vector<1x1x2x96xbf16>,
    %c0_28 = arith.constant 0 : index
    %c0_29 = arith.constant 0 : index
    %c0_30 = arith.constant 0 : index
    %c0_31 = arith.constant 0 : index
    %43 = vector.load %arg3[%c0_28, %c0_29, %c0_30, %c0_31] : memref<1x2x2x96xbf16, #tpu.memory_space<vmem>>, vector<1x1x2x96xbf16>
    %44 = vector.shape_cast %43 : vector<1x1x2x96xbf16> to vector<2x96xbf16>
    %45 = vector.extract_strided_slice %44 {offsets = [0, 0], sizes = [1, 96], strides = [1, 1]} : vector<2x96xbf16> to vector<1x96xbf16>
    %46 = tpu.concatenate %3, %45 in 0 : vector<1x96xbf16>, vector<1x96xbf16> -> vector<2x96xbf16>
    %47 = vector.extract_strided_slice %44 {offsets = [1, 0], sizes = [1, 96], strides = [1, 1]} : vector<2x96xbf16> to vector<1x96xbf16>
    %48 = tpu.concatenate %47, %3 in 0 : vector<1x96xbf16>, vector<1x96xbf16> -> vector<2x96xbf16>
    %c0_32 = arith.constant 0 : index
    %c1_33 = arith.constant 1 : index
    %c0_34 = arith.constant 0 : index
    %c0_35 = arith.constant 0 : index
    %49 = vector.load %arg3[%c0_32, %c1_33, %c0_34, %c0_35] : memref<1x2x2x96xbf16, #tpu.memory_space<vmem>>, vector<1x1x2x96xbf16>
    %50 = vector.shape_cast %49 : vector<1x1x2x96xbf16> to vector<2x96xbf16>
    %51 = vector.extract_strided_slice %50 {offsets = [0, 0], sizes = [1, 96], strides = [1, 1]} : vector<2x96xbf16> to vector<1x96xbf16>
    %52 = tpu.concatenate %3, %51 in 0 : vector<1x96xbf16>, vector<1x96xbf16> -> vector<2x96xbf16>
    %53 = vector.extract_strided_slice %50 {offsets = [1, 0], sizes = [1, 96], strides = [1, 1]} : vector<2x96xbf16> to vector<1x96xbf16>
    %54 = tpu.concatenate %53, %3 in 0 : vector<1x96xbf16>, vector<1x96xbf16> -> vector<2x96xbf16>
    %55 = vector.extract_strided_slice %13 {offsets = [0, 0], sizes = [1, 96], strides = [1, 1]} : vector<2x96xbf16> to vector<1x96xbf16>
    %56 = tpu.concatenate %3, %55 in 0 : vector<1x96xbf16>, vector<1x96xbf16> -> vector<2x96xbf16>
    %57 = vector.extract_strided_slice %13 {offsets = [1, 0], sizes = [1, 96], strides = [1, 1]} : vector<2x96xbf16> to vector<1x96xbf16>
    %58 = tpu.concatenate %57, %3 in 0 : vector<1x96xbf16>, vector<1x96xbf16> -> vector<2x96xbf16>
    %59 = tpu.concatenate %46, %44, %48, %52, %50, %54, %56, %13, %58 in 1 : vector<2x96xbf16>, vector<2x96xbf16>, vector<2x96xbf16>, vector<2x96xbf16>, vector<2x96xbf16>, vector<2x96xbf16>, vector<2x96xbf16>, vector<2x96xbf16>, vector<2x96xbf16> -> vector<2x864xbf16>
    %cst_36 = arith.constant dense<0.000000e+00> : vector<2x96xf32>
    %60 = tpu.matmul %59, %0, %cst_36 {dimension_numbers = #tpu.dot_dimension_numbers<[1], [0], [0], [1], [0, 0, 1, 1], [], []>} : vector<2x864xbf16>, vector<864x96xbf16>, vector<2x96xf32> -> vector<2x96xf32>
    %61 = vector.broadcast %1 : vector<1x96xf32> to vector<2x96xf32>
    %62 = arith.addf %60, %61 : vector<2x96xf32>
    %cst_37 = arith.constant 0.000000e+00 : f32
    %63 = vector.broadcast %cst_37 : f32 to vector<2x96xf32>
    %64 = arith.cmpf oge, %62, %63 : vector<2x96xf32>
    %65 = vector.broadcast %2 : f32 to vector<2x96xf32>
    %66 = arith.mulf %65, %62 : vector<2x96xf32>
    %67 = arith.select %64, %62, %66 : vector<2x96xi1>, vector<2x96xf32>
    %68 = arith.truncf %67 : vector<2x96xf32> to vector<2x96xbf16>
    %c0_38 = arith.constant 0 : index
    %c1_39 = arith.constant 1 : index
    %c0_40 = arith.constant 0 : index
    %c0_41 = arith.constant 0 : index
    %69 = vector.load %arg8[%c0_38, %c1_39, %c0_40, %c0_41] : memref<1x2x2x96xbf16, #tpu.memory_space<vmem>>, vector<1x1x2x96xbf16>
    %70 = vector.shape_cast %69 : vector<1x1x2x96xbf16> to vector<2x96xbf16>
    %71 = vector.shape_cast %68 : vector<2x96xbf16> to vector<1x1x2x96xbf16>
    tpu.vector_store %arg8[%c0_38, %c1_39, %c0_40, %c0_41], %71 {strides = array<i32>} : memref<1x2x2x96xbf16, #tpu.memory_space<vmem>>, vector<1x1x2x96xbf16>,
    return
  }
  func.func @transform_0(%arg0: i32, %arg1: i32) -> i32 {
    %c0_i32 = arith.constant 0 : i32
    %c0_i32_0 = arith.constant 0 : i32
    return %c0_i32 : i32
  }
  func.func @transform_1(%arg0: i32, %arg1: i32) -> (i32, i32, i32, i32) {
    %c0_i32 = arith.constant 0 : i32
    %c0_i32_0 = arith.constant 0 : i32
    %c0_i32_1 = arith.constant 0 : i32
    return %arg0, %arg1, %c0_i32, %c0_i32_0 : i32, i32, i32, i32
  }
  func.func @transform_2(%arg0: i32, %arg1: i32) -> (i32, i32, i32, i32) {
    %c2_i32 = arith.constant 2 : i32
    %0 = arith.muli %arg1, %c2_i32 : i32
    %c1_i32 = arith.constant 1 : i32
    %1 = arith.subi %0, %c1_i32 : i32
    %c0_i32 = arith.constant 0 : i32
    %2 = arith.maxsi %1, %c0_i32 : i32
    %c0_i32_0 = arith.constant 0 : i32
    %c0_i32_1 = arith.constant 0 : i32
    %c0_i32_2 = arith.constant 0 : i32
    return %arg0, %2, %c0_i32_0, %c0_i32_1 : i32, i32, i32, i32
  }
  func.func @transform_3(%arg0: i32, %arg1: i32) -> (i32, i32, i32, i32) {
    %c2_i32 = arith.constant 2 : i32
    %0 = arith.muli %arg1, %c2_i32 : i32
    %c2_i32_0 = arith.constant 2 : i32
    %1 = arith.addi %0, %c2_i32_0 : i32
    %c1_i32 = arith.constant 1 : i32
    %2 = arith.minsi %1, %c1_i32 : i32
    %c0_i32 = arith.constant 0 : i32
    %c0_i32_1 = arith.constant 0 : i32
    %c0_i32_2 = arith.constant 0 : i32
    return %arg0, %2, %c0_i32, %c0_i32_1 : i32, i32, i32, i32
  }
  func.func @transform_4(%arg0: i32, %arg1: i32) -> (i32, i32) {
    %c0_i32 = arith.constant 0 : i32
    %c0_i32_0 = arith.constant 0 : i32
    %c0_i32_1 = arith.constant 0 : i32
    return %c0_i32, %c0_i32_0 : i32, i32
  }
  func.func @transform_5(%arg0: i32, %arg1: i32) -> (i32, i32) {
    %c0_i32 = arith.constant 0 : i32
    %c0_i32_0 = arith.constant 0 : i32
    %c0_i32_1 = arith.constant 0 : i32
    return %c0_i32, %c0_i32_0 : i32, i32
  }
  func.func @transform_6(%arg0: i32, %arg1: i32) -> (i32, i32, i32, i32) {
    %c0_i32 = arith.constant 0 : i32
    %c0_i32_0 = arith.constant 0 : i32
    %c0_i32_1 = arith.constant 0 : i32
    return %arg0, %arg1, %c0_i32, %c0_i32_0 : i32, i32, i32, i32
  }
}

</mosaic_0001>

<bundles_post_ra>
// kernel: feature_extractor.6
= control target key start
LH: loop header
LB: loop body
LE: loop exit
PB: predicated region body
PF: predicated region fallthrough
CT: control target
= control target key end

     0   :  { %s397_s17 = smov 0   ;;  %s426_s0 = inlined_call_operand.<no memory space> [shape: f32[1], index: 0, kind: input, shape index: {}]   ;;  %s427_s1 = inlined_call_operand.vmem [shape: bf16[128,27], index: 1, kind: input, shape index: {}]   ;;  %s428_s2 = inlined_call_operand.vmem [shape: bf16[27,32], index: 2, kind: input, shape index: {}]   ;;  %s429_s3 = inlined_call_operand.vmem [shape: f32[1,32], index: 3, kind: input, shape index: {}]   ;;  %s430_s4 = inlined_call_operand.vmem [shape: bf16[128,32], index: 4, kind: output, shape index: {}]  }
   0x1   :  { %9 = sst [smem:[#allocation2]] %s426_s0 }
   0x2 LB: > { %s323_s18 = sadd.s32 4294967295, %s366_s17   ;;  %p327_p0 = scmp.ge.s32.totalorder %s366_s17, 1  ;;  %s366_s17 = sphi %s397_s17, %s15_s17  }
   0x3   : > { %p164_p1 = scmp.lt.s32.totalorder %s366_s17, 9 }
   0x5   : > { %p165_p2 = pnand %p327_p0, %p164_p1 }
   0x6   : > { %s328_s22 = sshll.u32 (!%p165_p2), %s323_s18, 1  ;;  %s254_s29 = sld [smem:[#allocation2]] (!%p165_p2) }
   0x7   : > { %168 = sbr.rel (%p165_p2) target bundleno = 167 (0xa7), region = 36  ;;  %p191_p3 = scmp.lt.s32.totalorder (!%p165_p2), %s328_s22, 15 }
   0xc   : > { %v342_v0 = vld [vmem:[%s428_s2 + $0x8] sm:$0xf]  ;;  %v349_v1 = vld [vmem:[%s428_s2 + $0x8] sm:$0x30]  ;;  %vm233_vm0 = vcmask 1044480   ;;  %vm234_vm1 = vcmask 1045504   ;;  %v257_v11 = vstv %s254_s29 }
   0xd   : > { %v343_v2 = vor.u32 %v349_v1, %v342_v0  ;;  %v368_v3 = vmov 65535   ;;  %s432_s22 = smov (!%p191_p3, %s328_s22), 15  ;;  %v348_v7 = vld [vmem:[%s428_s2] sm:$0xff]  ;;  %vm229_vm2 = vcmask 220160   ;;  %vm264_vm4 = vcmask 257024  }
   0xe   : > { %v235_v4 = vsel %vm233_vm0, 4294967295, %v368_v3  ;;  %s329_s25 = sshll.u32 %s432_s22, 2  ;;  %v359_v9 = vld [vmem:[%s429_s3] ss:$0 sm:$0xff] }
   0xf   : > { %v236_v5 = vsel %vm234_vm1, %v235_v4, 0  ;;  %s194_s28 = scalar_lea.vmem %s427_s1, %s329_s25  ;;  %s200_s8 = scalar_lea.vmem %s430_s4, %s329_s25 }
  0x10   : > { %v238_v6 = vand.u32 %v343_v2, %v236_v5  ;;  %v347_v8 = vld [vmem:[%s194_s28] sm:$0xff] }
  0x12   : > { %246 = vmatpush.bf16.msra.mxu0 %v238_v6 }
  0x16   : > { %247 = vmatpush.bf16.msra.mxu0 %v348_v7 }
  0x19   : > { %344 = vmatmul.msk.bf16.vlgmr.msra.gmra.mxu0 %vm229_vm2, %v347_v8 }
  0x96   : > { %v249_v10 = vpop.f32.mrf.mxu0 }
  0x97   : > { %v250_v12 = vadd.f32 %v359_v9, %v249_v10 }
  0x99   : > { %vm255_vm3 = vcmp.ge.f32.partialorder %v250_v12, 0.0  ;;  %v258_v13 = vmul.f32 %v257_v11, %v250_v12 }
  0x9b   : > { %v260_v14 = vsel %vm255_vm3, %v250_v12, %v258_v13 }
  0x9c   : > { %v262_v15 = vpack.c.bf16 %v260_v14, %v260_v14 }
  0x9e   : > { %265 = vst.msk [vmem:[%s200_s8] sm:$0xf] %vm264_vm4, %v262_v15  ;;  %v251_v16 = vpop.f32.mrf.mxu0 }
  0x9f   : > { %v252_v17 = vadd.f32 %v359_v9, %v251_v16 }
  0xa1   : > { %vm256_vm5 = vcmp.ge.f32.partialorder %v252_v17, 0.0  ;;  %v259_v18 = vmul.f32 %v257_v11, %v252_v17 }
  0xa3   : > { %v261_v19 = vsel %vm256_vm5, %v252_v17, %v259_v18 }
  0xa4   : > { %v263_v20 = vpack.c.bf16 %v261_v19, %v261_v19 }
  0xa6   : > { %266 = vst.msk [vmem:[%s200_s8 + $0x4] sm:$0xf] %vm264_vm4, %v263_v20 }
  0xa7 PF: > { %s15_s17 = sadd.s32 1, %s366_s17  }
  0xa8   : > { %p12_p4 = scmp.ge.s32.totalorder %s15_s17, 10  }
  0xaa   :  { %14 = sbr.rel (!%p12_p4) target bundleno = 2 (0x2), region = 66 }

// kernel: feature_extractor.8
= control target key start
LH: loop header
LB: loop body
LE: loop exit
PB: predicated region body
PF: predicated region fallthrough
CT: control target
= control target key end

     0   :  { %s608_s17 = smov 0   ;;  %s686_s0 = inlined_call_operand.<no memory space> [shape: f32[1], index: 0, kind: input, shape index: {}]   ;;  %s687_s1 = inlined_call_operand.vmem [shape: bf16[32,288], index: 1, kind: input, shape index: {}]   ;;  %s688_s2 = inlined_call_operand.vmem [shape: bf16[288,64], index: 2, kind: input, shape index: {}]   ;;  %s689_s3 = inlined_call_operand.vmem [shape: f32[1,64], index: 3, kind: input, shape index: {}]   ;;  %s690_s4 = inlined_call_operand.vmem [shape: bf16[32,64], index: 4, kind: output, shape index: {}]  }
   0x1   :  { %9 = sst [smem:[#allocation2]] %s686_s0 }
   0x2 LB: > { %s462_s18 = sadd.s32 4294967295, %s578_s17   ;;  %p466_p0 = scmp.ge.s32.totalorder %s578_s17, 1  ;;  %s578_s17 = sphi %s608_s17, %s15_s17  }
   0x3   : > { %p163_p1 = scmp.lt.s32.totalorder %s578_s17, 5 }
   0x5   : > { %p164_p2 = pnand %p466_p0, %p163_p1 }
   0x6   : > { %p188_p3 = scmp.lt.s32.totalorder (!%p164_p2), %s462_s18, 3  ;;  %s401_s7 = sld [smem:[#allocation2]] (!%p164_p2) }
   0x7   : > { %167 = sbr.rel (%p164_p2) target bundleno = 182 (0xb6), region = 36 }
   0xc   : > { %v551_v0 = vld [vmem:[%s688_s2 + $0x38] sm:$0xff]  ;;  %v550_v2 = vld [vmem:[%s688_s2 + $0x30] sm:$0xff]  ;;  %v561_v4 = vld [vmem:[%s688_s2 + $0x88] sm:$0xff]  ;;  %s692_s18 = smov (!%p188_p3, %s462_s18), 3  ;;  %vm358_vm0 = vcmask 261120   ;;  %v403_v33 = vstv %s401_s7  ;;  %vm407_vm2 = vcmask 519168  }
   0xd   : > { %v559_v1 = vld [vmem:[%s688_s2 + $0x78] sm:$0xff]  ;;  %362 = vmatpush.bf16.msra.mxu0 %v551_v0  ;;  %v558_v3 = vld [vmem:[%s688_s2 + $0x70] sm:$0xff]  ;;  %394 = vmatpush.bf16.msra.mxu2 %v561_v4  ;;  %v560_v5 = vld [vmem:[%s688_s2 + $0x80] sm:$0xff]  ;;  %s562_s30 = smul.u32 12, %s692_s18  ;;  %s468_s10 = sshll.u32 %s692_s18, 2 }
   0xe   : > { %375 = vmatpush.bf16.msra.mxu1 %v559_v1  ;;  %v549_v6 = vld [vmem:[%s688_s2 + $0x28] sm:$0xff]  ;;  %v548_v10 = vld [vmem:[%s688_s2 + $0x20] sm:$0xff]  ;;  %v547_v13 = vld [vmem:[%s688_s2 + $0x18] sm:$0xff]  ;;  %s196_s13 = scalar_lea.vmem %s690_s4, %s468_s10 }
   0xf   : > { %v557_v7 = vld [vmem:[%s688_s2 + $0x68] sm:$0xff]  ;;  %s192_s11 = scalar_lea.vmem %s687_s1, %s562_s30  ;;  %v556_v11 = vld [vmem:[%s688_s2 + $0x60] sm:$0xff]  ;;  %v555_v14 = vld [vmem:[%s688_s2 + $0x58] sm:$0xff] }
  0x10   : > { %v199_v8 = vld [vmem:[%s192_s11 + $0x8] sm:$0xf]  ;;  %v546_v15 = vld [vmem:[%s688_s2 + $0x10] sm:$0xff]  ;;  %v198_v19 = vld [vmem:[%s192_s11] sm:$0xff] }
  0x11   : > { %363 = vmatpush.bf16.msra.mxu0 %v550_v2  ;;  %395 = vmatpush.bf16.msra.mxu2 %v560_v5  ;;  %v244_v9 = vunpack.c.l.b16 %v199_v8  ;;  %v554_v16 = vld [vmem:[%s688_s2 + $0x50] sm:$0xff]  ;;  %v545_v17 = vld [vmem:[%s688_s2 + $0x8] sm:$0xff]  ;;  %v242_v20 = vunpack.c.l.b16 %v198_v19  ;;  %v243_v21 = vunpack.c.h.b16 %v198_v19  ;;  %v544_v22 = vld [vmem:[%s688_s2] sm:$0xff] }
  0x12   : > { %376 = vmatpush.bf16.msra.mxu1 %v558_v3  ;;  %v553_v18 = vld [vmem:[%s688_s2 + $0x48] sm:$0xff]  ;;  %v552_v23 = vld [vmem:[%s688_s2 + $0x40] sm:$0xff] }
  0x13   : > { %v247_v12 = vpack.c.b16 %v244_v9, %v244_v9  ;;  %v245_v24 = vpack.c.b16 %v242_v20, %v242_v20  ;;  %v246_v25 = vpack.c.b16 %v243_v21, %v243_v21  ;;  %v571_v28 = vld [vmem:[%s689_s3] ss:$0 sm:$0xff] }
  0x15   : > { %364 = vmatpush.bf16.msra.mxu0 %v549_v6  ;;  %541 = vmatmul.msk.bf16.vlgmr.msra.gmra.mxu2 %vm358_vm0, %v247_v12 }
  0x16   : > { %377 = vmatpush.bf16.msra.mxu1 %v557_v7 }
  0x19   : > { %365 = vmatpush.bf16.msra.mxu0 %v548_v10 }
  0x1a   : > { %378 = vmatpush.bf16.msra.mxu1 %v556_v11 }
  0x1d   : > { %366 = vmatpush.bf16.msra.mxu0 %v547_v13 }
  0x1e   : > { %379 = vmatpush.bf16.msra.mxu1 %v555_v14 }
  0x21   : > { %367 = vmatpush.bf16.msra.mxu0 %v546_v15 }
  0x22   : > { %380 = vmatpush.bf16.msra.mxu1 %v554_v16 }
  0x25   : > { %368 = vmatpush.bf16.msra.mxu0 %v545_v17 }
  0x26   : > { %381 = vmatpush.bf16.msra.mxu1 %v553_v18 }
  0x29   : > { %369 = vmatpush.bf16.msra.mxu0 %v544_v22 }
  0x2a   : > { %382 = vmatpush.bf16.msra.mxu1 %v552_v23 }
  0x2c   : > { %370 = vmatmul.bf16.vlgmr.msra.gmra.mxu0 %v245_v24 }
  0x2d   : > { %383 = vmatmul.bf16.vlgmr.msra.gmra.mxu1 %v246_v25 }
  0x98   : > { %v397_v26 = vpop.f32.mrf.mxu2 }
  0xa0   : > { %v399_v27 = vpop.f32.mrf.mxu2 }
  0xa9   : > { %v371_v29 = vpop.f32.mrf.mxu0 }
  0xaa   : > { %v384_v30 = vpop.f32.mrf.mxu1  ;;  %v372_v31 = vadd.f32 %v571_v28, %v371_v29 }
  0xac   : > { %v385_v32 = vadd.f32 %v384_v30, %v372_v31 }
  0xae   : > { %v398_v34 = vadd.f32 %v397_v26, %v385_v32 }
  0xb0   : > { %vm402_vm1 = vcmp.ge.f32.partialorder %v398_v34, 0.0  ;;  %v404_v35 = vmul.f32 %v403_v33, %v398_v34 }
  0xb1   : > { %v373_v36 = vpop.f32.mrf.mxu0 }
  0xb2   : > { %v386_v37 = vpop.f32.mrf.mxu1  ;;  %v405_v38 = vsel %vm402_vm1, %v398_v34, %v404_v35 }
  0xb3   : > { %v406_v39 = vpack.c.bf16 %v405_v38, %v405_v38 }
  0xb5   : > { %408 = vst.msk [vmem:[%s196_s13] sm:$0xf] %vm407_vm2, %v406_v39 }
  0xb6 PF: > { %s15_s17 = sadd.s32 1, %s578_s17  }
  0xb7   : > { %p12_p4 = scmp.ge.s32.totalorder %s15_s17, 6  }
  0xb9   :  { %14 = sbr.rel (!%p12_p4) target bundleno = 2 (0x2), region = 66 }

// kernel: feature_extractor.7
= control target key start
LH: loop header
LB: loop body
LE: loop exit
PB: predicated region body
PF: predicated region fallthrough
CT: control target
= control target key end

     0   :  { %s1998_s23 = smov 0   ;;  %s2000_s24 = smov 0   ;;  %s2810_s0 = inlined_call_operand.<no memory space> [shape: f32[1], index: 0, kind: input, shape index: {}]   ;;  %s2811_s1 = inlined_call_operand.vmem [shape: bf16[2,8,8,32], index: 1, kind: input, shape index: {}, may-alias: {1,2,3}]   ;;  %s2812_s2 = inlined_call_operand.vmem [shape: bf16[2,8,8,32], index: 2, kind: input, shape index: {}, may-alias: {1,2,3}]   ;;  %s2813_s3 = inlined_call_operand.vmem [shape: bf16[2,8,8,32], index: 3, kind: input, shape index: {}, may-alias: {1,2,3}]   ;;  %s2814_s4 = inlined_call_operand.vmem [shape: bf16[288,32], index: 4, kind: input, shape index: {}]   ;;  %s2815_s5 = inlined_call_operand.vmem [shape: f32[1,32], index: 5, kind: input, shape index: {}]   ;;  %s2816_s6 = inlined_call_operand.vmem [shape: bf16[2,8,8,32], index: 6, kind: output, shape index: {}]  }
   0x1   :  { %11 = sst [smem:[#allocation2]] %s2810_s0  ;;  %s2002_s2 = smov 0  }
   0x2 LB: > { %s29_s0 = sadd.s32 1, %s1950_s24  ;;  %p1762_p0 = scmp.ge.s32.totalorder %s1954_s2, 1  ;;  %s1954_s2 = sphi %s2002_s2, %s17_s2   ;;  %s1950_s24 = sphi %s2000_s24, %s2864_s24   ;;  %s1946_s23 = sphi %s1998_s23, %s2863_s23  }
   0x3   : > { %p31_p1 = scmp.ge.s32.totalorder %s29_s0, 2  ;;  %p296_p2 = scmp.lt.s32.totalorder %s1954_s2, 3 }
   0x5   : > { %s2866_s0 = smov (%p31_p1, %s29_s0), 0  ;;  %p297_p3 = pnand %p1762_p0, %p296_p2 }
   0x6   : > { %p359_p4 = scmp.lt.s32.totalorder (!%p297_p3), %s1946_s23, 1  ;;  %s1957_s25 = smov (!%p297_p3), 32  }
   0x7   : > { %300 = sbr.rel (%p297_p3) target bundleno = 398 (0x18e), region = 44  ;;  %s1958_s29 = smov (!%p297_p3), 96  }
   0x8   : > { %s1959_s30 = smov (!%p297_p3), 64  }
   0xc   : > { %v1956_v0 = vmov 0   ;;  %s2868_s23 = smov (!%p359_p4, %s1946_s23), 1  ;;  %vm479_vm0 = vcmask 1043456   ;;  %vm480_vm1 = vsmask.f32 3328  ;;  %vm472_vm3 = vcmask 1040384  }
   0xd   : > { %v462_v1 = vunpack.c.l.b16 %v1956_v0  ;;  %s1880_s3 = sshll.u32 %s2868_s23, 5  ;;  %vm2062_vm2 = vmand %vm479_vm0, %vm480_vm1  ;;  %vm473_vm4 = vsmask.f32 256  ;;  %vm534_vm6 = vcmask 261120   ;;  %vm538_vm7 = vcmask 523264  }
   0xe   : > { %s2028_s28 = scalar_lea.vmem %s2811_s1, %s1880_s3  ;;  %vm2085_vm5 = vmand %vm472_vm3, %vm473_vm4  ;;  %vm541_vm8 = vcmask 785408   ;;  %v2758_v40 = vld [vmem:[%s2815_s5] ss:$0 sm:$0xff]  ;;  %s2769_s8 = scalar_lea.vmem %s2816_s6, %s1880_s3  ;;  %vm711_vm10 = vcmask 257024  }
   0xf   : > { %v2018_v2 = vpack.c.b16 %v462_v1, %v462_v1  ;;  %v2032_v4 = vld [vmem:[%s2028_s28 + $0x8] sm:$0xff]   ;;  %v2035_v5 = vld [vmem:[%s2028_s28 + $0x4] sm:$0xf]  ;;  %v2038_v6 = vld [vmem:[%s2028_s28] sm:$0xf] }
  0x10   : > { %v750_v7 = vunpack.c.l.b16 %v2032_v4  ;;  %v732_v8 = vunpack.c.l.b16 %v2035_v5  ;;  %v485_v9 = vunpack.c.l.b16 %v2038_v6  ;;  %v2044_v10 = vld [vmem:[%s2028_s28 + $0x4] sm:$0xff]   ;;  %v2113_v55 = vld [vmem:[%s2028_s28 + $0xc] sm:$0xf]  ;;  %v882_v63 = vunpack.c.h.b16 %v2032_v4 }
  0x11   : > { %518 = vrot.lane.b32.xlu0 %v2018_v2, %s1957_s25  ;;  %v468_v3 = vshll.u32 %v2018_v2, 16  ;;  %v465_v11 = vshrl.u32 %v2018_v2, 16  ;;  %v503_v13 = vunpack.c.l.b16 %v2044_v10  ;;  %v713_v17 = vld [vmem:[%s2028_s28] sm:$0xff]   ;;  %v2098_v47 = vld [vmem:[%s2028_s28 + $0x8] sm:$0xf]  ;;  %v996_v59 = vunpack.c.l.b16 %v2113_v55 }
  0x12   : > { %v2050_v14 = vpack.c.b16 %v750_v7, %v750_v7  ;;  %v733_v15 = vpack.c.b16 %v732_v8, %v732_v8  ;;  %v486_v16 = vpack.c.b16 %v485_v9, %v485_v9  ;;  %v715_v24 = vunpack.c.l.b16 %v713_v17  ;;  %v2129_v9 = vld [vmem:[%s2028_s28 + $0x10] sm:$0xff]  }
  0x13   : > { %v476_v12 = vrot.slane %v468_v3, 1  ;;  %v2053_v18 = vpack.c.b16 %v503_v13, %v503_v13  ;;  %v847_v45 = vunpack.c.h.b16 %v713_v17  ;;  %v864_v54 = vunpack.c.l.b16 %v2098_v47 }
  0x14   : > { %779 = vrot.lane.b32.xlu1 %v2050_v14, %s1958_s29  ;;  %v735_v19 = vshrl.u32 %v733_v15, 16  ;;  %v738_v20 = vshll.u32 %v733_v15, 16  ;;  %v2832_v21 = vshrl.u32 %v2050_v14, 16  ;;  %v491_v23 = vshll.u32 %v486_v16, 16 }
  0x15   : > { %v477_v22 = vor.u32 %v476_v12, %v465_v11  ;;  %532 = vrot.lane.b32.xlu2 %v2053_v18, %s1958_s29  ;;  %v506_v27 = vshrl.u32 %v2053_v18, 16  ;;  %v2837_v28 = vshll.u32 %v2050_v14, 16  ;;  %v509_v29 = vshll.u32 %v2053_v18, 16 }
  0x16   : > { %v743_v26 = vrot.slane %v738_v20, 1  ;;  %v755_v31 = vrot.slane %v2832_v21, 7  ;;  %v488_v32 = vshrl.u32 %v486_v16, 16  ;;  %v496_v35 = vrot.slane %v491_v23, 1 }
  0x17   : > { %v508_v33 = vrot.slane %v506_v27, 7  ;;  %v2075_v34 = vsel %vm2062_vm2, %v477_v22, 0  ;;  %v2077_v36 = vpack.c.b16 %v715_v24, %v715_v24  ;;  %v2107_v52 = vpack.c.b16 %v847_v45, %v847_v45 }
  0x18   : > { %v744_v30 = vor.u32 %v743_v26, %v735_v19  ;;  %v490_v39 = vrot.slane %v488_v32, 7  ;;  %v758_v41 = vor.u32 %v2837_v28, %v755_v31  ;;  %v497_v43 = vor.u32 %v496_v35, %v488_v32 }
  0x19   : > { %v511_v38 = vor.u32 %v509_v29, %v508_v33  ;;  %v721_v44 = vshll.u32 %v2077_v36, 16  ;;  %v718_v50 = vshrl.u32 %v2077_v36, 16  ;;  %v737_v56 = vrot.slane %v735_v19, 7 }
  0x1a   : > { %v746_v37 = vsel %vm2062_vm2, %v744_v30, 0  ;;  %v493_v46 = vor.u32 %v491_v23, %v490_v39  ;;  %v760_v48 = vsel %vm2085_vm5, 0, %v758_v41  ;;  %v499_v49 = vsel %vm2062_vm2, %v497_v43, 0 }
  0x1b   : > { %774 = vrot.lane.b32.xlu0 %v746_v37, %s1957_s25  ;;  %v513_v42 = vsel %vm2085_vm5, 0, %v511_v38  ;;  %v726_v51 = vrot.slane %v721_v44, 1  ;;  %v2830_v58 = vshll.u32 %v2107_v52, 16  ;;  %v865_v60 = vpack.c.b16 %v864_v54, %v864_v54  ;;  %v1859_v54 = vld [vmem:[%s2028_s28 + $0xc] sm:$0xff]  }
  0x1c   : > { %521 = vrot.lane.b32.xlu1 %v2075_v34, %s1959_s30  ;;  %v495_v53 = vsel %vm2085_vm5, 0, %v493_v46  ;;  %v740_v61 = vor.u32 %v738_v20, %v737_v56  ;;  %v2834_v1 = vshrl.u32 %v2107_v52, 16  ;;  %v997_v8 = vpack.c.b16 %v996_v59, %v996_v59 }
  0x1d   : > { %530 = vrot.lane.b32.xlu2 %v513_v42, %s1959_s30  ;;  %v727_v57 = vor.u32 %v726_v51, %v718_v50  ;;  %v867_v62 = vshrl.u32 %v865_v60, 16  ;;  %v858_v7 = vrot.slane %v2830_v58, 1  ;;  %v870_v4 = vshll.u32 %v865_v60, 16 }
  0x1e   : > { %v742_v12 = vsel %vm2085_vm5, 0, %v740_v61  ;;  %v1014_v15 = vunpack.c.l.b16 %v2129_v9  ;;  %v2137_v16 = vpack.c.b16 %v882_v63, %v882_v63  ;;  %v1002_v19 = vshll.u32 %v997_v8, 16  ;;  %v2184_v61 = vld [vmem:[%s2028_s28 + $0x10] sm:$0xf] }
  0x1f   : > { %v729_v0 = vsel %vm2062_vm2, %v727_v57, 0  ;;  %v869_v13 = vrot.slane %v867_v62, 7  ;;  %v859_v17 = vor.u32 %v858_v7, %v2834_v1  ;;  %v875_v23 = vrot.slane %v870_v4, 1 }
  0x20   : > { %v2827_v22 = vshrl.u32 %v2137_v16, 16  ;;  %v2143_v24 = vpack.c.b16 %v1014_v15, %v1014_v15  ;;  %v999_v30 = vshrl.u32 %v997_v8, 16  ;;  %v1007_v31 = vrot.slane %v1002_v19, 1 }
  0x21   : > { %v872_v20 = vor.u32 %v870_v4, %v869_v13  ;;  %v861_v26 = vsel %vm2062_vm2, %v859_v17, 0  ;;  %v2831_v35 = vshll.u32 %v2137_v16, 16  ;;  %v876_v37 = vor.u32 %v875_v23, %v867_v62  ;;  %v2198_v4 = vld [vmem:[%s2028_s28 + $0x14] sm:$0xf] }
  0x22   : > { %v887_v33 = vrot.slane %v2827_v22, 7  ;;  %v2824_v38 = vshrl.u32 %v2143_v24, 16  ;;  %v1008_v39 = vor.u32 %v1007_v31, %v999_v30  ;;  %v979_v41 = vunpack.c.h.b16 %v2044_v10  ;;  %v2372_v22 = vld [vmem:[%s2028_s28 + $0x1c] sm:$0xf] }
  0x23   : > { %777 = vrot.lane.b32.xlu0 %v760_v48, %s1959_s30  ;;  %v874_v32 = vsel %vm2085_vm5, 0, %v872_v20  ;;  %v878_v43 = vsel %vm2062_vm2, %v876_v37, 0  ;;  %v2826_v46 = vshll.u32 %v2143_v24, 16  ;;  %v1111_v57 = vunpack.c.l.b16 %v1859_v54 }
  0x24   : > { %527 = vrot.lane.b32.xlu1 %v499_v49, %s1957_s25  ;;  %v890_v42 = vor.u32 %v2831_v35, %v887_v33  ;;  %v1019_v45 = vrot.slane %v2824_v38, 7  ;;  %v1010_v48 = vsel %vm2062_vm2, %v1008_v39, 0  ;;  %v2167_v49 = vpack.c.b16 %v979_v41, %v979_v41  ;;  %v2224_v33 = vld [vmem:[%s2814_s4 + $0x38] sm:$0xff]  ;;  %v2232_v41 = vld [vmem:[%s2814_s4 + $0x88] sm:$0xff] }
  0x25   : > { %524 = vrot.lane.b32.xlu2 %v495_v53, %s1958_s29  ;;  %v1001_v62 = vrot.slane %v999_v30, 7  ;;  %v2189_v63 = vpack.c.b16 %v1111_v57, %v1111_v57  ;;  %v1128_v8 = vunpack.c.l.b16 %v2184_v61  ;;  %v1146_v39 = vunpack.c.h.b16 %v2129_v9  ;;  %667 = vmatpush.bf16.msra.mxu0 %v2224_v33  ;;  %v2243_v9 = vld [vmem:[%s2814_s4 + $0x70] sm:$0xff] }
  0x26   : > { %v892_v10 = vsel %vm2085_vm5, 0, %v890_v42  ;;  %v1022_v51 = vor.u32 %v2826_v46, %v1019_v45  ;;  %v2821_v53 = vshll.u32 %v2167_v49, 16  ;;  %v2825_v59 = vshrl.u32 %v2167_v49, 16  ;;  %v2248_v45 = vld [vmem:[%s2814_s4 + $0x30] sm:$0xff]  ;;  %699 = vmatpush.bf16.msra.mxu3 %v2232_v41 }
  0x27   : > { %v2819_v13 = vshll.u32 %v2189_v63, 16  ;;  %v2204_v20 = vpack.c.b16 %v1128_v8, %v1128_v8  ;;  %v2820_v30 = vshrl.u32 %v2189_v63, 16  ;;  %v2257_v57 = vpack.c.b16 %v1146_v39, %v1146_v39 }
  0x28   : > { %v1024_v56 = vsel %vm2085_vm5, 0, %v1022_v51  ;;  %v990_v60 = vrot.slane %v2821_v53, 1 }
  0x29   : > { %v1131_v37 = vshrl.u32 %v2204_v20, 16  ;;  %668 = vmatpush.bf16.msra.mxu0 %v2248_v45 }
  0x2a   : > { %v991_v7 = vor.u32 %v990_v60, %v2825_v59  ;;  %v2260_v60 = vld [vmem:[%s2028_s28 + $0x18] sm:$0xff]  }
  0x2b   : > { %765 = vrot.lane.b32.xlu0 %v2077_v36, %s1957_s25 }
  0x2c   : > { %768 = vrot.lane.b32.xlu1 %v729_v0, %s1959_s30  ;;  %v1243_v0 = vunpack.c.h.b16 %v1859_v54  ;;  %v993_v17 = vsel %vm2062_vm2, %v991_v7, 0  ;;  %v1133_v54 = vrot.slane %v1131_v37, 7 }
  0x2d   : > { %771 = vrot.lane.b32.xlu2 %v742_v12, %s1958_s29  ;;  %v1004_v12 = vor.u32 %v1002_v19, %v1001_v62  ;;  %v1122_v19 = vrot.slane %v2819_v13, 1 }
  0x2e   : > { %v2200_v15 = vpack.c.b16 %v1243_v0, %v1243_v0 }
  0x2f   : > { %v1006_v23 = vsel %vm2085_vm5, 0, %v1004_v12  ;;  %v2279_v12 = vld [vmem:[%s2814_s4 + $0x68] sm:$0xff] }
  0x30   : > { %v2817_v31 = vshll.u32 %v2200_v15, 16 }
  0x33   : > { %897 = vrot.lane.b32.xlu0 %v2107_v52, %s1957_s25 }
  0x34   : > { %900 = vrot.lane.b32.xlu1 %v861_v26, %s1959_s30  ;;  %v1260_v26 = vunpack.c.l.b16 %v2198_v4 }
  0x35   : > { %903 = vrot.lane.b32.xlu2 %v874_v32, %s1958_s29  ;;  %v2219_v32 = vld [vmem:[%s2814_s4 + $0x78] sm:$0xff] }
  0x36   : > { %v2234_v42 = vpack.c.b16 %v1260_v26, %v1260_v26  ;;  %680 = vmatpush.bf16.msra.mxu1 %v2219_v32  ;;  %813 = vmatpush.bf16.msra.mxu2 %v2219_v32  ;;  %v2822_v26 = vshrl.u32 %v2257_v57, 16 }
  0x38   : > { %v1263_v51 = vshrl.u32 %v2234_v42, 16  ;;  %v1266_v8 = vshll.u32 %v2234_v42, 16  ;;  %v2395_v42 = vld [vmem:[%s2814_s4 + $0x8] sm:$0xff] }
  0x3a   : > { %681 = vmatpush.bf16.msra.mxu1 %v2243_v9  ;;  %v1265_v0 = vrot.slane %v1263_v51, 7  ;;  %814 = vmatpush.bf16.msra.mxu2 %v2243_v9 }
  0x3b   : > { %906 = vrot.lane.b32.xlu0 %v878_v43, %s1957_s25  ;;  %v1123_v43 = vor.u32 %v1122_v19, %v2820_v30  ;;  %v1278_v19 = vunpack.c.l.b16 %v2260_v60  ;;  %v2319_v30 = vld [vmem:[%s2028_s28 + $0x14] sm:$0xff]  }
  0x3c   : > { %1038 = vrot.lane.b32.xlu1 %v1010_v48, %s1957_s25  ;;  %v2818_v48 = vshrl.u32 %v2200_v15, 16  ;;  %v1268_v39 = vor.u32 %v1266_v8, %v1265_v0 }
  0x3d   : > { %909 = vrot.lane.b32.xlu2 %v892_v10, %s1959_s30  ;;  %v1254_v10 = vrot.slane %v2817_v31, 1  ;;  %v1125_v62 = vsel %vm2062_vm2, %v1123_v43, 0  ;;  %v2299_v43 = vld [vmem:[%s2814_s4 + $0x60] sm:$0xff]  ;;  %v1151_v31 = vrot.slane %v2822_v26, 7  ;;  %v2316_v13 = vpack.c.b16 %v1278_v19, %v1278_v19 }
  0x3e   : > { %682 = vmatpush.bf16.msra.mxu1 %v2279_v12  ;;  %815 = vmatpush.bf16.msra.mxu2 %v2279_v12  ;;  %v1270_v53 = vsel %vm2085_vm5, 0, %v1268_v39 }
  0x3f   : > { %v1255_v7 = vor.u32 %v1254_v10, %v2818_v48  ;;  %v2306_v10 = vld [vmem:[%s2814_s4 + $0x20] sm:$0xff]  ;;  %v2823_v48 = vshll.u32 %v2257_v57, 16  ;;  %v2828_v39 = vshrl.u32 %v2316_v13, 16  ;;  %v2829_v38 = vshll.u32 %v2316_v13, 16 }
  0x41   : > { %v1154_v19 = vor.u32 %v2823_v48, %v1151_v31  ;;  %v2357_v31 = vld [vmem:[%s2814_s4 + $0x10] sm:$0xff]  ;;  %v1283_v48 = vrot.slane %v2828_v39, 7 }
  0x42   : > { %683 = vmatpush.bf16.msra.mxu1 %v2299_v43  ;;  %816 = vmatpush.bf16.msra.mxu2 %v2299_v43 }
  0x43   : > { %1041 = vrot.lane.b32.xlu0 %v1024_v56, %s1959_s30  ;;  %v1134_v56 = vshll.u32 %v2204_v20, 16  ;;  %v2289_v20 = vld [vmem:[%s2814_s4 + $0x28] sm:$0xff]  ;;  %v1156_v26 = vsel %vm2085_vm5, 0, %v1154_v19  ;;  %v1286_v19 = vor.u32 %v2829_v38, %v1283_v48  ;;  %v2402_v48 = vld [vmem:[%s2814_s4 + $0x40] sm:$0xff] }
  0x44   : > { %911 = vrot.lane.b32.xlu1 %v2137_v16, %s1958_s29  ;;  %669 = vmatpush.bf16.msra.mxu0 %v2289_v20 }
  0x45   : > { %1043 = vrot.lane.b32.xlu2 %v2143_v24, %s1958_s29  ;;  %v1288_v38 = vsel %vm2085_vm5, 0, %v1286_v19 }
  0x48   : > { %670 = vmatpush.bf16.msra.mxu0 %v2306_v10 }
  0x4b   : > { %1029 = vrot.lane.b32.xlu0 %v2167_v49, %s1957_s25 }
  0x4c   : > { %1032 = vrot.lane.b32.xlu1 %v993_v17, %s1959_s30  ;;  %v2284_v17 = vld [vmem:[%s2814_s4 + $0x80] sm:$0xff] }
  0x4d   : > { %1035 = vrot.lane.b32.xlu2 %v1006_v23, %s1958_s29  ;;  %v1136_v23 = vor.u32 %v1134_v56, %v1133_v54  ;;  %700 = vmatpush.bf16.msra.mxu3 %v2284_v17  ;;  %v1257_v54 = vsel %vm2062_vm2, %v1255_v7, 0  ;;  %v2331_v7 = vld [vmem:[%s2814_s4 + $0x58] sm:$0xff] }
  0x4e   : > { %684 = vmatpush.bf16.msra.mxu1 %v2331_v7  ;;  %817 = vmatpush.bf16.msra.mxu2 %v2331_v7 }
  0x4f   : > { %v1138_v0 = vsel %vm2085_vm5, 0, %v1136_v23  ;;  %v2336_v23 = vld [vmem:[%s2814_s4 + $0x18] sm:$0xff] }
  0x50   : > { %671 = vmatpush.bf16.msra.mxu0 %v2336_v23 }
  0x51   : > { %800 = vmatpush.bf16.msrb.mxu3 %v2224_v33 }
  0x53   : > { %1161 = vrot.lane.b32.xlu0 %v2189_v63, %s1957_s25 }
  0x54   : > { %1293 = vrot.lane.b32.xlu1 %v2200_v15, %s1957_s25  ;;  %672 = vmatpush.bf16.msra.mxu0 %v2357_v31 }
  0x55   : > { %1164 = vrot.lane.b32.xlu2 %v1125_v62, %s1959_s30  ;;  %v1139_v62 = vrot.slane %v1134_v56, 1  ;;  %801 = vmatpush.bf16.msrb.mxu3 %v2248_v45 }
  0x57   : > { %v1140_v56 = vor.u32 %v1139_v62, %v1131_v37  ;;  %v2348_v37 = vld [vmem:[%s2814_s4 + $0x50] sm:$0xff]  ;;  %v2351_v62 = vld [vmem:[%s2028_s28 + $0x18] sm:$0xf] }
  0x58   : > { %v1392_v46 = vunpack.c.l.b16 %v2351_v62  ;;  %685 = vmatpush.bf16.msra.mxu1 %v2348_v37  ;;  %818 = vmatpush.bf16.msra.mxu2 %v2348_v37 }
  0x59   : > { %802 = vmatpush.bf16.msrb.mxu3 %v2289_v20  ;;  %673 = vmatpush.bf16.msra.mxu0 %v2395_v42 }
  0x5b   : > { %1296 = vrot.lane.b32.xlu0 %v1257_v54, %s1959_s30  ;;  %v1375_v54 = vunpack.c.l.b16 %v2319_v30 }
  0x5c   : > { %1167 = vrot.lane.b32.xlu1 %v1138_v0, %s1958_s29  ;;  %v1271_v0 = vrot.slane %v1266_v8, 1 }
  0x5d   : > { %1299 = vrot.lane.b32.xlu2 %v1270_v53, %s1958_s29  ;;  %v1142_v53 = vsel %vm2062_vm2, %v1140_v56, 0  ;;  %v2367_v59 = vpack.c.b16 %v1375_v54, %v1375_v54  ;;  %803 = vmatpush.bf16.msrb.mxu3 %v2306_v10  ;;  %v2384_v56 = vld [vmem:[%s2814_s4 + $0x48] sm:$0xff] }
  0x5e   : > { %v1272_v8 = vor.u32 %v1271_v0, %v1263_v51  ;;  %v1393_v51 = vpack.c.b16 %v1392_v46, %v1392_v46  ;;  %686 = vmatpush.bf16.msra.mxu1 %v2384_v56  ;;  %v1410_v46 = vunpack.c.h.b16 %v2260_v60  ;;  %819 = vmatpush.bf16.msra.mxu2 %v2384_v56 }
  0x5f   : > { %v2833_v54 = vshll.u32 %v2367_v59, 16  ;;  %v2836_v58 = vshrl.u32 %v2367_v59, 16 }
  0x60   : > { %v1274_v0 = vsel %vm2062_vm2, %v1272_v8, 0  ;;  %v1395_v39 = vshrl.u32 %v1393_v51, 16  ;;  %v1398_v60 = vshll.u32 %v1393_v51, 16  ;;  %v2426_v19 = vpack.c.b16 %v1410_v46, %v1410_v46 }
  0x61   : > { %804 = vmatpush.bf16.msrb.mxu3 %v2336_v23  ;;  %v1386_v35 = vrot.slane %v2833_v54, 1 }
  0x62   : > { %687 = vmatpush.bf16.msra.mxu1 %v2402_v48  ;;  %v1397_v8 = vrot.slane %v1395_v39, 7  ;;  %820 = vmatpush.bf16.msra.mxu2 %v2402_v48 }
  0x63   : > { %1170 = vrot.lane.b32.xlu0 %v1142_v53, %s1957_s25  ;;  %v1524_v53 = vunpack.c.l.b16 %v2372_v22  ;;  %v1387_v54 = vor.u32 %v1386_v35, %v2836_v58  ;;  %v1403_v35 = vrot.slane %v1398_v60, 1 }
  0x64   : > { %1173 = vrot.lane.b32.xlu1 %v1156_v26, %s1959_s30  ;;  %v2408_v26 = vld [vmem:[%s2814_s4] sm:$0xff] }
  0x65   : > { %1175 = vrot.lane.b32.xlu2 %v2257_v57, %s1958_s29  ;;  %v2419_v21 = vpack.c.b16 %v1524_v53, %v1524_v53  ;;  %674 = vmatpush.bf16.msra.mxu0 %v2408_v26  ;;  %v514_v53 = vrot.slane %v509_v29, 1  ;;  %v2835_v29 = vshrl.u32 %v2426_v19, 16 }
  0x66   : > { %805 = vmatpush.bf16.msrb.mxu3 %v2357_v31  ;;  %932 = vmatpush.bf16.msrb.mxu1 %v2224_v33 }
  0x67   : > { %v1530_v1 = vshll.u32 %v2419_v21, 16  ;;  %v515_v51 = vor.u32 %v514_v53, %v506_v27  ;;  %964 = vmatpush.bf16.msrb.mxu2 %v2232_v41  ;;  %v1527_v18 = vshrl.u32 %v2419_v21, 16  ;;  %v1415_v53 = vrot.slane %v2835_v29, 7 }
  0x69   : > { %832 = vmatpush.bf16.msrb.mxu0 %v2232_v41  ;;  %v517_v46 = vsel %vm2062_vm2, %v515_v51, 0  ;;  %v1535_v27 = vrot.slane %v1530_v1, 1  ;;  %v1416_v51 = vshll.u32 %v2426_v19, 16 }
  0x6a   : > { %806 = vmatpush.bf16.msrb.mxu3 %v2395_v42  ;;  %933 = vmatpush.bf16.msrb.mxu1 %v2248_v45 }
  0x6b   : > { %1302 = vrot.lane.b32.xlu0 %v1274_v0, %s1957_s25  ;;  %1844 = vmatmul.msk.bf16.vlgmr.msra.gmra.mxu3 %vm534_vm6, %v517_v46  ;;  %v1536_v46 = vor.u32 %v1535_v27, %v1527_v18  ;;  %v1418_v29 = vor.u32 %v1416_v51, %v1415_v53 }
  0x6c   : > { %1305 = vrot.lane.b32.xlu1 %v1288_v38, %s1959_s30  ;;  %v1400_v38 = vor.u32 %v1398_v60, %v1397_v8  ;;  %v1389_v8 = vsel %vm2062_vm2, %v1387_v54, 0  ;;  %965 = vmatpush.bf16.msrb.mxu2 %v2284_v17  ;;  %v1404_v54 = vor.u32 %v1403_v35, %v1395_v39  ;;  %v467_v39 = vrot.slane %v465_v11, 7 }
  0x6d   : > { %1307 = vrot.lane.b32.xlu2 %v2316_v13, %s1958_s29  ;;  %833 = vmatpush.bf16.msrb.mxu0 %v2284_v17  ;;  %v1538_v35 = vsel %vm2062_vm2, %v1536_v46, 0 }
  0x6e   : > { %v1402_v60 = vsel %vm2085_vm5, 0, %v1400_v38  ;;  %807 = vmatpush.bf16.msrb.mxu3 %v2408_v26  ;;  %v1507_v38 = vunpack.c.h.b16 %v2319_v30  ;;  %934 = vmatpush.bf16.msrb.mxu1 %v2289_v20  ;;  %v1406_v28 = vsel %vm2062_vm2, %v1404_v54, 0  ;;  %v470_v27 = vor.u32 %v468_v3, %v467_v39 }
  0x6f   : > { %v2442_v0 = vpop.permute.xlu2 %532  ;;  %v1529_v3 = vrot.slane %v1527_v18, 7 }
  0x70   : > { %v2478_v30 = vpack.c.b16 %v1507_v38, %v1507_v38 }
  0x71   : > { %v1532_v18 = vor.u32 %v1530_v1, %v1529_v3 }
  0x72   : > { %945 = vmatpush.bf16.msra.mxu3 %v2219_v32  ;;  %935 = vmatpush.bf16.msrb.mxu1 %v2306_v10  ;;  %v1513_v11 = vshll.u32 %v2478_v30, 16  ;;  %v1510_v53 = vshrl.u32 %v2478_v30, 16 }
  0x73   : > { %1425 = vrot.lane.b32.xlu0 %v2367_v59, %s1957_s25 }
  0x74   : > { %1428 = vrot.lane.b32.xlu1 %v1389_v8, %s1959_s30  ;;  %v1420_v8 = vsel %vm2085_vm5, 0, %v1418_v29  ;;  %v475_v29 = vsel %vm2085_vm5, 0, %v470_v27 }
  0x75   : > { %1431 = vrot.lane.b32.xlu2 %v1402_v60, %s1958_s29 }
  0x76   : > { %946 = vmatpush.bf16.msra.mxu3 %v2243_v9  ;;  %936 = vmatpush.bf16.msrb.mxu1 %v2336_v23 }
  0x77   : > { %v531_v58 = vpop.permute.xlu2 %530 }
  0x7a   : > { %947 = vmatpush.bf16.msra.mxu3 %v2279_v12  ;;  %937 = vmatpush.bf16.msrb.mxu1 %v2357_v31 }
  0x7b   : > { %1434 = vrot.lane.b32.xlu0 %v1406_v28, %s1957_s25  ;;  %v1518_v28 = vrot.slane %v1513_v11, 1 }
  0x7c   : > { %1564 = vrot.lane.b32.xlu1 %v1538_v35, %s1957_s25 }
  0x7d   : > { %1437 = vrot.lane.b32.xlu2 %v1420_v8, %s1959_s30  ;;  %v1519_v46 = vor.u32 %v1518_v28, %v1510_v53  ;;  %v1534_v8 = vsel %vm2085_vm5, 0, %v1532_v18 }
  0x7e   : > { %948 = vmatpush.bf16.msra.mxu3 %v2299_v43  ;;  %938 = vmatpush.bf16.msrb.mxu1 %v2395_v42 }
  0x7f   : > { %v525_v60 = vpop.permute.xlu2 %524  ;;  %v1521_v35 = vsel %vm2062_vm2, %v1519_v46, 0  ;;  %v720_v46 = vrot.slane %v718_v50, 7 }
  0x82   : > { %949 = vmatpush.bf16.msra.mxu3 %v2331_v7  ;;  %939 = vmatpush.bf16.msrb.mxu1 %v2408_v26 }
  0x83   : > { %1567 = vrot.lane.b32.xlu0 %v475_v29, %s1959_s30  ;;  %v519_v54 = vpop.permute.xlu0 %518 }
  0x84   : > { %1439 = vrot.lane.b32.xlu1 %v2426_v19, %s1958_s29  ;;  %v537_v21 = vsel %vm534_vm6, %v475_v29, %v519_v54 }
  0x85   : > { %1569 = vrot.lane.b32.xlu2 %v2018_v2, %s1958_s29 }
  0x86   : > { %v780_v38 = vpop.permute.xlu1 %779  ;;  %950 = vmatpush.bf16.msra.mxu3 %v2348_v37 }
  0x87   : > { %v772_v39 = vpop.permute.xlu2 %771 }
  0x8a   : > { %951 = vmatpush.bf16.msra.mxu3 %v2384_v56 }
  0x8b   : > { %1555 = vrot.lane.b32.xlu0 %v2478_v30, %s1957_s25  ;;  %s448_s25 = sld [smem:[#allocation2]] }
  0x8c   : > { %1558 = vrot.lane.b32.xlu1 %v1521_v35, %s1959_s30 }
  0x8d   : > { %v775_v2 = vpop.permute.xlu0 %774  ;;  %1561 = vrot.lane.b32.xlu2 %v1534_v8, %s1958_s29 }
  0x8e   : > { %v522_v1 = vpop.permute.xlu1 %521  ;;  %952 = vmatpush.bf16.msra.mxu3 %v2402_v48  ;;  %v791_v18 = vsel %vm534_vm6, %v2035_v5, %v775_v2 }
  0x8f   : > { %v540_v27 = vsel %vm538_vm7, %v537_v21, %v522_v1  ;;  %v904_v28 = vpop.permute.xlu2 %903  ;;  %v723_v21 = vor.u32 %v721_v44, %v720_v46  ;;  %v2842_v1 = vshll.u32 %v2050_v14, 16  ;;  %v2844_v44 = vshrl.u32 %v2050_v14, 16 }
  0x90   : > { %v543_v3 = vsel %vm541_vm8, %v540_v27, %v525_v60 }
  0x91   : > { %675 = vmatmul.bf16.vlgmr.msra.gmra.mxu0 %v543_v3  ;;  %v761_v5 = vrot.slane %v2842_v1, 1  ;;  %v725_v36 = vsel %vm2085_vm5, 0, %v723_v21  ;;  %v2847_v21 = vshrl.u32 %v2137_v16, 16 }
  0x92   : > { %1064 = vmatpush.bf16.msra.mxu0 %v2224_v33 }
  0x95   : > { %v778_v29 = vpop.permute.xlu0 %777 }
  0x96   : > { %v793_v54 = vsel %vm538_vm7, %v791_v18, %v778_v29  ;;  %1065 = vmatpush.bf16.msra.mxu0 %v2248_v45  ;;  %v528_v35 = vpop.permute.xlu1 %527 }
  0x97   : > { %v547_v60 = vsel %vm534_vm6, %v2038_v6, %v528_v35  ;;  %v795_v8 = vsel %vm541_vm8, %v793_v54, %v780_v38  ;;  %v910_v27 = vpop.permute.xlu2 %909  ;;  %v2843_v6 = vshrl.u32 %v2107_v52, 16  ;;  %v2846_v35 = vshll.u32 %v2107_v52, 16 }
  0x98   : > { %821 = vmatmul.bf16.vlgmr.msra.gmra.mxu2 %v795_v8  ;;  %v549_v50 = vsel %vm538_vm7, %v547_v60, %v531_v58  ;;  %v762_v58 = vor.u32 %v761_v5, %v2844_v44 }
  0x99   : > { %1077 = vmatpush.bf16.msra.mxu2 %v2219_v32  ;;  %v551_v2 = vsel %vm541_vm8, %v549_v50, %v2442_v0  ;;  %v852_v38 = vrot.slane %v2843_v6, 7  ;;  %v2845_v0 = vshll.u32 %v2137_v16, 16 }
  0x9a   : > { %1066 = vmatpush.bf16.msra.mxu0 %v2289_v20  ;;  %688 = vmatmul.bf16.vlgmr.msra.gmra.mxu1 %v551_v2  ;;  %v764_v8 = vsel %vm2062_vm2, %v762_v58, 0 }
  0x9b   : > { %1096 = vmatpush.bf16.msra.mxu1 %v2232_v41  ;;  %v893_v46 = vrot.slane %v2845_v0, 1  ;;  %v855_v60 = vor.u32 %v2846_v35, %v852_v38 }
  0x9d   : > { %1078 = vmatpush.bf16.msra.mxu2 %v2243_v9  ;;  %v766_v3 = vpop.permute.xlu0 %765  ;;  %v894_v50 = vor.u32 %v893_v46, %v2847_v21  ;;  %v857_v52 = vsel %vm2085_vm5, 0, %v855_v60 }
  0x9e   : > { %v783_v18 = vsel %vm534_vm6, %v725_v36, %v766_v3  ;;  %1067 = vmatpush.bf16.msra.mxu0 %v2306_v10  ;;  %v769_v29 = vpop.permute.xlu1 %768  ;;  %v2848_v3 = vshll.u32 %v2143_v24, 16 }
  0x9f   : > { %v785_v54 = vsel %vm538_vm7, %v783_v18, %v769_v29  ;;  %1097 = vmatpush.bf16.msra.mxu1 %v2284_v17  ;;  %v1044_v1 = vpop.permute.xlu2 %1043  ;;  %v896_v5 = vsel %vm2062_vm2, %v894_v50, 0  ;;  %v2850_v29 = vshrl.u32 %v2143_v24, 16  ;;  %v2851_v50 = vshll.u32 %v2167_v49, 16 }
  0xa0   : > { %v787_v14 = vsel %vm541_vm8, %v785_v54, %v772_v39  ;;  %v1025_v0 = vrot.slane %v2848_v3, 1 }
  0xa1   : > { %1079 = vmatpush.bf16.msra.mxu2 %v2279_v12  ;;  %808 = vmatmul.bf16.vlgmr.msrb.gmra.mxu3 %v787_v14 }
  0xa2   : > { %1068 = vmatpush.bf16.msra.mxu0 %v2336_v23  ;;  %1196 = vmatpush.bf16.msrb.mxu3 %v2224_v33  ;;  %v1026_v54 = vor.u32 %v1025_v0, %v2850_v29  ;;  %v2854_v0 = vshrl.u32 %v2257_v57, 16 }
  0xa3   : > { %1847 = vmatmul.msk.bf16.vlgmr.msrb.gmra.mxu0 %vm534_vm6, %v764_v8 }
  0xa5   : > { %1080 = vmatpush.bf16.msra.mxu2 %v2299_v43  ;;  %v898_v39 = vpop.permute.xlu0 %897 }
  0xa6   : > { %v915_v2 = vsel %vm534_vm6, %v857_v52, %v898_v39  ;;  %1069 = vmatpush.bf16.msra.mxu0 %v2357_v31  ;;  %v901_v16 = vpop.permute.xlu1 %900  ;;  %1197 = vmatpush.bf16.msrb.mxu3 %v2248_v45 }
  0xa7   : > { %v917_v6 = vsel %vm538_vm7, %v915_v2, %v901_v16  ;;  %v1036_v44 = vpop.permute.xlu2 %1035  ;;  %v2852_v2 = vshll.u32 %v2257_v57, 16 }
  0xa8   : > { %1852 = vmatmul.msk.bf16.vlgmr.msrb.gmra.mxu2 %vm534_vm6, %v896_v5  ;;  %v919_v38 = vsel %vm541_vm8, %v917_v6, %v904_v28  ;;  %v2849_v28 = vshrl.u32 %v2167_v49, 16 }
  0xa9   : > { %1081 = vmatpush.bf16.msra.mxu2 %v2331_v7  ;;  %v1157_v16 = vrot.slane %v2852_v2, 1 }
  0xaa   : > { %1070 = vmatpush.bf16.msra.mxu0 %v2395_v42  ;;  %940 = vmatmul.bf16.vlgmr.msrb.gmra.mxu1 %v919_v38  ;;  %v984_v46 = vrot.slane %v2849_v28, 7  ;;  %v2853_v38 = vshrl.u32 %v2189_v63, 16 }
  0xab   : > { %1198 = vmatpush.bf16.msrb.mxu3 %v2289_v20  ;;  %1228 = vmatpush.bf16.msrb.mxu1 %v2232_v41  ;;  %v1158_v28 = vor.u32 %v1157_v16, %v2854_v0  ;;  %v2860_v0 = vshrl.u32 %v2367_v59, 16 }
  0xac   : > { %v987_v52 = vor.u32 %v2851_v50, %v984_v46  ;;  %v2855_v46 = vshll.u32 %v2189_v63, 16 }
  0xad   : > { %1082 = vmatpush.bf16.msra.mxu2 %v2348_v37  ;;  %v907_v36 = vpop.permute.xlu0 %906  ;;  %v1160_v57 = vsel %vm2062_vm2, %v1158_v28, 0  ;;  %v1380_v28 = vrot.slane %v2860_v0, 7 }
  0xae   : > { %1071 = vmatpush.bf16.msra.mxu0 %v2408_v26  ;;  %v1039_v58 = vpop.permute.xlu1 %1038  ;;  %v923_v18 = vsel %vm534_vm6, %v2098_v47, %v907_v36  ;;  %v1116_v36 = vrot.slane %v2853_v38, 7 }
  0xaf   : > { %1199 = vmatpush.bf16.msrb.mxu3 %v2306_v10  ;;  %1229 = vmatpush.bf16.msrb.mxu1 %v2284_v17  ;;  %v1055_v35 = vsel %vm534_vm6, %v2113_v55, %v1039_v58  ;;  %v925_v14 = vsel %vm538_vm7, %v923_v18, %v910_v27  ;;  %v1028_v55 = vsel %vm2062_vm2, %v1026_v54, 0  ;;  %v1165_v27 = vpop.permute.xlu2 %1164 }
  0xb0   : > { %v1119_v18 = vor.u32 %v2855_v46, %v1116_v36 }
  0xb1   : > { %1083 = vmatpush.bf16.msra.mxu2 %v2384_v56 }
  0xb2   : > { %1209 = vmatpush.bf16.msrb.mxu0 %v2219_v32  ;;  %v1121_v63 = vsel %vm2085_vm5, 0, %v1119_v18 }
  0xb3   : > { %1200 = vmatpush.bf16.msrb.mxu3 %v2336_v23 }
  0xb5   : > { %1084 = vmatpush.bf16.msra.mxu2 %v2402_v48  ;;  %v1042_v60 = vpop.permute.xlu0 %1041 }
  0xb6   : > { %1210 = vmatpush.bf16.msrb.mxu0 %v2243_v9  ;;  %v1057_v8 = vsel %vm538_vm7, %v1055_v35, %v1042_v60  ;;  %v912_v47 = vpop.permute.xlu1 %911  ;;  %v2857_v60 = vshll.u32 %v2200_v15, 16 }
  0xb7   : > { %v927_v21 = vsel %vm541_vm8, %v925_v14, %v912_v47  ;;  %v1059_v24 = vsel %vm541_vm8, %v1057_v8, %v1044_v1  ;;  %1201 = vmatpush.bf16.msrb.mxu3 %v2357_v31  ;;  %v989_v1 = vsel %vm2085_vm5, 0, %v987_v52  ;;  %v1300_v3 = vpop.permute.xlu2 %1299 }
  0xb8   : > { %953 = vmatmul.bf16.vlgmr.msra.gmra.mxu3 %v927_v21  ;;  %1085 = vmatmul.bf16.vlgmr.msra.gmra.mxu2 %v1059_v24 }
  0xb9   : > { %1328 = vmatpush.bf16.msrb.mxu2 %v2224_v33 }
  0xba   : > { %1211 = vmatpush.bf16.msrb.mxu0 %v2279_v12  ;;  %1857 = vmatmul.msk.bf16.vlgmr.msra.gmra.mxu1 %vm534_vm6, %v1028_v55 }
  0xbb   : > { %1341 = vmatpush.bf16.msra.mxu1 %v2219_v32  ;;  %1202 = vmatpush.bf16.msrb.mxu3 %v2395_v42 }
  0xbd   : > { %1329 = vmatpush.bf16.msrb.mxu2 %v2248_v45  ;;  %v1030_v49 = vpop.permute.xlu0 %1029 }
  0xbe   : > { %1212 = vmatpush.bf16.msrb.mxu0 %v2299_v43  ;;  %v1047_v39 = vsel %vm534_vm6, %v989_v1, %v1030_v49  ;;  %v1033_v5 = vpop.permute.xlu1 %1032  ;;  %v2858_v49 = vshll.u32 %v2316_v13, 16 }
  0xbf   : > { %v1049_v6 = vsel %vm538_vm7, %v1047_v39, %v1033_v5  ;;  %1342 = vmatpush.bf16.msra.mxu1 %v2243_v9  ;;  %1203 = vmatpush.bf16.msrb.mxu3 %v2408_v26  ;;  %v1176_v47 = vpop.permute.xlu2 %1175 }
  0xc0   : > { %v1051_v58 = vsel %vm541_vm8, %v1049_v6, %v1036_v44  ;;  %v2856_v44 = vshrl.u32 %v2200_v15, 16  ;;  %v1289_v39 = vrot.slane %v2858_v49, 1 }
  0xc1   : > { %1330 = vmatpush.bf16.msrb.mxu2 %v2289_v20  ;;  %1072 = vmatmul.bf16.vlgmr.msra.gmra.mxu0 %v1051_v58  ;;  %v2859_v58 = vshrl.u32 %v2316_v13, 16 }
  0xc2   : > { %1213 = vmatpush.bf16.msrb.mxu0 %v2331_v7  ;;  %v1248_v29 = vrot.slane %v2856_v44, 7 }
  0xc3   : > { %1360 = vmatpush.bf16.msra.mxu3 %v2232_v41  ;;  %1343 = vmatpush.bf16.msra.mxu1 %v2279_v12 }
  0xc4   : > { %v1251_v14 = vor.u32 %v2857_v60, %v1248_v29  ;;  %v2862_v29 = vshll.u32 %v2367_v59, 16 }
  0xc5   : > { %1331 = vmatpush.bf16.msrb.mxu2 %v2306_v10  ;;  %v1162_v54 = vpop.permute.xlu0 %1161 }
  0xc6   : > { %1214 = vmatpush.bf16.msrb.mxu0 %v2348_v37  ;;  %v1294_v35 = vpop.permute.xlu1 %1293  ;;  %v1179_v8 = vsel %vm534_vm6, %v1121_v63, %v1162_v54  ;;  %v1253_v21 = vsel %vm2085_vm5, 0, %v1251_v14 }
  0xc7   : > { %1361 = vmatpush.bf16.msra.mxu3 %v2284_v17  ;;  %1344 = vmatpush.bf16.msra.mxu1 %v2299_v43  ;;  %v1181_v15 = vsel %vm538_vm7, %v1179_v8, %v1165_v27  ;;  %v1311_v55 = vsel %vm534_vm6, %v1253_v21, %v1294_v35  ;;  %v1308_v2 = vpop.permute.xlu2 %1307 }
  0xc9   : > { %1332 = vmatpush.bf16.msrb.mxu2 %v2336_v23 }
  0xca   : > { %1215 = vmatpush.bf16.msrb.mxu0 %v2384_v56  ;;  %1862 = vmatmul.msk.bf16.vlgmr.msrb.gmra.mxu1 %vm534_vm6, %v1160_v57 }
  0xcb   : > { %1345 = vmatpush.bf16.msra.mxu1 %v2331_v7 }
  0xcd   : > { %1333 = vmatpush.bf16.msrb.mxu2 %v2357_v31  ;;  %v1297_v24 = vpop.permute.xlu0 %1296 }
  0xce   : > { %1216 = vmatpush.bf16.msrb.mxu0 %v2402_v48  ;;  %v1168_v50 = vpop.permute.xlu1 %1167  ;;  %v1313_v1 = vsel %vm538_vm7, %v1311_v55, %v1297_v24 }
  0xcf   : > { %v1183_v52 = vsel %vm541_vm8, %v1181_v15, %v1168_v50  ;;  %1346 = vmatpush.bf16.msra.mxu1 %v2348_v37  ;;  %v1315_v27 = vsel %vm541_vm8, %v1313_v1, %v1300_v3  ;;  %v1290_v3 = vor.u32 %v1289_v39, %v2859_v58  ;;  %v1432_v54 = vpop.permute.xlu2 %1431 }
  0xd0   : > { %1204 = vmatmul.bf16.vlgmr.msrb.gmra.mxu3 %v1183_v52  ;;  %v2761_v52 = vstv %s448_s25 }
  0xd1   : > { %1334 = vmatpush.bf16.msrb.mxu2 %v2395_v42  ;;  %1473 = vmatpush.bf16.msrb.mxu3 %v2219_v32 }
  0xd2   : > { %1460 = vmatpush.bf16.msra.mxu0 %v2224_v33 }
  0xd3   : > { %1347 = vmatpush.bf16.msra.mxu1 %v2384_v56 }
  0xd5   : > { %1335 = vmatpush.bf16.msrb.mxu2 %v2408_v26  ;;  %v1171_v5 = vpop.permute.xlu0 %1170  ;;  %1474 = vmatpush.bf16.msrb.mxu3 %v2243_v9 }
  0xd6   : > { %1461 = vmatpush.bf16.msra.mxu0 %v2248_v45  ;;  %v1187_v16 = vsel %vm534_vm6, %v2184_v61, %v1171_v5  ;;  %v1174_v6 = vpop.permute.xlu1 %1173  ;;  %v1421_v61 = vrot.slane %v1416_v51, 1  ;;  %v2861_v51 = vshrl.u32 %v2426_v19, 16 }
  0xd7   : > { %v1189_v38 = vsel %vm538_vm7, %v1187_v16, %v1174_v6  ;;  %1348 = vmatpush.bf16.msra.mxu1 %v2402_v48  ;;  %v1438_v57 = vpop.permute.xlu2 %1437 }
  0xd8   : > { %1336 = vmatmul.bf16.vlgmr.msrb.gmra.mxu2 %v1315_v27  ;;  %v1191_v36 = vsel %vm541_vm8, %v1189_v38, %v1176_v47 }
  0xd9   : > { %1492 = vmatpush.bf16.msra.mxu2 %v2232_v41  ;;  %1217 = vmatmul.bf16.vlgmr.msrb.gmra.mxu0 %v1191_v36 }
  0xda   : > { %1462 = vmatpush.bf16.msra.mxu0 %v2289_v20  ;;  %1475 = vmatpush.bf16.msrb.mxu3 %v2279_v12 }
  0xdb   : > { %1590 = vmatpush.bf16.msrb.mxu1 %v2224_v33  ;;  %v1422_v33 = vor.u32 %v1421_v61, %v2861_v51 }
  0xdd   : > { %1493 = vmatpush.bf16.msra.mxu2 %v2284_v17  ;;  %v1303_v46 = vpop.permute.xlu0 %1302 }
  0xde   : > { %1463 = vmatpush.bf16.msra.mxu0 %v2306_v10  ;;  %1476 = vmatpush.bf16.msrb.mxu3 %v2299_v43  ;;  %v1319_v13 = vsel %vm534_vm6, %v2198_v4, %v1303_v46  ;;  %v1306_v18 = vpop.permute.xlu1 %1305  ;;  %v1424_v4 = vsel %vm2062_vm2, %v1422_v33, 0 }
  0xdf   : > { %1591 = vmatpush.bf16.msrb.mxu1 %v2248_v45  ;;  %v1321_v44 = vsel %vm538_vm7, %v1319_v13, %v1306_v18  ;;  %v1570_v63 = vpop.permute.xlu2 %1569 }
  0xe0   : > { %v1323_v35 = vsel %vm541_vm8, %v1321_v44, %v1308_v2 }
  0xe1   : > { %1603 = vmatpush.bf16.msrb.mxu2 %v2219_v32  ;;  %v1292_v32 = vsel %vm2062_vm2, %v1290_v3, 0  ;;  %1349 = vmatmul.bf16.vlgmr.msra.gmra.mxu1 %v1323_v35 }
  0xe2   : > { %1464 = vmatpush.bf16.msra.mxu0 %v2336_v23  ;;  %1867 = vmatmul.msk.bf16.vlgmr.msra.gmra.mxu3 %vm534_vm6, %v1292_v32 }
  0xe3   : > { %1477 = vmatpush.bf16.msrb.mxu3 %v2331_v7  ;;  %1592 = vmatpush.bf16.msrb.mxu1 %v2289_v20 }
  0xe5   : > { %1604 = vmatpush.bf16.msrb.mxu2 %v2243_v9  ;;  %v1383_v9 = vor.u32 %v2862_v29, %v1380_v28  ;;  %v1426_v45 = vpop.permute.xlu0 %1425 }
  0xe6   : > { %1465 = vmatpush.bf16.msra.mxu0 %v2357_v31 }
  0xe7   : > { %v1385_v59 = vsel %vm2085_vm5, 0, %v1383_v9  ;;  %1478 = vmatpush.bf16.msrb.mxu3 %v2348_v37  ;;  %1593 = vmatpush.bf16.msrb.mxu1 %v2306_v10  ;;  %v1562_v8 = vpop.permute.xlu2 %1561 }
  0xe8   : > { %1872 = vmatmul.msk.bf16.vlgmr.msra.gmra.mxu2 %vm534_vm6, %v1424_v4  ;;  %v1443_v19 = vsel %vm534_vm6, %v1385_v59, %v1426_v45 }
  0xe9   : > { %1605 = vmatpush.bf16.msrb.mxu2 %v2279_v12  ;;  %v1429_v12 = vpop.permute.xlu1 %1428 }
  0xea   : > { %1466 = vmatpush.bf16.msra.mxu0 %v2395_v42  ;;  %v1445_v25 = vsel %vm538_vm7, %v1443_v19, %v1429_v12 }
  0xeb   : > { %v1447_v20 = vsel %vm541_vm8, %v1445_v25, %v1432_v54  ;;  %1479 = vmatpush.bf16.msrb.mxu3 %v2384_v56  ;;  %1594 = vmatpush.bf16.msrb.mxu1 %v2336_v23 }
  0xed   : > { %1606 = vmatpush.bf16.msrb.mxu2 %v2299_v43  ;;  %v1435_v43 = vpop.permute.xlu0 %1434 }
  0xee   : > { %1467 = vmatpush.bf16.msra.mxu0 %v2408_v26  ;;  %v702_v23 = vpop.f32.mrf.mxu3 }
  0xef   : > { %1480 = vmatpush.bf16.msrb.mxu3 %v2402_v48  ;;  %1595 = vmatpush.bf16.msrb.mxu1 %v2357_v31 }
  0xf1   : > { %1607 = vmatpush.bf16.msrb.mxu2 %v2331_v7  ;;  %1468 = vmatmul.bf16.vlgmr.msra.gmra.mxu0 %v1447_v20  ;;  %v1565_v10 = vpop.permute.xlu1 %1564  ;;  %v1451_v7 = vsel %vm534_vm6, %v2351_v62, %v1435_v43 }
  0xf2   : > { %1622 = vmatpush.bf16.msrb.mxu0 %v2232_v41  ;;  %v1512_v41 = vrot.slane %v1510_v53, 7  ;;  %v1453_v60 = vsel %vm538_vm7, %v1451_v7, %v1438_v57 }
  0xf3   : > { %1596 = vmatpush.bf16.msrb.mxu1 %v2395_v42 }
  0xf4   : > { %v1515_v62 = vor.u32 %v1513_v11, %v1512_v41 }
  0xf5   : > { %1608 = vmatpush.bf16.msrb.mxu2 %v2348_v37  ;;  %v1568_v37 = vpop.permute.xlu0 %1567 }
  0xf6   : > { %1623 = vmatpush.bf16.msrb.mxu0 %v2284_v17  ;;  %v1581_v17 = vsel %vm534_vm6, %v2372_v22, %v1565_v10  ;;  %v1517_v22 = vsel %vm2085_vm5, 0, %v1515_v62  ;;  %v704_v42 = vpop.f32.mrf.mxu3 }
  0xf7   : > { %v1583_v31 = vsel %vm538_vm7, %v1581_v17, %v1568_v37  ;;  %1597 = vmatpush.bf16.msrb.mxu1 %v2408_v26 }
  0xf8   : > { %v1585_v14 = vsel %vm541_vm8, %v1583_v31, %v1570_v63 }
  0xf9   : > { %1609 = vmatpush.bf16.msrb.mxu2 %v2384_v56  ;;  %v1440_v56 = vpop.permute.xlu1 %1439 }
  0xfa   : > { %v1455_v53 = vsel %vm541_vm8, %v1453_v60, %v1440_v56 }
  0xfb   : > { %1481 = vmatmul.bf16.vlgmr.msrb.gmra.mxu3 %v1455_v53 }
  0xfd   : > { %1610 = vmatpush.bf16.msrb.mxu2 %v2402_v48  ;;  %v1556_v48 = vpop.permute.xlu0 %1555 }
  0xfe   : > { %v1573_v47 = vsel %vm534_vm6, %v1517_v22, %v1556_v48 }
 0x100   : > { %1611 = vmatmul.bf16.vlgmr.msrb.gmra.mxu2 %v1585_v14 }
 0x101   : > { %1876 = vmatmul.msk.bf16.vlgmr.msrb.gmra.mxu0 %vm534_vm6, %v2075_v34  ;;  %v1559_v21 = vpop.permute.xlu1 %1558 }
 0x102   : > { %v1575_v30 = vsel %vm538_vm7, %v1573_v47, %v1559_v21 }
 0x103   : > { %v1577_v11 = vsel %vm541_vm8, %v1575_v30, %v1562_v8 }
 0x104   : > { %1598 = vmatmul.bf16.vlgmr.msrb.gmra.mxu1 %v1577_v11 }
 0x10e   : > { %v676_v26 = vpop.f32.mrf.mxu0 }
 0x10f   : > { %v677_v34 = vadd.f32 %v2758_v40, %v676_v26 }
 0x116   : > { %v678_v24 = vpop.f32.mrf.mxu0 }
 0x117   : > { %v689_v15 = vpop.f32.mrf.mxu1 }
 0x118   : > { %v690_v50 = vadd.f32 %v689_v15, %v677_v34 }
 0x11a   : > { %v703_v55 = vadd.f32 %v702_v23, %v690_v50 }
 0x11b   : > { %v822_v1 = vpop.f32.mrf.mxu2 }
 0x11c   : > { %vm706_vm9 = vcmp.ge.f32.partialorder %v703_v55, 0.0  ;;  %v708_v27 = vmul.f32 %v2761_v52, %v703_v55 }
 0x11e   : > { %v709_v49 = vsel %vm706_vm9, %v703_v55, %v708_v27 }
 0x11f   : > { %v710_v39 = vpack.c.bf16 %v709_v49, %v709_v49  ;;  %v691_v5 = vpop.f32.mrf.mxu1 }
 0x120   : > { %v835_v2 = vpop.f32.mrf.mxu0 }
 0x121   : > { %712 = vst.msk [vmem:[%s2769_s8] sm:$0xf] %vm711_vm10, %v710_v39 }
 0x123   : > { %v824_v16 = vpop.f32.mrf.mxu2 }
 0x124   : > { %v809_v6 = vpop.f32.mrf.mxu3 }
 0x125   : > { %v810_v38 = vadd.f32 %v2758_v40, %v809_v6 }
 0x127   : > { %v941_v36 = vpop.f32.mrf.mxu1  ;;  %v823_v58 = vadd.f32 %v822_v1, %v810_v38 }
 0x128   : > { %v837_v3 = vpop.f32.mrf.mxu0  ;;  %v942_v44 = vadd.f32 %v2758_v40, %v941_v36 }
 0x129   : > { %v836_v61 = vadd.f32 %v835_v2, %v823_v58 }
 0x12b   : > { %vm839_vm11 = vcmp.ge.f32.partialorder %v836_v61, 0.0  ;;  %v840_v0 = vmul.f32 %v836_v61, %v2761_v52  ;;  %v967_v28 = vpop.f32.mrf.mxu2 }
 0x12c   : > { %v811_v46 = vpop.f32.mrf.mxu3 }
 0x12d   : > { %v841_v32 = vsel %vm839_vm11, %v836_v61, %v840_v0 }
 0x12e   : > { %v842_v13 = vpack.c.bf16 %v841_v32, %v841_v32 }
 0x12f   : > { %v943_v18 = vpop.f32.mrf.mxu1 }
 0x130   : > { %1848 = vst.msk [vmem:[%s2769_s8 + $0x4] sm:$0xf] %vm711_vm10, %v842_v13 }
 0x133   : > { %v969_v51 = vpop.f32.mrf.mxu2 }
 0x137   : > { %v1099_v33 = vpop.f32.mrf.mxu1 }
 0x13b   : > { %v954_v29 = vpop.f32.mrf.mxu3  ;;  %v1086_v9 = vpop.f32.mrf.mxu2 }
 0x13c   : > { %v955_v54 = vadd.f32 %v954_v29, %v942_v44 }
 0x13e   : > { %v968_v35 = vadd.f32 %v967_v28, %v955_v54  ;;  %v1073_v4 = vpop.f32.mrf.mxu0 }
 0x13f   : > { %v1074_v59 = vadd.f32 %v2758_v40, %v1073_v4  ;;  %v1101_v45 = vpop.f32.mrf.mxu1 }
 0x140   : > { %vm971_vm12 = vcmp.ge.f32.partialorder %v968_v35, 0.0  ;;  %v972_v19 = vmul.f32 %v968_v35, %v2761_v52 }
 0x141   : > { %v1087_v12 = vadd.f32 %v1086_v9, %v1074_v59 }
 0x142   : > { %v973_v25 = vsel %vm971_vm12, %v968_v35, %v972_v19 }
 0x143   : > { %v974_v20 = vpack.c.bf16 %v973_v25, %v973_v25  ;;  %v1100_v57 = vadd.f32 %v1099_v33, %v1087_v12  ;;  %v956_v43 = vpop.f32.mrf.mxu3  ;;  %v1088_v10 = vpop.f32.mrf.mxu2 }
 0x145   : > { %1853 = vst.msk [vmem:[%s2769_s8 + $0x8] sm:$0xf] %vm711_vm10, %v974_v20  ;;  %vm1103_vm13 = vcmp.ge.f32.partialorder %v1100_v57, 0.0  ;;  %v1104_v41 = vmul.f32 %v1100_v57, %v2761_v52 }
 0x146   : > { %v1075_v7 = vpop.f32.mrf.mxu0 }
 0x147   : > { %v1105_v63 = vsel %vm1103_vm13, %v1100_v57, %v1104_v41  ;;  %v1231_v23 = vpop.f32.mrf.mxu1 }
 0x148   : > { %v1106_v17 = vpack.c.bf16 %v1105_v63, %v1105_v63 }
 0x14a   : > { %1858 = vst.msk [vmem:[%s2769_s8 + $0xc] sm:$0xf] %vm711_vm10, %v1106_v17 }
 0x14f   : > { %v1233_v37 = vpop.f32.mrf.mxu1 }
 0x153   : > { %v1205_v60 = vpop.f32.mrf.mxu3 }
 0x154   : > { %v1206_v31 = vadd.f32 %v2758_v40, %v1205_v60 }
 0x156   : > { %v1218_v56 = vpop.f32.mrf.mxu0 }
 0x157   : > { %v1219_v53 = vadd.f32 %v1218_v56, %v1206_v31 }
 0x159   : > { %v1232_v62 = vadd.f32 %v1231_v23, %v1219_v53 }
 0x15b   : > { %v1337_v14 = vpop.f32.mrf.mxu2  ;;  %vm1235_vm14 = vcmp.ge.f32.partialorder %v1232_v62, 0.0  ;;  %v1236_v22 = vmul.f32 %v1232_v62, %v2761_v52  ;;  %v1207_v42 = vpop.f32.mrf.mxu3 }
 0x15c   : > { %v1338_v30 = vadd.f32 %v2758_v40, %v1337_v14 }
 0x15d   : > { %v1237_v48 = vsel %vm1235_vm14, %v1232_v62, %v1236_v22 }
 0x15e   : > { %v1238_v8 = vpack.c.bf16 %v1237_v48, %v1237_v48  ;;  %v1220_v47 = vpop.f32.mrf.mxu0  ;;  %v1350_v21 = vpop.f32.mrf.mxu1 }
 0x15f   : > { %v1351_v26 = vadd.f32 %v1350_v21, %v1338_v30 }
 0x160   : > { %1863 = vst.msk [vmem:[%s2769_s8 + $0x10] sm:$0xf] %vm711_vm10, %v1238_v8 }
 0x163   : > { %v1339_v11 = vpop.f32.mrf.mxu2 }
 0x165   : > { %v1363_v34 = vpop.f32.mrf.mxu3 }
 0x166   : > { %v1364_v24 = vadd.f32 %v1363_v34, %v1351_v26  ;;  %v1352_v50 = vpop.f32.mrf.mxu1 }
 0x168   : > { %vm1367_vm15 = vcmp.ge.f32.partialorder %v1364_v24, 0.0  ;;  %v1368_v15 = vmul.f32 %v1364_v24, %v2761_v52 }
 0x16a   : > { %v1369_v55 = vsel %vm1367_vm15, %v1364_v24, %v1368_v15 }
 0x16b   : > { %v1495_v27 = vpop.f32.mrf.mxu2  ;;  %v1370_v49 = vpack.c.bf16 %v1369_v55, %v1369_v55 }
 0x16d   : > { %1868 = vst.msk [vmem:[%s2769_s8 + $0x14] sm:$0xf] %vm711_vm10, %v1370_v49  ;;  %v1365_v39 = vpop.f32.mrf.mxu3 }
 0x16e   : > { %v1469_v1 = vpop.f32.mrf.mxu0 }
 0x16f   : > { %v1470_v6 = vadd.f32 %v2758_v40, %v1469_v1 }
 0x173   : > { %v1497_v2 = vpop.f32.mrf.mxu2 }
 0x176   : > { %v1471_v5 = vpop.f32.mrf.mxu0 }
 0x17e   : > { %v1625_v16 = vpop.f32.mrf.mxu0  ;;  %v1482_v38 = vpop.f32.mrf.mxu3 }
 0x17f   : > { %v1483_v36 = vadd.f32 %v1482_v38, %v1470_v6 }
 0x181   : > { %v1496_v3 = vadd.f32 %v1495_v27, %v1483_v36  ;;  %v1599_v61 = vpop.f32.mrf.mxu1 }
 0x182   : > { %v1600_v0 = vadd.f32 %v2758_v40, %v1599_v61 }
 0x183   : > { %v1612_v58 = vpop.f32.mrf.mxu2  ;;  %vm1499_vm0 = vcmp.ge.f32.partialorder %v1496_v3, 0.0  ;;  %v1500_v28 = vmul.f32 %v1496_v3, %v2761_v52 }
 0x184   : > { %v1613_v32 = vadd.f32 %v1612_v58, %v1600_v0 }
 0x185   : > { %v1501_v13 = vsel %vm1499_vm0, %v1496_v3, %v1500_v28 }
 0x186   : > { %v1627_v46 = vpop.f32.mrf.mxu0  ;;  %v1502_v18 = vpack.c.bf16 %v1501_v13, %v1501_v13  ;;  %v1626_v51 = vadd.f32 %v1625_v16, %v1613_v32  ;;  %v1484_v33 = vpop.f32.mrf.mxu3 }
 0x188   : > { %1873 = vst.msk [vmem:[%s2769_s8 + $0x18] sm:$0xf] %vm711_vm10, %v1502_v18  ;;  %vm1629_vm1 = vcmp.ge.f32.partialorder %v1626_v51, 0.0  ;;  %v1630_v29 = vmul.f32 %v1626_v51, %v2761_v52 }
 0x189   : > { %v1601_v9 = vpop.f32.mrf.mxu1 }
 0x18a   : > { %v1631_v54 = vsel %vm1629_vm1, %v1626_v51, %v1630_v29 }
 0x18b   : > { %v1614_v44 = vpop.f32.mrf.mxu2  ;;  %v1632_v35 = vpack.c.bf16 %v1631_v54, %v1631_v54 }
 0x18d   : > { %1877 = vst.msk [vmem:[%s2769_s8 + $0x1c] sm:$0xf] %vm711_vm10, %v1632_v35 }
 0x18e PF: > { %s17_s2 = sadd.s32 1, %s1954_s2   ;;  %s2863_s23 = smov %s1950_s24 }
 0x18f   : > { %p14_p5 = scmp.ge.s32.totalorder %s17_s2, 4   ;;  %s2864_s24 = smov %s2866_s0 }
 0x191   :  { %16 = sbr.rel (!%p14_p5) target bundleno = 2 (0x2), region = 94 }

// kernel: feature_extractor.9
= control target key start
LH: loop header
LB: loop body
LE: loop exit
PB: predicated region body
PF: predicated region fallthrough
CT: control target
= control target key end

     0   :  { %s1858_s23 = smov 0   ;;  %s1860_s24 = smov 0   ;;  %s2462_s0 = inlined_call_operand.<no memory space> [shape: f32[1], index: 0, kind: input, shape index: {}]   ;;  %s2463_s1 = inlined_call_operand.vmem [shape: bf16[2,4,4,64], index: 1, kind: input, shape index: {}, may-alias: {1,2,3}]   ;;  %s2464_s2 = inlined_call_operand.vmem [shape: bf16[2,4,4,64], index: 2, kind: input, shape index: {}, may-alias: {1,2,3}]   ;;  %s2465_s3 = inlined_call_operand.vmem [shape: bf16[2,4,4,64], index: 3, kind: input, shape index: {}, may-alias: {1,2,3}]   ;;  %s2466_s4 = inlined_call_operand.vmem [shape: bf16[576,64], index: 4, kind: input, shape index: {}]   ;;  %s2467_s5 = inlined_call_operand.vmem [shape: f32[1,64], index: 5, kind: input, shape index: {}]   ;;  %s2468_s6 = inlined_call_operand.vmem [shape: bf16[2,4,4,64], index: 6, kind: output, shape index: {}]  }
   0x1   :  { %11 = sst [smem:[#allocation2]] %s2462_s0  ;;  %s1862_s25 = smov 0  }
   0x2 LB: > { %s29_s0 = sadd.s32 1, %s1812_s24  ;;  %p1555_p0 = scmp.ge.s32.totalorder %s1816_s25, 1  ;;  %s1816_s25 = sphi %s1862_s25, %s17_s25   ;;  %s1812_s24 = sphi %s1860_s24, %s2488_s24   ;;  %s1808_s23 = sphi %s1858_s23, %s2487_s23  }
   0x3   : > { %p31_p1 = scmp.ge.s32.totalorder %s29_s0, 2  ;;  %p296_p2 = scmp.lt.s32.totalorder %s1816_s25, 3 }
   0x5   : > { %s2490_s0 = smov (%p31_p1, %s29_s0), 0  ;;  %p297_p3 = pnand %p1555_p0, %p296_p2 }
   0x7   : > { %300 = sbr.rel (%p297_p3) target bundleno = 536 (0x218), region = 44 }
   0xc   : > { %p359_p4 = scmp.lt.s32.totalorder %s1808_s23, 1  ;;  %vm1818_vm0 = vmmov 0   ;;  %vm539_vm2 = vcmask 1041408   ;;  %vm540_vm3 = vsmask.f32 1280  ;;  %s1819_s9 = smov 64  }
   0xd   : > { %vm1878_vm1 = vmpackc.low %vm1818_vm0, %vm1818_vm0  ;;  %vm526_vm5 = vcmask 1040384   ;;  %vm527_vm6 = vsmask.f32 256  ;;  %v1956_v50 = vld [vmem:[%s2466_s4 + $0xf8] sm:$0xff]  ;;  %v2146_v0 = vld [vmem:[%s2466_s4 + $0x8] sm:$0xff]  ;;  %vm604_vm8 = vcmask 523264  }
   0xe   : > { %s2492_s23 = smov (!%p359_p4, %s1808_s23), 1  ;;  %vm1904_vm4 = vmand %vm539_vm2, %vm540_vm3  ;;  %881 = vmatpush.bf16.msra.mxu3 %v1956_v50  ;;  %s485_s7 = sld [smem:[#allocation2]]  ;;  %vm912_vm10 = vcmask 517120  }
   0xf   : > { %s1876_s26 = sshll.u32 %s2492_s23, 3  ;;  %vm1918_vm7 = vmand %vm526_vm5, %vm527_vm6 }
  0x10   : > { %s379_s29 = scalar_lea.vmem %s2464_s2, %s1876_s26  ;;  %s1894_s8 = scalar_lea.vmem %s2463_s1, %s1876_s26 }
  0x11   : > { %v487_v1 = vld [vmem:[%s379_s29] sm:$0x3]  ;;  %v1564_v7 = vld [vmem:[%s1894_s8 + $0x2] sm:$0x3]  ;;  %v1711_v30 = vld [vmem:[%s1894_s8 + $0x4] sm:$0x3]  ;;  %s2437_s12 = scalar_lea.vmem %s2468_s6, %s1876_s26 }
  0x12   : > { %v500_v2 = vsel %vm1878_vm1, %v487_v1, 0  ;;  %v1897_v4 = vld [vmem:[%s1894_s8] sm:$0x3]  ;;  %v1928_v27 = vld [vmem:[%s1894_s8 + $0x2] sm:$0x3]  ;;  %s1728_s10 = sadd.s32 6, %s1876_s26 }
  0x13   : > { %517 = vst [vmem:[#allocation1] ss:$4 sm:$0xff] %v500_v2  ;;  %v914_v21 = vld [vmem:[%s1894_s8] sm:$0x3]  ;;  %v1714_v39 = vld [vmem:[%s1894_s8 + $0x2] sm:$0x3]  ;;  %s395_s13 = scalar_lea.vmem %s2465_s3, %s1728_s10 }
  0x14   : > { %v1947_v43 = vld [vmem:[%s1894_s8 + $0x4] sm:$0x3]  ;;  %v1716_v55 = vld [vmem:[%s1894_s8 + $0x6] sm:$0x3] }
  0x1a   : > { %v1888_v3 = vld.sshfl [vmem:[#allocation1] sm:$0xff pattern:$0x73625140] }
  0x1b   : > { %530 = vst [vmem:[#allocation1] ss:$4 sm:$0xff] %v500_v2 }
  0x22   : > { %v1899_v5 = vld.sshfl [vmem:[#allocation1] sm:$0xff pattern:$0x73625140] }
  0x23   : > { %545 = vst [vmem:[#allocation1] ss:$4 sm:$0xff] %v1897_v4 }
  0x2a   : > { %v546_v6 = vld.sshfl [vmem:[#allocation1] sm:$0xff pattern:$0x73625140] }
  0x2b   : > { %555 = vst [vmem:[#allocation1] ss:$4 sm:$0xff] %v1897_v4  ;;  %v547_v18 = vshrl.u32 %v546_v6, 16  ;;  %v550_v20 = vshll.u32 %v546_v6, 16  ;;  %v1980_v6 = vld [vmem:[%s2466_s4 + $0xf0] sm:$0xff] }
  0x2c   : > { %882 = vmatpush.bf16.msra.mxu3 %v1980_v6 }
  0x2d   : > { %v549_v19 = vrot.slane %v547_v18, 7 }
  0x2f   : > { %v552_v23 = vor.u32 %v550_v20, %v549_v19  ;;  %v2026_v19 = vld [vmem:[%s2466_s4 + $0x28] sm:$0xff]  ;;  %v2031_v20 = vld [vmem:[%s2466_s4 + $0xe0] sm:$0xff] }
  0x31   : > { %v554_v25 = vsel %vm1918_vm7, 0, %v552_v23  ;;  %v2043_v23 = vld [vmem:[%s2466_s4 + $0xa8] sm:$0xff] }
  0x32   : > { %v556_v8 = vld.sshfl [vmem:[#allocation1] sm:$0xff pattern:$0x73625140] }
  0x33   : > { %v557_v9 = vshrl.u32 %v556_v8, 16  ;;  %v559_v10 = vshll.u32 %v556_v8, 16  ;;  %568 = vst [vmem:[#allocation1] ss:$4 sm:$0xff] %v1564_v7 }
  0x35   : > { %v561_v11 = vrot.slane %v559_v10, 1  ;;  %v1997_v10 = vld [vmem:[%s2466_s4 + $0x30] sm:$0xff] }
  0x37   : > { %v562_v13 = vor.u32 %v561_v11, %v557_v9  ;;  %v1990_v9 = vld [vmem:[%s2466_s4 + $0xb8] sm:$0xff]  ;;  %v2002_v11 = vld [vmem:[%s2466_s4 + $0xe8] sm:$0xff] }
  0x38   : > { %868 = vmatpush.bf16.msra.mxu2 %v1990_v9  ;;  %883 = vmatpush.bf16.msra.mxu3 %v2002_v11 }
  0x39   : > { %v564_v14 = vsel %vm1904_vm4, %v562_v13, 0  ;;  %v2009_v13 = vld [vmem:[%s2466_s4 + $0x70] sm:$0xff] }
  0x3a   : > { %597 = vrot.lane.b32.xlu0 %v564_v14, %s1819_s9  ;;  %v1911_v15 = vld.sshfl [vmem:[#allocation1] sm:$0xff pattern:$0x73625140]  ;;  %v2014_v14 = vld [vmem:[%s2466_s4 + $0xb0] sm:$0xff] }
  0x3b   : > { %578 = vst [vmem:[#allocation1] ss:$4 sm:$0xff] %v1564_v7 }
  0x3c   : > { %869 = vmatpush.bf16.msra.mxu2 %v2014_v14  ;;  %884 = vmatpush.bf16.msra.mxu3 %v2031_v20 }
  0x40   : > { %870 = vmatpush.bf16.msra.mxu2 %v2043_v23 }
  0x42   : > { %v1913_v16 = vld.sshfl [vmem:[#allocation1] sm:$0xff pattern:$0x73625140] }
  0x43   : > { %588 = vst [vmem:[#allocation1] ss:$4 sm:$0xff] %v500_v2  ;;  %v1975_v2 = vld [vmem:[%s2466_s4 + $0x38] sm:$0xff] }
  0x44   : > { %842 = vmatpush.bf16.msra.mxu0 %v1975_v2 }
  0x48   : > { %843 = vmatpush.bf16.msra.mxu0 %v1997_v10 }
  0x4a   : > { %v589_v17 = vld.sshfl [vmem:[#allocation1] sm:$0xff pattern:$0x73625140] }
  0x4b   : > { %591 = vrot.lane.b32.xlu0 %v589_v17, %s1819_s9  ;;  %599 = vst [vmem:[#allocation1] ss:$4 sm:$0xff] %v1564_v7  ;;  %v1985_v7 = vld [vmem:[%s2466_s4 + $0x78] sm:$0xff]  ;;  %v2017_v17 = vld [vmem:[%s1894_s8 + $0x4] sm:$0x3] }
  0x4c   : > { %855 = vmatpush.bf16.msra.mxu1 %v1985_v7  ;;  %844 = vmatpush.bf16.msra.mxu0 %v2026_v19 }
  0x50   : > { %856 = vmatpush.bf16.msra.mxu1 %v2009_v13 }
  0x52   : > { %v600_v22 = vld.sshfl [vmem:[#allocation1] sm:$0xff pattern:$0x73625140] }
  0x53   : > { %602 = vrot.lane.b32.xlu1 %v600_v22, %s1819_s9  ;;  %916 = vst [vmem:[#allocation1] ss:$4 sm:$0xff] %v914_v21  ;;  %v2038_v22 = vld [vmem:[%s2466_s4 + $0x68] sm:$0xff] }
  0x54   : > { %857 = vmatpush.bf16.msra.mxu1 %v2038_v22 }
  0x5a   : > { %v1924_v26 = vld.sshfl [vmem:[#allocation1] sm:$0xff pattern:$0x73625140] }
  0x5b   : > { %594 = vrot.lane.b32.xlu1 %v554_v25, %s1819_s9  ;;  %926 = vst [vmem:[#allocation1] ss:$4 sm:$0xff] %v914_v21  ;;  %v2053_v25 = vld [vmem:[%s2466_s4 + $0x20] sm:$0xff] }
  0x5c   : > { %845 = vmatpush.bf16.msra.mxu0 %v2053_v25 }
  0x62   : > { %v1930_v28 = vld.sshfl [vmem:[#allocation1] sm:$0xff pattern:$0x73625140] }
  0x63   : > { %938 = vst [vmem:[#allocation1] ss:$4 sm:$0xff] %v1928_v27 }
  0x6a   : > { %v939_v29 = vld.sshfl [vmem:[#allocation1] sm:$0xff pattern:$0x73625140] }
  0x6b   : > { %948 = vst [vmem:[#allocation1] ss:$4 sm:$0xff] %v1928_v27  ;;  %v940_v35 = vshrl.u32 %v939_v29, 16  ;;  %v943_v36 = vshll.u32 %v939_v29, 16  ;;  %v2058_v29 = vld [vmem:[%s2466_s4 + $0xd8] sm:$0xff] }
  0x6c   : > { %885 = vmatpush.bf16.msra.mxu3 %v2058_v29 }
  0x6d   : > { %v942_v37 = vrot.slane %v940_v35, 7  ;;  %v2082_v35 = vld [vmem:[%s2466_s4 + $0xd0] sm:$0xff] }
  0x6f   : > { %v945_v38 = vor.u32 %v943_v36, %v942_v37  ;;  %v2092_v37 = vld [vmem:[%s1894_s8 + $0x6] sm:$0x3] }
  0x70   : > { %886 = vmatpush.bf16.msra.mxu3 %v2082_v35  ;;  %2481 = vst [vmem:[#allocation5_spill] sm:$0xff] %v2092_v37 }
  0x71   : > { %v947_v40 = vsel %vm1918_vm7, 0, %v945_v38 }
  0x72   : > { %v949_v31 = vld.sshfl [vmem:[#allocation1] sm:$0xff pattern:$0x73625140]  ;;  %987 = vrot.lane.b32.xlu2 %v947_v40, %s1819_s9  ;;  %v2107_v40 = vld [vmem:[%s2466_s4 + $0x58] sm:$0xff] }
  0x73   : > { %961 = vst [vmem:[#allocation1] ss:$4 sm:$0xff] %v1711_v30  ;;  %v950_v48 = vshrl.u32 %v949_v31, 16  ;;  %v952_v49 = vshll.u32 %v949_v31, 16  ;;  %v2070_v31 = vld [vmem:[%s2466_s4 + $0xa0] sm:$0xff] }
  0x74   : > { %871 = vmatpush.bf16.msra.mxu2 %v2070_v31 }
  0x75   : > { %v954_v52 = vrot.slane %v952_v49, 1 }
  0x77   : > { %v955_v54 = vor.u32 %v954_v52, %v950_v48 }
  0x79   : > { %v957_v57 = vsel %vm1904_vm4, %v955_v54, 0  ;;  %v2141_v54 = vld [vmem:[%s2466_s4 + $0x90] sm:$0xff] }
  0x7a   : > { %v1935_v32 = vld.sshfl [vmem:[#allocation1] sm:$0xff pattern:$0x73625140]  ;;  %990 = vrot.lane.b32.xlu2 %v957_v57, %s1819_s9 }
  0x7b   : > { %971 = vst [vmem:[#allocation1] ss:$4 sm:$0xff] %v1711_v30  ;;  %v2152_v57 = vld [vmem:[%s2466_s4 + $0xc0] sm:$0xff] }
  0x82   : > { %v1937_v33 = vld.sshfl [vmem:[#allocation1] sm:$0xff pattern:$0x73625140] }
  0x83   : > { %981 = vst [vmem:[#allocation1] ss:$4 sm:$0xff] %v914_v21 }
  0x8a   : > { %v982_v34 = vld.sshfl [vmem:[#allocation1] sm:$0xff pattern:$0x73625140] }
  0x8b   : > { %992 = vst [vmem:[#allocation1] ss:$4 sm:$0xff] %v1711_v30  ;;  %984 = vrot.lane.b32.xlu0 %v982_v34, %s1819_s9  ;;  %v2065_v30 = vld [vmem:[%s2466_s4 + $0x60] sm:$0xff]  ;;  %v2077_v34 = vld [vmem:[%s2466_s4 + $0x18] sm:$0xff] }
  0x8c   : > { %858 = vmatpush.bf16.msra.mxu1 %v2065_v30  ;;  %846 = vmatpush.bf16.msra.mxu0 %v2077_v34 }
  0x90   : > { %859 = vmatpush.bf16.msra.mxu1 %v2107_v40 }
  0x92   : > { %v993_v41 = vld.sshfl [vmem:[#allocation1] sm:$0xff pattern:$0x73625140] }
  0x93   : > { %1088 = vst [vmem:[#allocation1] ss:$4 sm:$0xff] %v1714_v39  ;;  %995 = vrot.lane.b32.xlu2 %v993_v41, %s1819_s9  ;;  %v2112_v41 = vld [vmem:[%s2466_s4 + $0x98] sm:$0xff] }
  0x94   : > { %872 = vmatpush.bf16.msra.mxu2 %v2112_v41 }
  0x98   : > { %873 = vmatpush.bf16.msra.mxu2 %v2141_v54 }
  0x9a   : > { %v1944_v42 = vld.sshfl [vmem:[#allocation1] sm:$0xff pattern:$0x73625140] }
  0x9b   : > { %1098 = vst [vmem:[#allocation1] ss:$4 sm:$0xff] %v1714_v39 }
  0xa2   : > { %v1949_v44 = vld.sshfl [vmem:[#allocation1] sm:$0xff pattern:$0x73625140] }
  0xa3   : > { %1110 = vst [vmem:[#allocation1] ss:$4 sm:$0xff] %v1947_v43 }
  0xaa   : > { %v1111_v45 = vld.sshfl [vmem:[#allocation1] sm:$0xff pattern:$0x73625140] }
  0xab   : > { %1120 = vst [vmem:[#allocation1] ss:$4 sm:$0xff] %v1947_v43  ;;  %v1112_v46 = vshrl.u32 %v1111_v45, 16  ;;  %v1115_v47 = vshll.u32 %v1111_v45, 16  ;;  %v2117_v45 = vld [vmem:[%s2466_s4 + $0x10] sm:$0xff] }
  0xac   : > { %847 = vmatpush.bf16.msra.mxu0 %v2117_v45 }
  0xad   : > { %v1114_v51 = vrot.slane %v1112_v46, 7  ;;  %v2122_v46 = vld [vmem:[%s2466_s4 + $0xc8] sm:$0xff] }
  0xae   : > { %887 = vmatpush.bf16.msra.mxu3 %v2122_v46 }
  0xaf   : > { %v1117_v53 = vor.u32 %v1115_v47, %v1114_v51  ;;  %v502_v47 = vld [vmem:[%s395_s13] sm:$0x3]  ;;  %v2135_v51 = vld [vmem:[%s2466_s4 + $0x50] sm:$0xff] }
  0xb0   : > { %v2130_v48 = vsel %vm1878_vm1, %v502_v47, 0  ;;  %860 = vmatpush.bf16.msra.mxu1 %v2135_v51  ;;  %848 = vmatpush.bf16.msra.mxu0 %v2146_v0  ;;  %v573_v47 = vshll.u32 %v1911_v15, 16 }
  0xb1   : > { %v1119_v56 = vsel %vm1918_vm7, 0, %v1117_v53 }
  0xb2   : > { %v1121_v58 = vld.sshfl [vmem:[#allocation1] sm:$0xff pattern:$0x73625140]  ;;  %1159 = vrot.lane.b32.xlu0 %v1119_v56, %s1819_s9  ;;  %888 = vmatpush.bf16.msra.mxu3 %v2152_v57 }
  0xb3   : > { %1133 = vst [vmem:[#allocation1] ss:$4 sm:$0xff] %v1716_v55  ;;  %v1124_v61 = vshll.u32 %v1121_v58, 16  ;;  %v1122_v62 = vshrl.u32 %v1121_v58, 16  ;;  %v2157_v58 = vld [vmem:[%s2466_s4 + $0x48] sm:$0xff] }
  0xb4   : > { %861 = vmatpush.bf16.msra.mxu1 %v2157_v58 }
  0xb5   : > { %v1126_v63 = vrot.slane %v1124_v61, 1  ;;  %v519_v61 = vshrl.u32 %v1888_v3, 16 }
  0xb6   : > { %1041 = vmatpush.bf16.msrb.mxu3 %v1990_v9 }
  0xb7   : > { %v1127_v8 = vor.u32 %v1126_v63, %v1122_v62  ;;  %v522_v62 = vshll.u32 %v1888_v3, 16  ;;  %v2177_v3 = vld [vmem:[%s2466_s4 + $0x118] sm:$0xff] }
  0xb9   : > { %v1129_v18 = vsel %vm1904_vm4, %v1127_v8, 0  ;;  %v2171_v8 = vld [vmem:[%s2466_s4] sm:$0xff] }
  0xba   : > { %v1966_v59 = vld.sshfl [vmem:[#allocation1] sm:$0xff pattern:$0x73625140]  ;;  %849 = vmatpush.bf16.msra.mxu0 %v2171_v8  ;;  %1042 = vmatpush.bf16.msrb.mxu3 %v2014_v14 }
  0xbb   : > { %2479 = vst [vmem:[#allocation3_spill] sm:$0xff] %v1966_v59 }
  0xbc   : > { %1143 = vst [vmem:[#allocation1] ss:$4 sm:$0xff] %v1716_v55 }
  0xbe   : > { %898 = vmatpush.bf16.msrb.mxu0 %v2177_v3  ;;  %1043 = vmatpush.bf16.msrb.mxu3 %v2043_v23 }
  0xc2   : > { %1044 = vmatpush.bf16.msrb.mxu3 %v2070_v31 }
  0xc3   : > { %v1969_v60 = vld.sshfl [vmem:[#allocation1] sm:$0xff pattern:$0x73625140] }
  0xc4   : > { %1153 = vst [vmem:[#allocation1] ss:$4 sm:$0xff] %v1714_v39 }
  0xc5   : > { %v603_v56 = vpop.permute.xlu1 %602 }
  0xc6   : > { %1045 = vmatpush.bf16.msrb.mxu3 %v2112_v41 }
  0xca   : > { %1046 = vmatpush.bf16.msrb.mxu3 %v2141_v54 }
  0xcb   : > { %v1154_v1 = vld.sshfl [vmem:[#allocation1] sm:$0xff pattern:$0x73625140] }
  0xcc   : > { %1156 = vrot.lane.b32.xlu1 %v1154_v1, %s1819_s9  ;;  %1164 = vst [vmem:[#allocation1] ss:$4 sm:$0xff] %v1716_v55  ;;  %v598_v55 = vpop.permute.xlu0 %597  ;;  %v2166_v1 = vld [vmem:[%s2466_s4 + $0x88] sm:$0xff] }
  0xcd   : > { %874 = vmatpush.bf16.msra.mxu2 %v2166_v1 }
  0xce   : > { %1047 = vmatpush.bf16.msrb.mxu3 %v2166_v1 }
  0xd3   : > { %v1165_v21 = vld.sshfl [vmem:[#allocation1] sm:$0xff pattern:$0x73625140] }
  0xd4   : > { %1162 = vrot.lane.b32.xlu1 %v1129_v18, %s1819_s9  ;;  %1260 = vst [vmem:[#allocation1] ss:$4 sm:$0xff] %v2017_v17  ;;  %1167 = vrot.lane.b32.xlu0 %v1165_v21, %s1819_s9  ;;  %v521_v18 = vrot.slane %v519_v61, 7  ;;  %v570_v21 = vshrl.u32 %v1911_v15, 16 }
  0xd6   : > { %v572_v61 = vrot.slane %v570_v21, 7 }
  0xdb   : > { %v2084_v36 = vld.sshfl [vmem:[#allocation1] sm:$0xff pattern:$0x73625140] }
  0xdc   : > { %2480 = vst [vmem:[#allocation4_spill] sm:$0xff] %v2084_v36  ;;  %v524_v36 = vor.u32 %v522_v62, %v521_v18  ;;  %v2206_v62 = vld [vmem:[%s2466_s4 + $0x110] sm:$0xff]  ;;  %v575_v18 = vor.u32 %v573_v47, %v572_v61  ;;  %v595_v61 = vpop.permute.xlu1 %594 }
  0xdd   : > { %1270 = vst [vmem:[#allocation1] ss:$4 sm:$0xff] %v2017_v17  ;;  %899 = vmatpush.bf16.msrb.mxu0 %v2206_v62 }
  0xe4   : > { %v2094_v38 = vld.sshfl [vmem:[#allocation1] sm:$0xff pattern:$0x73625140] }
  0xe5   : > { %2482 = vst [vmem:[#allocation6_spill] sm:$0xff] %v2094_v38  ;;  %v2188_v38 = vld [vmem:[%s2466_s4 + $0x40] sm:$0xff] }
  0xe6   : > { %1282 = vst [vmem:[#allocation1] ss:$4 sm:$0xff] %v2092_v37  ;;  %862 = vmatpush.bf16.msra.mxu1 %v2188_v38 }
  0xea   : > { %1015 = vmatpush.bf16.msrb.mxu1 %v1975_v2 }
  0xed   : > { %v2101_v39 = vld.sshfl [vmem:[#allocation1] sm:$0xff pattern:$0x73625140] }
  0xee   : > { %1292 = vst [vmem:[#allocation1] ss:$4 sm:$0xff] %v2092_v37  ;;  %v534_v37 = vshll.u32 %v1899_v5, 16  ;;  %1016 = vmatpush.bf16.msrb.mxu1 %v1997_v10 }
  0xf0   : > { %v536_v15 = vrot.slane %v534_v37, 1  ;;  %v592_v37 = vpop.permute.xlu0 %591 }
  0xf2   : > { %1017 = vmatpush.bf16.msrb.mxu1 %v2026_v19 }
  0xf5   : > { %v1293_v49 = vld.sshfl [vmem:[#allocation1] sm:$0xff pattern:$0x73625140] }
  0xf6   : > { %v1294_v52 = vshrl.u32 %v1293_v49, 16  ;;  %v1296_v53 = vshll.u32 %v1293_v49, 16  ;;  %1303 = vst [vmem:[#allocation1] ss:$4 sm:$0xff] %v2130_v48  ;;  %1018 = vmatpush.bf16.msrb.mxu1 %v2053_v25 }
  0xf8   : > { %v1298_v63 = vrot.slane %v1296_v53, 1  ;;  %v532_v53 = vshrl.u32 %v1899_v5, 16  ;;  %v2197_v5 = vld [vmem:[%s2466_s4 + $0x80] sm:$0xff] }
  0xf9   : > { %875 = vmatpush.bf16.msra.mxu2 %v2197_v5  ;;  %1048 = vmatpush.bf16.msrb.mxu3 %v2197_v5 }
  0xfa   : > { %v1299_v49 = vor.u32 %v1298_v63, %v1294_v52  ;;  %v529_v63 = vsel %vm1918_vm7, 0, %v524_v36  ;;  %v537_v21 = vor.u32 %v536_v15, %v532_v53  ;;  %v614_v36 = vsel %vm604_vm8, %v1897_v4, %v598_v55  ;;  %v2228_v15 = vld [vmem:[%s2466_s4 + $0x108] sm:$0xff]  ;;  %1019 = vmatpush.bf16.msrb.mxu1 %v2077_v34 }
  0xfb   : > { %v582_v55 = vshll.u32 %v1913_v16, 16  ;;  %900 = vmatpush.bf16.msrb.mxu0 %v2228_v15 }
  0xfc   : > { %v1301_v59 = vsel %vm1904_vm4, %v1299_v49, 0  ;;  %v577_v49 = vsel %vm1918_vm7, 0, %v575_v18  ;;  %v542_v53 = vsel %vm1904_vm4, %v537_v21, 0  ;;  %876 = vmatmul.bf16.vlgmr.msra.gmra.mxu2 %v614_v36  ;;  %v1284_v18 = vshrl.u32 %v2101_v39, 16 }
  0xfd   : > { %v2199_v52 = vld.sshfl [vmem:[#allocation1] sm:$0xff pattern:$0x73625140]  ;;  %1332 = vrot.lane.b32.xlu0 %v1301_v59, %s1819_s9  ;;  %v607_v59 = vsel %vm604_vm8, %v529_v63, %v592_v37  ;;  %v618_v47 = vsel %vm604_vm8, %v577_v49, %v603_v56  ;;  %1028 = vmatpush.bf16.msrb.mxu2 %v1985_v7  ;;  %v611_v4 = vsel %vm604_vm8, %v542_v53, %v595_v61  ;;  %v580_v37 = vshrl.u32 %v1913_v16, 16 }
  0xfe   : > { %1313 = vst [vmem:[#allocation1] ss:$4 sm:$0xff] %v2130_v48  ;;  %850 = vmatmul.bf16.vlgmr.msra.gmra.mxu0 %v607_v59  ;;  %889 = vmatmul.bf16.vlgmr.msra.gmra.mxu3 %v618_v47  ;;  %v2241_v63 = vld [vmem:[%s2466_s4 + $0x100] sm:$0xff]  ;;  %v584_v21 = vrot.slane %v582_v55, 1  ;;  %v988_v59 = vpop.permute.xlu2 %987  ;;  %v1287_v49 = vshll.u32 %v2101_v39, 16  ;;  %v918_v16 = vshrl.u32 %v1924_v26, 16 }
  0xff   : > { %863 = vmatmul.bf16.vlgmr.msra.gmra.mxu1 %v611_v4  ;;  %901 = vmatpush.bf16.msrb.mxu0 %v2241_v63  ;;  %v930_v61 = vshll.u32 %v1930_v28, 16  ;;  %v921_v55 = vshll.u32 %v1924_v26, 16 }
 0x100   : > { %v585_v36 = vor.u32 %v584_v21, %v580_v37  ;;  %v920_v4 = vrot.slane %v918_v16, 7  ;;  %1020 = vmatpush.bf16.msrb.mxu1 %v2117_v45  ;;  %1200 = vmatpush.bf16.msra.mxu3 %v1985_v7  ;;  %v963_v16 = vshrl.u32 %v1935_v32, 16 }
 0x101   : > { %1029 = vmatpush.bf16.msrb.mxu2 %v2009_v13 }
 0x102   : > { %v587_v39 = vsel %vm1904_vm4, %v585_v36, 0  ;;  %v985_v36 = vpop.permute.xlu0 %984 }
 0x103   : > { %1054 = vmatpush.bf16.msra.mxu0 %v1956_v50 }
 0x104   : > { %1021 = vmatpush.bf16.msrb.mxu1 %v2146_v0  ;;  %1201 = vmatpush.bf16.msra.mxu3 %v2009_v13 }
 0x105   : > { %v2234_v56 = vld.sshfl [vmem:[#allocation1] sm:$0xff pattern:$0x73625140]  ;;  %1030 = vmatpush.bf16.msrb.mxu2 %v2038_v22 }
 0x106   : > { %1323 = vst [vmem:[#allocation1] ss:$4 sm:$0xff] %v2017_v17  ;;  %v1286_v17 = vrot.slane %v1284_v18, 7  ;;  %v932_v18 = vrot.slane %v930_v61, 1  ;;  %v991_v21 = vpop.permute.xlu2 %990 }
 0x107   : > { %1055 = vmatpush.bf16.msra.mxu0 %v1980_v6 }
 0x108   : > { %v1289_v53 = vor.u32 %v1287_v49, %v1286_v17  ;;  %v923_v49 = vor.u32 %v921_v55, %v920_v4  ;;  %1022 = vmatpush.bf16.msrb.mxu1 %v2171_v8  ;;  %v966_v4 = vshll.u32 %v1935_v32, 16  ;;  %1202 = vmatpush.bf16.msra.mxu3 %v2038_v22  ;;  %v975_v55 = vshll.u32 %v1937_v33, 16 }
 0x109   : > { %1031 = vmatpush.bf16.msrb.mxu2 %v2065_v30  ;;  %v973_v32 = vshrl.u32 %v1937_v33, 16 }
 0x10a   : > { %v1291_v37 = vsel %vm1918_vm7, 0, %v1289_v53 }
 0x10b   : > { %1056 = vmatpush.bf16.msra.mxu0 %v2002_v11 }
 0x10c   : > { %1071 = vmatpush.bf16.msra.mxu1 %v2177_v3  ;;  %1203 = vmatpush.bf16.msra.mxu3 %v2065_v30 }
 0x10d   : > { %v1324_v47 = vld.sshfl [vmem:[#allocation1] sm:$0xff pattern:$0x73625140]  ;;  %1032 = vmatpush.bf16.msrb.mxu2 %v2107_v40 }
 0x10e   : > { %1334 = vst [vmem:[#allocation1] ss:$4 sm:$0xff] %v2130_v48  ;;  %1326 = vrot.lane.b32.xlu2 %v1324_v47, %s1819_s9  ;;  %1709 = vmatmul.msk.bf16.vlgmr.msrb.gmra.mxu0 %vm604_vm8, %v587_v39  ;;  %v928_v48 = vshrl.u32 %v1930_v28, 16  ;;  %v1006_v28 = vsel %vm604_vm8, %v1928_v27, %v991_v21  ;;  %v925_v47 = vsel %vm1918_vm7, 0, %v923_v49  ;;  %v965_v39 = vrot.slane %v963_v16, 7 }
 0x10f   : > { %1057 = vmatpush.bf16.msra.mxu0 %v2031_v20  ;;  %1049 = vmatmul.bf16.vlgmr.msrb.gmra.mxu3 %v1006_v28  ;;  %v999_v27 = vsel %vm604_vm8, %v925_v47, %v985_v36  ;;  %v1102_v21 = vshll.u32 %v1949_v44, 16  ;;  %v1100_v49 = vshrl.u32 %v1949_v44, 16  ;;  %v1090_v16 = vshrl.u32 %v1944_v42, 16 }
 0x110   : > { %v933_v26 = vor.u32 %v932_v18, %v928_v48  ;;  %1023 = vmatmul.bf16.vlgmr.msrb.gmra.mxu1 %v999_v27  ;;  %v968_v48 = vor.u32 %v966_v4, %v965_v39  ;;  %1204 = vmatpush.bf16.msra.mxu3 %v2107_v40 }
 0x111   : > { %1033 = vmatpush.bf16.msrb.mxu2 %v2135_v51  ;;  %1072 = vmatpush.bf16.msra.mxu1 %v2206_v62  ;;  %v1092_v27 = vrot.slane %v1090_v16, 7 }
 0x112   : > { %v935_v61 = vsel %vm1904_vm4, %v933_v26, 0  ;;  %v970_v18 = vsel %vm1918_vm7, 0, %v968_v48  ;;  %v1104_v26 = vrot.slane %v1102_v21, 1 }
 0x113   : > { %1058 = vmatpush.bf16.msra.mxu0 %v2058_v29  ;;  %v1003_v53 = vsel %vm604_vm8, %v935_v61, %v988_v59  ;;  %v977_v59 = vrot.slane %v975_v55, 1 }
 0x114   : > { %1205 = vmatpush.bf16.msra.mxu3 %v2135_v51  ;;  %v1105_v36 = vor.u32 %v1104_v26, %v1100_v49 }
 0x115   : > { %v1335_v17 = vld.sshfl [vmem:[#allocation1] sm:$0xff pattern:$0x73625140]  ;;  %1034 = vmatpush.bf16.msrb.mxu2 %v2157_v58  ;;  %1073 = vmatpush.bf16.msra.mxu1 %v2228_v15  ;;  %v978_v33 = vor.u32 %v977_v59, %v973_v32 }
 0x116   : > { %1337 = vrot.lane.b32.xlu1 %v1335_v17, %s1819_s9  ;;  %1329 = vrot.lane.b32.xlu2 %v1291_v37, %s1819_s9  ;;  %v996_v37 = vpop.permute.xlu2 %995  ;;  %v1107_v44 = vsel %vm1904_vm4, %v1105_v36, 0 }
 0x117   : > { %1059 = vmatpush.bf16.msra.mxu0 %v2082_v35  ;;  %v1010_v17 = vsel %vm604_vm8, %v970_v18, %v996_v37  ;;  %v980_v28 = vsel %vm1904_vm4, %v978_v33, 0  ;;  %v1308_v18 = vshll.u32 %v2199_v52, 16 }
 0x118   : > { %1206 = vmatpush.bf16.msra.mxu3 %v2157_v58 }
 0x119   : > { %1035 = vmatpush.bf16.msrb.mxu2 %v2188_v38  ;;  %1074 = vmatpush.bf16.msra.mxu1 %v2241_v63 }
 0x11b   : > { %1060 = vmatpush.bf16.msra.mxu0 %v2122_v46 }
 0x11c   : > { %1036 = vmatmul.bf16.vlgmr.msrb.gmra.mxu2 %v1003_v53  ;;  %1207 = vmatpush.bf16.msra.mxu3 %v2188_v38  ;;  %v1093_v53 = vshll.u32 %v1944_v42, 16 }
 0x11d   : > { %1187 = vmatpush.bf16.msra.mxu2 %v1975_v2  ;;  %1226 = vmatpush.bf16.msrb.mxu1 %v1956_v50 }
 0x11e   : > { %v1095_v39 = vor.u32 %v1093_v53, %v1092_v27 }
 0x11f   : > { %1061 = vmatpush.bf16.msra.mxu0 %v2152_v57 }
 0x120   : > { %1712 = vmatmul.msk.bf16.vlgmr.msra.gmra.mxu1 %vm604_vm8, %v980_v28  ;;  %1357 = vmatpush.bf16.msrb.mxu3 %v1975_v2  ;;  %v1097_v42 = vsel %vm1918_vm7, 0, %v1095_v39 }
 0x121   : > { %1188 = vmatpush.bf16.msra.mxu2 %v1997_v10  ;;  %1227 = vmatpush.bf16.msrb.mxu1 %v1980_v6 }
 0x122   : > { %1062 = vmatmul.bf16.vlgmr.msra.gmra.mxu0 %v1010_v17 }
 0x123   : > { %1213 = vmatpush.bf16.msrb.mxu0 %v1990_v9 }
 0x124   : > { %v1160_v47 = vpop.permute.xlu0 %1159  ;;  %1358 = vmatpush.bf16.msrb.mxu3 %v1997_v10 }
 0x125   : > { %1189 = vmatpush.bf16.msra.mxu2 %v2026_v19  ;;  %1228 = vmatpush.bf16.msrb.mxu1 %v2002_v11  ;;  %v1175_v61 = vsel %vm604_vm8, %v1107_v44, %v1160_v47 }
 0x126   : > { %1208 = vmatmul.bf16.vlgmr.msra.gmra.mxu3 %v1175_v61 }
 0x127   : > { %1214 = vmatpush.bf16.msrb.mxu0 %v2014_v14 }
 0x128   : > { %1359 = vmatpush.bf16.msrb.mxu3 %v2026_v19  ;;  %v1147_v19 = vshll.u32 %v1969_v60, 16 }
 0x129   : > { %1190 = vmatpush.bf16.msra.mxu2 %v2053_v25  ;;  %1229 = vmatpush.bf16.msrb.mxu1 %v2031_v20 }
 0x12a   : > { %v1149_v4 = vrot.slane %v1147_v19, 1 }
 0x12b   : > { %1215 = vmatpush.bf16.msrb.mxu0 %v2043_v23 }
 0x12c   : > { %1360 = vmatpush.bf16.msrb.mxu3 %v2053_v25  ;;  %v1145_v25 = vshrl.u32 %v1969_v60, 16 }
 0x12d   : > { %1191 = vmatpush.bf16.msra.mxu2 %v2077_v34  ;;  %1230 = vmatpush.bf16.msrb.mxu1 %v2058_v29 }
 0x12f   : > { %1216 = vmatpush.bf16.msrb.mxu0 %v2070_v31 }
 0x130   : > { %1361 = vmatpush.bf16.msrb.mxu3 %v2077_v34 }
 0x131   : > { %1192 = vmatpush.bf16.msra.mxu2 %v2117_v45  ;;  %1231 = vmatpush.bf16.msrb.mxu1 %v2082_v35 }
 0x133   : > { %1217 = vmatpush.bf16.msrb.mxu0 %v2112_v41 }
 0x134   : > { %1362 = vmatpush.bf16.msrb.mxu3 %v2117_v45 }
 0x135   : > { %1193 = vmatpush.bf16.msra.mxu2 %v2146_v0  ;;  %1232 = vmatpush.bf16.msrb.mxu1 %v2122_v46 }
 0x137   : > { %1218 = vmatpush.bf16.msrb.mxu0 %v2141_v54 }
 0x138   : > { %1363 = vmatpush.bf16.msrb.mxu3 %v2146_v0  ;;  %v1315_v0 = vshrl.u32 %v2234_v56, 16 }
 0x139   : > { %1194 = vmatpush.bf16.msra.mxu2 %v2171_v8  ;;  %1233 = vmatpush.bf16.msrb.mxu1 %v2152_v57 }
 0x13b   : > { %1219 = vmatpush.bf16.msrb.mxu0 %v2166_v1 }
 0x13c   : > { %1364 = vmatpush.bf16.msrb.mxu3 %v2171_v8  ;;  %v2486_v8 = vld [vmem:[#allocation5_spill] sm:$0xff] }
 0x13d   : > { %1243 = vmatpush.bf16.msrb.mxu2 %v2177_v3  ;;  %1383 = vmatpush.bf16.msra.mxu1 %v1990_v9  ;;  %v1150_v9 = vor.u32 %v1149_v4, %v1145_v25 }
 0x13e   : > { %v1157_v2 = vpop.permute.xlu1 %1156 }
 0x13f   : > { %v1171_v10 = vsel %vm604_vm8, %v1097_v42, %v1157_v2  ;;  %1220 = vmatpush.bf16.msrb.mxu0 %v2197_v5  ;;  %v2430_v42 = vstv %s485_s7 }
 0x140   : > { %1195 = vmatmul.bf16.vlgmr.msra.gmra.mxu2 %v1171_v10  ;;  %1413 = vmatpush.bf16.msra.mxu3 %v2177_v3 }
 0x141   : > { %1244 = vmatpush.bf16.msrb.mxu2 %v2206_v62  ;;  %1384 = vmatpush.bf16.msra.mxu1 %v2014_v14 }
 0x143   : > { %1370 = vmatpush.bf16.msra.mxu0 %v1985_v7  ;;  %v2483_v7 = vld [vmem:[#allocation3_spill] sm:$0xff] }
 0x144   : > { %v1135_v48 = vshrl.u32 %v2483_v7, 16  ;;  %v1138_v32 = vshll.u32 %v2483_v7, 16  ;;  %1414 = vmatpush.bf16.msra.mxu3 %v2206_v62 }
 0x145   : > { %1245 = vmatpush.bf16.msrb.mxu2 %v2228_v15  ;;  %1385 = vmatpush.bf16.msra.mxu1 %v2043_v23 }
 0x146   : > { %v1163_v55 = vpop.permute.xlu1 %1162  ;;  %v1137_v60 = vrot.slane %v1135_v48, 7 }
 0x147   : > { %1371 = vmatpush.bf16.msra.mxu0 %v2009_v13  ;;  %v1178_v34 = vsel %vm604_vm8, %v1947_v43, %v1163_v55  ;;  %v1168_v13 = vpop.permute.xlu0 %1167  ;;  %v1152_v43 = vsel %vm1904_vm4, %v1150_v9, 0 }
 0x148   : > { %1221 = vmatmul.bf16.vlgmr.msrb.gmra.mxu0 %v1178_v34  ;;  %1415 = vmatpush.bf16.msra.mxu3 %v2228_v15 }
 0x149   : > { %1246 = vmatpush.bf16.msrb.mxu2 %v2241_v63  ;;  %1386 = vmatpush.bf16.msra.mxu1 %v2070_v31 }
 0x14b   : > { %1372 = vmatpush.bf16.msra.mxu0 %v2038_v22 }
 0x14c   : > { %1416 = vmatpush.bf16.msra.mxu3 %v2241_v63  ;;  %v1305_v63 = vshrl.u32 %v2199_v52, 16 }
 0x14d   : > { %1396 = vmatpush.bf16.msra.mxu2 %v1956_v50  ;;  %v1140_v50 = vor.u32 %v1138_v32, %v1137_v60  ;;  %1387 = vmatpush.bf16.msra.mxu1 %v2112_v41 }
 0x14e   : > { %v1307_v59 = vrot.slane %v1305_v63, 7 }
 0x14f   : > { %v1142_v45 = vsel %vm1918_vm7, 0, %v1140_v50  ;;  %1373 = vmatpush.bf16.msra.mxu0 %v2065_v30 }
 0x150   : > { %v1182_v14 = vsel %vm604_vm8, %v1142_v45, %v1168_v13  ;;  %1717 = vmatmul.msk.bf16.vlgmr.msrb.gmra.mxu2 %vm604_vm8, %v1152_v43  ;;  %v1310_v17 = vor.u32 %v1308_v18, %v1307_v59 }
 0x151   : > { %1397 = vmatpush.bf16.msra.mxu2 %v1980_v6  ;;  %1234 = vmatmul.bf16.vlgmr.msrb.gmra.mxu1 %v1182_v14  ;;  %v2484_v6 = vld [vmem:[#allocation4_spill] sm:$0xff] }
 0x152   : > { %1388 = vmatpush.bf16.msra.mxu1 %v2141_v54  ;;  %v1265_v22 = vshll.u32 %v2484_v6, 16  ;;  %v1312_v12 = vsel %vm1918_vm7, 0, %v1310_v17 }
 0x153   : > { %1374 = vmatpush.bf16.msra.mxu0 %v2107_v40 }
 0x155   : > { %1398 = vmatpush.bf16.msra.mxu2 %v2002_v11  ;;  %v1262_v11 = vshrl.u32 %v2484_v6, 16 }
 0x156   : > { %1389 = vmatpush.bf16.msra.mxu1 %v2166_v1 }
 0x157   : > { %1375 = vmatpush.bf16.msra.mxu0 %v2135_v51 }
 0x159   : > { %1399 = vmatpush.bf16.msra.mxu2 %v2031_v20  ;;  %v1264_v20 = vrot.slane %v1262_v11, 7 }
 0x15a   : > { %1390 = vmatpush.bf16.msra.mxu1 %v2197_v5 }
 0x15b   : > { %1376 = vmatpush.bf16.msra.mxu0 %v2157_v58  ;;  %v1267_v23 = vor.u32 %v1265_v22, %v1264_v20 }
 0x15d   : > { %1400 = vmatpush.bf16.msra.mxu2 %v2058_v29  ;;  %v2485_v29 = vld [vmem:[#allocation6_spill] sm:$0xff]  ;;  %v1269_v31 = vsel %vm1918_vm7, 0, %v1267_v23 }
 0x15e   : > { %v1274_v30 = vshll.u32 %v2485_v29, 16 }
 0x15f   : > { %1377 = vmatpush.bf16.msra.mxu0 %v2188_v38  ;;  %v1317_v38 = vshll.u32 %v2234_v56, 16  ;;  %v2423_v56 = vld [vmem:[%s2467_s5] ss:$0 sm:$0xff] }
 0x160   : > { %v1276_v40 = vrot.slane %v1274_v30, 1 }
 0x161   : > { %1401 = vmatpush.bf16.msra.mxu2 %v2082_v35  ;;  %v1272_v35 = vshrl.u32 %v2485_v29, 16  ;;  %v1319_v58 = vrot.slane %v1317_v38, 1 }
 0x163   : > { %v1320_v62 = vor.u32 %v1319_v58, %v1315_v0 }
 0x165   : > { %1402 = vmatpush.bf16.msra.mxu2 %v2122_v46  ;;  %v1277_v46 = vor.u32 %v1276_v40, %v1272_v35  ;;  %v1322_v15 = vsel %vm1904_vm4, %v1320_v62, 0 }
 0x167   : > { %v1279_v54 = vsel %vm1904_vm4, %v1277_v46, 0 }
 0x168   : > { %v1327_v41 = vpop.permute.xlu2 %1326 }
 0x169   : > { %1403 = vmatpush.bf16.msra.mxu2 %v2152_v57  ;;  %v1341_v51 = vsel %vm604_vm8, %v1269_v31, %v1327_v41 }
 0x16a   : > { %1365 = vmatmul.bf16.vlgmr.msrb.gmra.mxu3 %v1341_v51 }
 0x16f   : > { %v1333_v57 = vpop.permute.xlu0 %1332 }
 0x170   : > { %v1330_v1 = vpop.permute.xlu2 %1329  ;;  %v1348_v3 = vsel %vm604_vm8, %v2486_v8, %v1333_v57 }
 0x171   : > { %v1345_v5 = vsel %vm604_vm8, %v1279_v54, %v1330_v1  ;;  %1391 = vmatmul.bf16.vlgmr.msra.gmra.mxu1 %v1348_v3 }
 0x172   : > { %1378 = vmatmul.bf16.vlgmr.msra.gmra.mxu0 %v1345_v5 }
 0x17a   : > { %1721 = vmatmul.msk.bf16.vlgmr.msra.gmra.mxu3 %vm604_vm8, %v1322_v15 }
 0x17b   : > { %v851_v37 = vpop.f32.mrf.mxu0 }
 0x17c   : > { %v852_v21 = vadd.f32 %v2423_v56, %v851_v37  ;;  %v864_v33 = vpop.f32.mrf.mxu1 }
 0x17e   : > { %v865_v49 = vadd.f32 %v864_v33, %v852_v21 }
 0x17f   : > { %v877_v26 = vpop.f32.mrf.mxu2 }
 0x180   : > { %v878_v47 = vadd.f32 %v877_v26, %v865_v49 }
 0x181   : > { %v890_v28 = vpop.f32.mrf.mxu3 }
 0x182   : > { %v891_v61 = vadd.f32 %v890_v28, %v878_v47 }
 0x183   : > { %v853_v36 = vpop.f32.mrf.mxu0 }
 0x184   : > { %v866_v52 = vpop.f32.mrf.mxu1 }
 0x187   : > { %v879_v27 = vpop.f32.mrf.mxu2 }
 0x188   : > { %v1338_v44 = vpop.permute.xlu1 %1337 }
 0x189   : > { %v1352_v16 = vsel %vm604_vm8, %v1312_v12, %v1338_v44  ;;  %v892_v53 = vpop.f32.mrf.mxu3 }
 0x18a   : > { %1404 = vmatmul.bf16.vlgmr.msra.gmra.mxu2 %v1352_v16 }
 0x18b   : > { %v903_v39 = vpop.f32.mrf.mxu0 }
 0x18c   : > { %v904_v2 = vadd.f32 %v903_v39, %v891_v61 }
 0x18d   : > { %v1024_v4 = vpop.f32.mrf.mxu1 }
 0x18e   : > { %vm907_vm9 = vcmp.ge.f32.partialorder %v904_v2, 0.0  ;;  %v909_v24 = vmul.f32 %v2430_v42, %v904_v2  ;;  %v1025_v34 = vadd.f32 %v2423_v56, %v1024_v4 }
 0x190   : > { %v910_v10 = vsel %vm907_vm9, %v904_v2, %v909_v24 }
 0x191   : > { %v911_v19 = vpack.c.bf16 %v910_v10, %v910_v10 }
 0x192   : > { %v1050_v55 = vpop.f32.mrf.mxu3 }
 0x193   : > { %913 = vst.msk [vmem:[%s2437_s12] sm:$0x3] %vm912_vm10, %v911_v19  ;;  %v905_v25 = vpop.f32.mrf.mxu0 }
 0x195   : > { %v1026_v48 = vpop.f32.mrf.mxu1 }
 0x19a   : > { %v1052_v9 = vpop.f32.mrf.mxu3 }
 0x19d   : > { %v1076_v45 = vpop.f32.mrf.mxu1 }
 0x19f   : > { %v1037_v7 = vpop.f32.mrf.mxu2  ;;  %v1063_v50 = vpop.f32.mrf.mxu0 }
 0x1a0   : > { %v1038_v32 = vadd.f32 %v1037_v7, %v1025_v34 }
 0x1a2   : > { %v1051_v60 = vadd.f32 %v1050_v55, %v1038_v32 }
 0x1a4   : > { %v1064_v13 = vadd.f32 %v1063_v50, %v1051_v60 }
 0x1a5   : > { %v1078_v23 = vpop.f32.mrf.mxu1 }
 0x1a6   : > { %v1077_v14 = vadd.f32 %v1076_v45, %v1064_v13 }
 0x1a7   : > { %v1039_v43 = vpop.f32.mrf.mxu2  ;;  %v1065_v11 = vpop.f32.mrf.mxu0 }
 0x1a8   : > { %vm1080_vm11 = vcmp.ge.f32.partialorder %v1077_v14, 0.0  ;;  %v1081_v6 = vmul.f32 %v1077_v14, %v2430_v42 }
 0x1a9   : > { %v1209_v29 = vpop.f32.mrf.mxu3 }
 0x1aa   : > { %v1082_v20 = vsel %vm1080_vm11, %v1077_v14, %v1081_v6 }
 0x1ab   : > { %v1083_v22 = vpack.c.bf16 %v1082_v20, %v1082_v20 }
 0x1ad   : > { %1713 = vst.msk [vmem:[%s2437_s12 + $0x2] sm:$0x3] %vm912_vm10, %v1083_v22 }
 0x1b1   : > { %v1211_v30 = vpop.f32.mrf.mxu3 }
 0x1c3   : > { %v1196_v31 = vpop.f32.mrf.mxu2 }
 0x1c4   : > { %v1197_v35 = vadd.f32 %v2423_v56, %v1196_v31 }
 0x1c5   : > { %v1222_v40 = vpop.f32.mrf.mxu0 }
 0x1c6   : > { %v1210_v41 = vadd.f32 %v1209_v29, %v1197_v35 }
 0x1c8   : > { %v1223_v46 = vadd.f32 %v1222_v40, %v1210_v41 }
 0x1cb   : > { %v1198_v51 = vpop.f32.mrf.mxu2 }
 0x1cd   : > { %v1224_v54 = vpop.f32.mrf.mxu0 }
 0x1ce   : > { %v1235_v38 = vpop.f32.mrf.mxu1 }
 0x1cf   : > { %v1236_v0 = vadd.f32 %v1235_v38, %v1223_v46 }
 0x1d3   : > { %v1248_v58 = vpop.f32.mrf.mxu2 }
 0x1d4   : > { %v1249_v57 = vadd.f32 %v1248_v58, %v1236_v0 }
 0x1d6   : > { %v1237_v1 = vpop.f32.mrf.mxu1  ;;  %vm1252_vm12 = vcmp.ge.f32.partialorder %v1249_v57, 0.0  ;;  %v1253_v8 = vmul.f32 %v1249_v57, %v2430_v42 }
 0x1d8   : > { %v1254_v3 = vsel %vm1252_vm12, %v1249_v57, %v1253_v8 }
 0x1d9   : > { %v1255_v5 = vpack.c.bf16 %v1254_v3, %v1254_v3 }
 0x1db   : > { %1718 = vst.msk [vmem:[%s2437_s12 + $0x4] sm:$0x3] %vm912_vm10, %v1255_v5  ;;  %v1250_v62 = vpop.f32.mrf.mxu2 }
 0x1ed   : > { %v1366_v15 = vpop.f32.mrf.mxu3 }
 0x1ee   : > { %v1392_v63 = vpop.f32.mrf.mxu1  ;;  %v1367_v33 = vadd.f32 %v2423_v56, %v1366_v15 }
 0x1ef   : > { %v1379_v59 = vpop.f32.mrf.mxu0 }
 0x1f0   : > { %v1380_v12 = vadd.f32 %v1379_v59, %v1367_v33 }
 0x1f2   : > { %v1393_v26 = vadd.f32 %v1392_v63, %v1380_v12 }
 0x1f5   : > { %v1368_v18 = vpop.f32.mrf.mxu3 }
 0x1f6   : > { %v1394_v37 = vpop.f32.mrf.mxu1 }
 0x1f7   : > { %v1381_v21 = vpop.f32.mrf.mxu0 }
 0x1fd   : > { %v1418_v17 = vpop.f32.mrf.mxu3 }
 0x205   : > { %v1420_v49 = vpop.f32.mrf.mxu3 }
 0x20d   : > { %v1405_v28 = vpop.f32.mrf.mxu2 }
 0x20e   : > { %v1406_v36 = vadd.f32 %v1405_v28, %v1393_v26 }
 0x210   : > { %v1419_v44 = vadd.f32 %v1418_v17, %v1406_v36 }
 0x212   : > { %vm1422_vm13 = vcmp.ge.f32.partialorder %v1419_v44, 0.0  ;;  %v1423_v47 = vmul.f32 %v1419_v44, %v2430_v42 }
 0x214   : > { %v1424_v16 = vsel %vm1422_vm13, %v1419_v44, %v1423_v47 }
 0x215   : > { %v1425_v52 = vpack.c.bf16 %v1424_v16, %v1424_v16  ;;  %v1407_v61 = vpop.f32.mrf.mxu2 }
 0x217   : > { %1722 = vst.msk [vmem:[%s2437_s12 + $0x6] sm:$0x3] %vm912_vm10, %v1425_v52 }
 0x218 PF: > { %s17_s25 = sadd.s32 1, %s1816_s25   ;;  %s2487_s23 = smov %s1812_s24 }
 0x219   : > { %p14_p5 = scmp.ge.s32.totalorder %s17_s25, 4   ;;  %s2488_s24 = smov %s2490_s0 }
 0x21b   :  { %16 = sbr.rel (!%p14_p5) target bundleno = 2 (0x2), region = 86 }

// kernel: feature_extractor.10
= control target key start
LH: loop header
LB: loop body
LE: loop exit
PB: predicated region body
PF: predicated region fallthrough
CT: control target
= control target key end

     0   :  { %vm331_vm0 = vcmask 523264   ;;  %vm406_vm2 = vcmask 781312   ;;  %s745_s2 = inlined_call_operand.vmem [shape: bf16[576,96], index: 2, kind: input, shape index: {}]   ;;  %s746_s3 = inlined_call_operand.vmem [shape: f32[1,96], index: 3, kind: input, shape index: {}]   ;;  %s747_s1 = inlined_call_operand.vmem [shape: bf16[8,576], index: 1, kind: input, shape index: {}]   ;;  %s748_s0 = inlined_call_operand.<no memory space> [shape: f32[1], index: 0, kind: input, shape index: {}]   ;;  %s749_s4 = inlined_call_operand.vmem [shape: bf16[8,96], index: 4, kind: output, shape index: {}]  }
   0x1   :  { %v564_v0 = vld [vmem:[%s745_s2 + $0x38] sm:$0xff]  ;;  %v563_v4 = vld [vmem:[%s745_s2 + $0x30] sm:$0xff]  ;;  %v562_v8 = vld [vmem:[%s745_s2 + $0x28] sm:$0xff]  ;;  %v402_v63 = vstv %s748_s0 }
   0x2   :  { %v580_v1 = vld [vmem:[%s745_s2 + $0xb8] sm:$0xff]  ;;  %335 = vmatpush.bf16.msra.mxu0 %v564_v0  ;;  %v579_v5 = vld [vmem:[%s745_s2 + $0xb0] sm:$0xff]  ;;  %v578_v9 = vld [vmem:[%s745_s2 + $0xa8] sm:$0xff] }
   0x3   :  { %v588_v2 = vld [vmem:[%s745_s2 + $0xf8] sm:$0xff]  ;;  %361 = vmatpush.bf16.msra.mxu2 %v580_v1  ;;  %v587_v6 = vld [vmem:[%s745_s2 + $0xf0] sm:$0xff]  ;;  %v586_v10 = vld [vmem:[%s745_s2 + $0xe8] sm:$0xff] }
   0x4   :  { %v572_v3 = vld [vmem:[%s745_s2 + $0x78] sm:$0xff]  ;;  %374 = vmatpush.bf16.msra.mxu3 %v588_v2  ;;  %v571_v7 = vld [vmem:[%s745_s2 + $0x70] sm:$0xff]  ;;  %v570_v11 = vld [vmem:[%s745_s2 + $0x68] sm:$0xff] }
   0x5   :  { %348 = vmatpush.bf16.msra.mxu1 %v572_v3  ;;  %v561_v12 = vld [vmem:[%s745_s2 + $0x20] sm:$0xff]  ;;  %v560_v16 = vld [vmem:[%s745_s2 + $0x18] sm:$0xff]  ;;  %v559_v20 = vld [vmem:[%s745_s2 + $0x10] sm:$0xff] }
   0x6   :  { %336 = vmatpush.bf16.msra.mxu0 %v563_v4  ;;  %v577_v13 = vld [vmem:[%s745_s2 + $0xa0] sm:$0xff]  ;;  %v576_v17 = vld [vmem:[%s745_s2 + $0x98] sm:$0xff]  ;;  %v575_v21 = vld [vmem:[%s745_s2 + $0x90] sm:$0xff] }
   0x7   :  { %362 = vmatpush.bf16.msra.mxu2 %v579_v5  ;;  %v585_v14 = vld [vmem:[%s745_s2 + $0xe0] sm:$0xff]  ;;  %v584_v18 = vld [vmem:[%s745_s2 + $0xd8] sm:$0xff]  ;;  %v583_v22 = vld [vmem:[%s745_s2 + $0xd0] sm:$0xff] }
   0x8   :  { %375 = vmatpush.bf16.msra.mxu3 %v587_v6  ;;  %v569_v15 = vld [vmem:[%s745_s2 + $0x60] sm:$0xff]  ;;  %v568_v19 = vld [vmem:[%s745_s2 + $0x58] sm:$0xff]  ;;  %v567_v23 = vld [vmem:[%s745_s2 + $0x50] sm:$0xff] }
   0x9   :  { %349 = vmatpush.bf16.msra.mxu1 %v571_v7  ;;  %v558_v24 = vld [vmem:[%s745_s2 + $0x8] sm:$0xff]  ;;  %v19_v26 = vld [vmem:[%s747_s1] sm:$0xff]  ;;  %v592_v38 = vld [vmem:[%s745_s2 + $0x118] sm:$0xff] }
   0xa   :  { %337 = vmatpush.bf16.msra.mxu0 %v562_v8  ;;  %v574_v25 = vld [vmem:[%s745_s2 + $0x88] sm:$0xff]  ;;  %v101_v30 = vunpack.c.l.b16 %v19_v26  ;;  %v557_v32 = vld [vmem:[%s745_s2] sm:$0xff]  ;;  %v102_v35 = vunpack.c.h.b16 %v19_v26  ;;  %v591_v43 = vld [vmem:[%s745_s2 + $0x110] sm:$0xff] }
   0xb   :  { %363 = vmatpush.bf16.msra.mxu2 %v578_v9  ;;  %v20_v27 = vld [vmem:[%s747_s1 + $0x8] sm:$0xff]  ;;  %v573_v33 = vld [vmem:[%s745_s2 + $0x80] sm:$0xff]  ;;  %v21_v45 = vld [vmem:[%s747_s1 + $0x10] sm:$0xf] }
   0xc   :  { %376 = vmatpush.bf16.msra.mxu3 %v586_v10  ;;  %v582_v28 = vld [vmem:[%s745_s2 + $0xc8] sm:$0xff]  ;;  %v103_v31 = vunpack.c.l.b16 %v20_v27  ;;  %v104_v34 = vunpack.c.h.b16 %v20_v27  ;;  %v581_v36 = vld [vmem:[%s745_s2 + $0xc0] sm:$0xff]  ;;  %v106_v39 = vpack.c.b16 %v101_v30, %v101_v30  ;;  %v107_v42 = vpack.c.b16 %v102_v35, %v102_v35 }
   0xd   :  { %350 = vmatpush.bf16.msra.mxu1 %v570_v11  ;;  %v566_v29 = vld [vmem:[%s745_s2 + $0x48] sm:$0xff]  ;;  %v565_v37 = vld [vmem:[%s745_s2 + $0x40] sm:$0xff]  ;;  %v105_v47 = vunpack.c.l.b16 %v21_v45 }
   0xe   :  { %338 = vmatpush.bf16.msra.mxu0 %v561_v12  ;;  %v108_v40 = vpack.c.b16 %v103_v31, %v103_v31  ;;  %v109_v41 = vpack.c.b16 %v104_v34, %v104_v34  ;;  %v590_v44 = vld [vmem:[%s745_s2 + $0x108] sm:$0xff]  ;;  %v589_v46 = vld [vmem:[%s745_s2 + $0x100] sm:$0xff] }
   0xf   :  { %364 = vmatpush.bf16.msra.mxu2 %v577_v13  ;;  %v110_v48 = vpack.c.b16 %v105_v47, %v105_v47  ;;  %v593_v50 = vld [vmem:[%s746_s3] ss:$0 sm:$0xff] }
  0x10   :  { %377 = vmatpush.bf16.msra.mxu3 %v585_v14 }
  0x11   :  { %351 = vmatpush.bf16.msra.mxu1 %v569_v15 }
  0x12   :  { %339 = vmatpush.bf16.msra.mxu0 %v560_v16 }
  0x13   :  { %365 = vmatpush.bf16.msra.mxu2 %v576_v17 }
  0x14   :  { %378 = vmatpush.bf16.msra.mxu3 %v584_v18 }
  0x15   :  { %352 = vmatpush.bf16.msra.mxu1 %v568_v19 }
  0x16   :  { %340 = vmatpush.bf16.msra.mxu0 %v559_v20 }
  0x17   :  { %366 = vmatpush.bf16.msra.mxu2 %v575_v21 }
  0x18   :  { %379 = vmatpush.bf16.msra.mxu3 %v583_v22 }
  0x19   :  { %353 = vmatpush.bf16.msra.mxu1 %v567_v23 }
  0x1a   :  { %341 = vmatpush.bf16.msra.mxu0 %v558_v24 }
  0x1b   :  { %367 = vmatpush.bf16.msra.mxu2 %v574_v25 }
  0x1c   :  { %380 = vmatpush.bf16.msra.mxu3 %v582_v28 }
  0x1d   :  { %354 = vmatpush.bf16.msra.mxu1 %v566_v29 }
  0x1e   :  { %342 = vmatpush.bf16.msra.mxu0 %v557_v32 }
  0x1f   :  { %368 = vmatpush.bf16.msra.mxu2 %v573_v33 }
  0x20   :  { %381 = vmatpush.bf16.msra.mxu3 %v581_v36 }
  0x21   :  { %355 = vmatpush.bf16.msra.mxu1 %v565_v37  ;;  %343 = vmatmul.bf16.vlgmr.msra.gmra.mxu0 %v106_v39 }
  0x22   :  { %391 = vmatpush.bf16.msrb.mxu0 %v592_v38  ;;  %369 = vmatmul.bf16.vlgmr.msra.gmra.mxu2 %v108_v40 }
  0x23   :  { %382 = vmatmul.bf16.vlgmr.msra.gmra.mxu3 %v109_v41 }
  0x24   :  { %356 = vmatmul.bf16.vlgmr.msra.gmra.mxu1 %v107_v42 }
  0x26   :  { %392 = vmatpush.bf16.msrb.mxu0 %v591_v43 }
  0x2a   :  { %393 = vmatpush.bf16.msrb.mxu0 %v590_v44 }
  0x2e   :  { %394 = vmatpush.bf16.msrb.mxu0 %v589_v46 }
  0x31   :  { %556 = vmatmul.msk.bf16.vlgmr.msrb.gmra.mxu0 %vm331_vm0, %v110_v48 }
  0x9e   :  { %v344_v49 = vpop.f32.mrf.mxu0 }
  0x9f   :  { %v345_v52 = vadd.f32 %v593_v50, %v344_v49 }
  0xa1   :  { %v357_v51 = vpop.f32.mrf.mxu1 }
  0xa2   :  { %v358_v56 = vadd.f32 %v357_v51, %v345_v52 }
  0xa5   :  { %v370_v53 = vpop.f32.mrf.mxu2 }
  0xa6   :  { %v383_v54 = vpop.f32.mrf.mxu3  ;;  %v346_v55 = vpop.f32.mrf.mxu0  ;;  %v371_v58 = vadd.f32 %v370_v53, %v358_v56 }
  0xa8   :  { %v384_v60 = vadd.f32 %v383_v54, %v371_v58 }
  0xa9   :  { %v359_v57 = vpop.f32.mrf.mxu1 }
  0xad   :  { %v372_v59 = vpop.f32.mrf.mxu2 }
  0xae   :  { %v385_v61 = vpop.f32.mrf.mxu3  ;;  %v396_v62 = vpop.f32.mrf.mxu0 }
  0xaf   :  { %v397_v0 = vadd.f32 %v396_v62, %v384_v60 }
  0xb1   :  { %vm401_vm1 = vcmp.ge.f32.partialorder %v397_v0, 0.0  ;;  %v403_v1 = vmul.f32 %v402_v63, %v397_v0 }
  0xb3   :  { %v404_v2 = vsel %vm401_vm1, %v397_v0, %v403_v1 }
  0xb4   :  { %v405_v3 = vpack.c.bf16 %v404_v2, %v404_v2 }
  0xb6   :  { %407 = vst.msk [vmem:[%s749_s4] sm:$0xf] %vm406_vm2, %v405_v3  ;;  %v398_v4 = vpop.f32.mrf.mxu0 }

// kernel: feature_extractor.11
= control target key start
LH: loop header
LB: loop body
LE: loop exit
PB: predicated region body
PF: predicated region fallthrough
CT: control target
= control target key end

     0   :  { %s1729_s23 = smov 0   ;;  %s1731_s24 = smov 0   ;;  %s2246_s0 = inlined_call_operand.<no memory space> [shape: f32[1], index: 0, kind: input, shape index: {}]   ;;  %s2247_s1 = inlined_call_operand.vmem [shape: bf16[2,2,2,96], index: 1, kind: input, shape index: {}, may-alias: {1,2,3}]   ;;  %s2248_s2 = inlined_call_operand.vmem [shape: bf16[2,2,2,96], index: 2, kind: input, shape index: {}, may-alias: {1,2,3}]   ;;  %s2249_s3 = inlined_call_operand.vmem [shape: bf16[2,2,2,96], index: 3, kind: input, shape index: {}, may-alias: {1,2,3}]   ;;  %s2250_s4 = inlined_call_operand.vmem [shape: bf16[864,96], index: 4, kind: input, shape index: {}]   ;;  %s2251_s5 = inlined_call_operand.vmem [shape: f32[1,96], index: 5, kind: input, shape index: {}]   ;;  %s2252_s6 = inlined_call_operand.vmem [shape: bf16[2,2,2,96], index: 6, kind: output, shape index: {}]  }
   0x1   :  { %11 = sst [smem:[#allocation2]] %s2246_s0  ;;  %s1733_s25 = smov 0  }
   0x2 LB: > { %s29_s0 = sadd.s32 1, %s1681_s24  ;;  %p1352_p0 = scmp.ge.s32.totalorder %s1685_s25, 1  ;;  %s1685_s25 = sphi %s1733_s25, %s17_s25   ;;  %s1681_s24 = sphi %s1731_s24, %s2258_s24   ;;  %s1677_s23 = sphi %s1729_s23, %s2257_s23  }
   0x3   : > { %p31_p1 = scmp.ge.s32.totalorder %s29_s0, 2  ;;  %p293_p2 = scmp.lt.s32.totalorder %s1685_s25, 3 }
   0x5   : > { %s2260_s0 = smov (%p31_p1, %s29_s0), 0  ;;  %p294_p3 = pnand %p1352_p0, %p293_p2 }
   0x6   : > { %p352_p4 = scmp.lt.s32.totalorder (!%p294_p3), %s1677_s23, 1  ;;  %s1688_s9 = smov (!%p294_p3), 64  }
   0x7   : > { %297 = sbr.rel (%p294_p3) target bundleno = 389 (0x185), region = 44  ;;  %s1689_s10 = smov (!%p294_p3), 32  }
   0x8   : > { %s1690_s11 = smov (!%p294_p3), 96   ;;  %s2228_s7 = sld [smem:[#allocation2]] (!%p294_p3) }
   0xc   : > { %s2262_s23 = smov (!%p352_p4, %s1677_s23), 1  ;;  %vm1687_vm0 = vmmov 0   ;;  %vm547_vm2 = vcmask 1040384   ;;  %vm548_vm3 = vsmask.f32 256  ;;  %v1807_v27 = vld [vmem:[%s2250_s4 + $0xb8] sm:$0xff] }
   0xd   : > { %s1747_s26 = sshll.u32 %s2262_s23, 1  ;;  %vm1749_vm1 = vmpackc.low %vm1687_vm0, %vm1687_vm0  ;;  %986 = vmatpush.bf16.msra.mxu2 %v1807_v27  ;;  %v1823_v30 = vld [vmem:[%s2250_s4 + $0xb0] sm:$0xff]  ;;  %v1828_v31 = vld [vmem:[%s2250_s4 + $0x38] sm:$0xff]  ;;  %vm617_vm5 = vcmask 261120   ;;  %vm608_vm6 = vcmask 785408   ;;  %vm613_vm7 = vcmask 523264  }
   0xe   : > { %s370_s29 = scalar_lea.vmem %s2248_s2, %s1747_s26  ;;  %s1765_s8 = scalar_lea.vmem %s2247_s1, %s1747_s26  ;;  %vm1770_vm4 = vmand %vm547_vm2, %vm548_vm3  ;;  %960 = vmatpush.bf16.msra.mxu0 %v1828_v31  ;;  %v1835_v33 = vld [vmem:[%s2250_s4 + $0xa8] sm:$0xff]  ;;  %v1843_v37 = vld [vmem:[%s2250_s4 + $0x30] sm:$0xff]  ;;  %vm1056_vm9 = vcmask 778240  }
   0xf   : > { %v512_v1 = vld [vmem:[%s370_s29] sm:$0x1]  ;;  %v1357_v12 = vld [vmem:[%s1765_s8 + $0x1] sm:$0x1]  ;;  %s384_s14 = sadd.s32 1, %s1747_s26  ;;  %v1848_v38 = vld [vmem:[%s2250_s4 + $0x78] sm:$0xff]  ;;  %s397_s13 = scalar_lea.vmem %s2252_s6, %s1747_s26 }
  0x10   : > { %v525_v2 = vsel %vm1749_vm1, %v512_v1, 0  ;;  %v1768_v4 = vld [vmem:[%s1765_s8] sm:$0x1]  ;;  %v1801_v24 = vld [vmem:[%s1765_s8 + $0x1] sm:$0x1]  ;;  %s385_s17 = scalar_lea.vmem %s2249_s3, %s384_s14  ;;  %973 = vmatpush.bf16.msra.mxu1 %v1848_v38  ;;  %v1862_v41 = vld [vmem:[%s2250_s4 + $0x28] sm:$0xff] }
  0x11   : > { %542 = vst [vmem:[#allocation1] ss:$9 sm:$0xff] %v525_v2  ;;  %v1792_v21 = vld [vmem:[%s1765_s8] sm:$0x1]  ;;  %987 = vmatpush.bf16.msra.mxu2 %v1823_v30  ;;  %v1867_v42 = vld [vmem:[%s2250_s4 + $0x70] sm:$0xff]  ;;  %v1874_v43 = vld [vmem:[%s2250_s4 + $0x98] sm:$0xff] }
  0x12   : > { %v527_v32 = vld [vmem:[%s385_s17] sm:$0x1]  ;;  %961 = vmatpush.bf16.msra.mxu0 %v1843_v37  ;;  %v1887_v47 = vld [vmem:[%s2250_s4 + $0x68] sm:$0xff]  ;;  %v1892_v48 = vld [vmem:[%s2250_s4 + $0x90] sm:$0xff] }
  0x13   : > { %v540_v34 = vsel %vm1749_vm1, %v527_v32, 0  ;;  %v1853_v39 = vld [vmem:[%s2250_s4 + $0xa0] sm:$0xff]  ;;  %v1897_v49 = vld [vmem:[%s2250_s4 + $0xf8] sm:$0xff]  ;;  %v1918_v53 = vld [vmem:[%s2250_s4 + $0x88] sm:$0xff] }
  0x14   : > { %974 = vmatpush.bf16.msra.mxu1 %v1867_v42  ;;  %v1882_v46 = vld [vmem:[%s2250_s4 + $0x20] sm:$0xff]  ;;  %v1906_v51 = vld [vmem:[%s2250_s4 + $0x18] sm:$0xff]  ;;  %999 = vmatpush.bf16.msra.mxu3 %v1897_v49  ;;  %v1924_v54 = vld [vmem:[%s2250_s4 + $0xf0] sm:$0xff] }
  0x15   : > { %988 = vmatpush.bf16.msra.mxu2 %v1835_v33  ;;  %v1911_v52 = vld [vmem:[%s2250_s4 + $0x60] sm:$0xff]  ;;  %v1931_v55 = vld [vmem:[%s2250_s4 + $0x10] sm:$0xff]  ;;  %v1936_v56 = vld [vmem:[%s2250_s4 + $0x58] sm:$0xff] }
  0x16   : > { %962 = vmatpush.bf16.msra.mxu0 %v1862_v41  ;;  %v1944_v58 = vld [vmem:[%s2250_s4 + $0x80] sm:$0xff]  ;;  %v1951_v59 = vld [vmem:[%s2250_s4 + $0xe8] sm:$0xff]  ;;  %v1968_v62 = vld [vmem:[%s2250_s4 + $0x50] sm:$0xff] }
  0x17   : > { %v1956_v60 = vld [vmem:[%s2250_s4 + $0x1a8] sm:$0xff]  ;;  %v1976_v63 = vld [vmem:[%s2250_s4 + $0xe0] sm:$0xff] }
  0x18   : > { %v1759_v3 = vld [vmem:[#allocation1] sm:$0xff]  ;;  %975 = vmatpush.bf16.msra.mxu1 %v1887_v47  ;;  %1000 = vmatpush.bf16.msra.mxu3 %v1924_v54  ;;  %v1963_v61 = vld [vmem:[%s2250_s4 + $0x8] sm:$0xff] }
  0x19   : > { %551 = vst [vmem:[#allocation1] ss:$9 sm:$0xff] %v525_v2  ;;  %989 = vmatpush.bf16.msra.mxu2 %v1853_v39  ;;  %v1981_v0 = vld [vmem:[%s2250_s4 + $0x1a0] sm:$0xff] }
  0x1a   : > { %963 = vmatpush.bf16.msra.mxu0 %v1882_v46  ;;  %v1988_v1 = vld [vmem:[%s2250_s4] sm:$0xff] }
  0x1b   : > { %v2094_v32 = vld [vmem:[%s2250_s4 + $0x180] sm:$0xff] }
  0x1c   : > { %976 = vmatpush.bf16.msra.mxu1 %v1911_v52  ;;  %1001 = vmatpush.bf16.msra.mxu3 %v1951_v59 }
  0x1d   : > { %990 = vmatpush.bf16.msra.mxu2 %v1874_v43 }
  0x1e   : > { %964 = vmatpush.bf16.msra.mxu0 %v1906_v51 }
  0x20   : > { %v552_v6 = vld [vmem:[#allocation1] sm:$0xff]  ;;  %977 = vmatpush.bf16.msra.mxu1 %v1936_v56  ;;  %1002 = vmatpush.bf16.msra.mxu3 %v1976_v63 }
  0x21   : > { %v553_v7 = vshrl.u32 %v552_v6, 16  ;;  %559 = vst [vmem:[#allocation1] ss:$9 sm:$0xff] %v1768_v4  ;;  %991 = vmatpush.bf16.msra.mxu2 %v1892_v48 }
  0x22   : > { %965 = vmatpush.bf16.msra.mxu0 %v1931_v55 }
  0x23   : > { %v556_v8 = vsel %vm1770_vm4, %v553_v7, 0  ;;  %v1998_v7 = vld [vmem:[%s2250_s4 + $0x138] sm:$0xff] }
  0x24   : > { %592 = vrot.lane.b32.xlu0 %v556_v8, %s1688_s9  ;;  %978 = vmatpush.bf16.msra.mxu1 %v1968_v62  ;;  %v2005_v8 = vld [vmem:[%s2250_s4 + $0xd8] sm:$0xff] }
  0x25   : > { %992 = vmatpush.bf16.msra.mxu2 %v1918_v53  ;;  %1003 = vmatpush.bf16.msra.mxu3 %v2005_v8 }
  0x26   : > { %966 = vmatpush.bf16.msra.mxu0 %v1963_v61 }
  0x28   : > { %v560_v9 = vld [vmem:[#allocation1] sm:$0xff] }
  0x29   : > { %v561_v10 = vshll.u32 %v560_v9, 16  ;;  %565 = vst [vmem:[#allocation1] ss:$9 sm:$0xff] %v1768_v4  ;;  %993 = vmatpush.bf16.msra.mxu2 %v1944_v58 }
  0x2a   : > { %967 = vmatpush.bf16.msra.mxu0 %v1988_v1 }
  0x2b   : > { %v564_v11 = vsel %vm1770_vm4, 0, %v561_v10  ;;  %v2012_v10 = vld [vmem:[%s2250_s4 + $0x198] sm:$0xff] }
  0x2c   : > { %595 = vrot.lane.b32.xlu0 %v564_v11, %s1689_s10  ;;  %v2019_v11 = vld [vmem:[%s2250_s4 + $0x40] sm:$0xff] }
  0x2d   : > { %1040 = vmatpush.bf16.msrb.mxu2 %v1956_v60 }
  0x2e   : > { %1012 = vmatpush.bf16.msrb.mxu0 %v1998_v7 }
  0x30   : > { %v566_v13 = vld [vmem:[#allocation1] sm:$0xff] }
  0x31   : > { %574 = vst [vmem:[#allocation1] ss:$9 sm:$0xff] %v1357_v12  ;;  %v567_v19 = vshrl.u32 %v566_v13, 16  ;;  %1041 = vmatpush.bf16.msrb.mxu2 %v1981_v0  ;;  %v2030_v13 = vld [vmem:[%s2250_s4 + $0x178] sm:$0xff] }
  0x33   : > { %v570_v20 = vsel %vm1770_vm4, %v567_v19, 0  ;;  %v2057_v19 = vld [vmem:[%s2250_s4 + $0x170] sm:$0xff] }
  0x35   : > { %1042 = vmatpush.bf16.msrb.mxu2 %v2012_v10 }
  0x38   : > { %v575_v14 = vld [vmem:[#allocation1] sm:$0xff] }
  0x39   : > { %580 = vst [vmem:[#allocation1] ss:$9 sm:$0xff] %v1357_v12  ;;  %v576_v15 = vshll.u32 %v575_v14, 16  ;;  %v2036_v14 = vld [vmem:[%s2250_s4 + $0xd0] sm:$0xff] }
  0x3a   : > { %1004 = vmatpush.bf16.msra.mxu3 %v2036_v14 }
  0x3b   : > { %v579_v16 = vsel %vm1770_vm4, 0, %v576_v15 }
  0x3c   : > { %601 = vrot.lane.b32.xlu2 %v579_v16, %s1688_s9  ;;  %v2044_v16 = vld [vmem:[%s2250_s4 + $0x190] sm:$0xff] }
  0x3d   : > { %1043 = vmatpush.bf16.msrb.mxu2 %v2044_v16 }
  0x40   : > { %v1786_v17 = vld [vmem:[#allocation1] sm:$0xff] }
  0x41   : > { %586 = vst [vmem:[#allocation1] ss:$9 sm:$0xff] %v525_v2  ;;  %v1993_v2 = vld [vmem:[%s2250_s4 + $0x48] sm:$0xff] }
  0x42   : > { %979 = vmatpush.bf16.msra.mxu1 %v1993_v2 }
  0x46   : > { %980 = vmatpush.bf16.msra.mxu1 %v2019_v11 }
  0x48   : > { %v587_v18 = vld [vmem:[#allocation1] sm:$0xff] }
  0x49   : > { %589 = vrot.lane.b32.xlu1 %v587_v18, %s1690_s11  ;;  %603 = vst [vmem:[#allocation1] ss:$9 sm:$0xff] %v1357_v12  ;;  %v2025_v12 = vld [vmem:[%s2250_s4 + $0x130] sm:$0xff]  ;;  %v2052_v18 = vld [vmem:[%s2250_s4 + $0x128] sm:$0xff] }
  0x4a   : > { %1013 = vmatpush.bf16.msrb.mxu0 %v2025_v12  ;;  %1025 = vmatpush.bf16.msrb.mxu1 %v2030_v13 }
  0x4e   : > { %1014 = vmatpush.bf16.msrb.mxu0 %v2052_v18  ;;  %1026 = vmatpush.bf16.msrb.mxu1 %v2057_v19 }
  0x50   : > { %v604_v22 = vld [vmem:[#allocation1] sm:$0xff] }
  0x51   : > { %598 = vrot.lane.b32.xlu1 %v570_v20, %s1690_s11  ;;  %1060 = vst [vmem:[#allocation1] ss:$9 sm:$0xff] %v1792_v21  ;;  %v2064_v20 = vld [vmem:[%s2250_s4 + $0xc8] sm:$0xff] }
  0x52   : > { %1005 = vmatpush.bf16.msra.mxu3 %v2064_v20 }
  0x58   : > { %v1796_v23 = vld [vmem:[#allocation1] sm:$0xff] }
  0x59   : > { %606 = vrot.lane.b32.xlu1 %v604_v22, %s1689_s10  ;;  %1066 = vst [vmem:[#allocation1] ss:$9 sm:$0xff] %v1792_v21  ;;  %v2077_v22 = vld [vmem:[%s2250_s4 + $0x120] sm:$0xff] }
  0x5a   : > { %1015 = vmatpush.bf16.msrb.mxu0 %v2077_v22 }
  0x60   : > { %v1067_v25 = vld [vmem:[#allocation1] sm:$0xff] }
  0x61   : > { %v1068_v26 = vshrl.u32 %v1067_v25, 16  ;;  %1074 = vst [vmem:[#allocation1] ss:$9 sm:$0xff] %v1801_v24  ;;  %v2082_v25 = vld [vmem:[%s2250_s4 + $0x168] sm:$0xff] }
  0x62   : > { %1027 = vmatpush.bf16.msrb.mxu1 %v2082_v25 }
  0x63   : > { %v1071_v28 = vsel %vm1770_vm4, %v1068_v26, 0  ;;  %v2088_v26 = vld [vmem:[%s2250_s4 + $0xc0] sm:$0xff] }
  0x64   : > { %1105 = vrot.lane.b32.xlu0 %v1071_v28, %s1688_s9  ;;  %1006 = vmatpush.bf16.msra.mxu3 %v2088_v26 }
  0x68   : > { %v1814_v29 = vld [vmem:[#allocation1] sm:$0xff]  ;;  %1143 = vmatpush.bf16.msrb.mxu3 %v1828_v31  ;;  %v2122_v31 = vld [vmem:[%s2250_s4 + $0x158] sm:$0xff] }
  0x69   : > { %1080 = vst [vmem:[#allocation1] ss:$9 sm:$0xff] %v1801_v24  ;;  %v1076_v9 = vshll.u32 %v1814_v29, 16 }
  0x6b   : > { %v1079_v15 = vsel %vm1770_vm4, 0, %v1076_v9 }
  0x6c   : > { %1144 = vmatpush.bf16.msrb.mxu3 %v1843_v37  ;;  %v1622_v37 = vld [vmem:[%s2250_s4 + $0x150] sm:$0xff] }
  0x70   : > { %v1081_v35 = vld [vmem:[#allocation1] sm:$0xff]  ;;  %1145 = vmatpush.bf16.msrb.mxu3 %v1862_v41  ;;  %v1621_v41 = vld [vmem:[%s2250_s4 + $0x148] sm:$0xff] }
  0x71   : > { %v1082_v36 = vshrl.u32 %v1081_v35, 16  ;;  %1087 = vst [vmem:[#allocation1] ss:$9 sm:$0xff] %v540_v34  ;;  %v2110_v35 = vld [vmem:[%s2250_s4 + $0x160] sm:$0xff] }
  0x72   : > { %1028 = vmatpush.bf16.msrb.mxu1 %v2110_v35 }
  0x73   : > { %v1085_v40 = vsel %vm1770_vm4, %v1082_v36, 0  ;;  %v2117_v36 = vld [vmem:[%s2250_s4 + $0x110] sm:$0xff] }
  0x74   : > { %1111 = vrot.lane.b32.xlu0 %v1085_v40, %s1690_s11  ;;  %1146 = vmatpush.bf16.msrb.mxu3 %v1882_v46 }
  0x76   : > { %1029 = vmatpush.bf16.msrb.mxu1 %v2122_v31 }
  0x78   : > { %v1088_v44 = vld [vmem:[#allocation1] sm:$0xff]  ;;  %1147 = vmatpush.bf16.msrb.mxu3 %v1906_v51 }
  0x79   : > { %v1089_v45 = vshll.u32 %v1088_v44, 16  ;;  %1093 = vst [vmem:[#allocation1] ss:$9 sm:$0xff] %v540_v34 }
  0x7a   : > { %1030 = vmatpush.bf16.msrb.mxu1 %v1622_v37 }
  0x7b   : > { %v1092_v50 = vsel %vm1770_vm4, 0, %v1089_v45  ;;  %v2133_v45 = vld [vmem:[%s2250_s4 + $0x108] sm:$0xff] }
  0x7c   : > { %1114 = vrot.lane.b32.xlu1 %v1092_v50, %s1688_s9  ;;  %v582_v50 = vshrl.u32 %v1786_v17, 16  ;;  %1148 = vmatpush.bf16.msrb.mxu3 %v1931_v55  ;;  %v544_v17 = vshll.u32 %v1759_v3, 16 }
  0x7e   : > { %1031 = vmatpush.bf16.msrb.mxu1 %v1621_v41  ;;  %v550_v46 = vsel %vm1770_vm4, 0, %v544_v17 }
  0x80   : > { %v1938_v57 = vld [vmem:[#allocation1] sm:$0xff]  ;;  %1149 = vmatpush.bf16.msrb.mxu3 %v1963_v61 }
  0x81   : > { %1099 = vst [vmem:[#allocation1] ss:$9 sm:$0xff] %v1792_v21  ;;  %v2070_v21 = vld [vmem:[%s2250_s4 + $0x188] sm:$0xff] }
  0x82   : > { %1044 = vmatpush.bf16.msrb.mxu2 %v2070_v21 }
  0x84   : > { %1150 = vmatpush.bf16.msrb.mxu3 %v1988_v1 }
  0x86   : > { %1045 = vmatpush.bf16.msrb.mxu2 %v2094_v32 }
  0x88   : > { %v1100_v6 = vld [vmem:[#allocation1] sm:$0xff] }
  0x89   : > { %1102 = vrot.lane.b32.xlu2 %v1100_v6, %s1690_s11  ;;  %1116 = vst [vmem:[#allocation1] ss:$9 sm:$0xff] %v540_v34  ;;  %v2105_v34 = vld [vmem:[%s2250_s4 + $0x118] sm:$0xff]  ;;  %v585_v6 = vsel %vm1770_vm4, %v582_v50, 0 }
  0x8a   : > { %1016 = vmatpush.bf16.msrb.mxu0 %v2105_v34 }
  0x8e   : > { %1017 = vmatpush.bf16.msrb.mxu0 %v2117_v36 }
  0x90   : > { %v1117_v28 = vld [vmem:[#allocation1] sm:$0xff] }
  0x91   : > { %1108 = vrot.lane.b32.xlu2 %v1079_v15, %s1689_s10 }
  0x92   : > { %1018 = vmatpush.bf16.msrb.mxu0 %v2133_v45 }
  0x96   : > { %v593_v29 = vpop.permute.xlu0 %592 }
  0x99   : > { %1119 = vrot.lane.b32.xlu2 %v1117_v28, %s1689_s10 }
  0x9e   : > { %v596_v40 = vpop.permute.xlu0 %595 }
  0x9f   : > { %v619_v44 = vsel %vm617_vm5, %v593_v29, %v596_v40 }
  0xa0   : > { %994 = vmatmul.bf16.vlgmr.msra.gmra.mxu2 %v619_v44 }
  0xa1   : > { %1156 = vmatpush.bf16.msra.mxu2 %v1848_v38  ;;  %v2143_v38 = vld [vmem:[%s2250_s4 + $0x100] sm:$0xff] }
  0xa2   : > { %1019 = vmatpush.bf16.msrb.mxu0 %v2143_v38 }
  0xa5   : > { %1157 = vmatpush.bf16.msra.mxu2 %v1867_v42  ;;  %v1620_v42 = vld [vmem:[%s2250_s4 + $0x140] sm:$0xff] }
  0xa6   : > { %1032 = vmatpush.bf16.msrb.mxu1 %v1620_v42 }
  0xa9   : > { %1158 = vmatpush.bf16.msra.mxu2 %v1887_v47 }
  0xad   : > { %1159 = vmatpush.bf16.msra.mxu2 %v1911_v52 }
  0xb0   : > { %1574 = vmatmul.msk.bf16.vlgmr.msrb.gmra.mxu2 %vm608_vm6, %v585_v6 }
  0xb1   : > { %1160 = vmatpush.bf16.msra.mxu2 %v1936_v56 }
  0xb5   : > { %1161 = vmatpush.bf16.msra.mxu2 %v1968_v62 }
  0xb9   : > { %1162 = vmatpush.bf16.msra.mxu2 %v1993_v2 }
  0xbb   : > { %v590_v47 = vpop.permute.xlu1 %589 }
  0xbc   : > { %v611_v51 = vsel %vm608_vm6, %v550_v46, %v590_v47  ;;  %v615_v52 = vsel %vm613_vm7, %v590_v47, %v593_v29 }
  0xbd   : > { %968 = vmatmul.bf16.vlgmr.msra.gmra.mxu0 %v611_v51  ;;  %981 = vmatmul.bf16.vlgmr.msra.gmra.mxu1 %v615_v52 }
  0xbe   : > { %1169 = vmatpush.bf16.msra.mxu0 %v1807_v27  ;;  %1182 = vmatpush.bf16.msra.mxu1 %v1897_v49  ;;  %v602_v27 = vpop.permute.xlu2 %601 }
  0xbf   : > { %1163 = vmatpush.bf16.msra.mxu2 %v2019_v11 }
  0xc2   : > { %1170 = vmatpush.bf16.msra.mxu0 %v1823_v30  ;;  %1183 = vmatpush.bf16.msra.mxu1 %v1924_v54 }
  0xc3   : > { %1208 = vmatpush.bf16.msrb.mxu2 %v2030_v13  ;;  %v599_v3 = vpop.permute.xlu1 %598 }
  0xc4   : > { %v622_v55 = vsel %vm608_vm6, %v1768_v4, %v599_v3  ;;  %v625_v30 = vsel %vm613_vm7, %v599_v3, %v602_v27 }
  0xc5   : > { %1007 = vmatmul.bf16.vlgmr.msra.gmra.mxu3 %v622_v55 }
  0xc6   : > { %1171 = vmatpush.bf16.msra.mxu0 %v1835_v33  ;;  %1184 = vmatpush.bf16.msra.mxu1 %v1951_v59 }
  0xc7   : > { %1209 = vmatpush.bf16.msrb.mxu2 %v2057_v19  ;;  %1195 = vmatpush.bf16.msra.mxu3 %v1998_v7 }
  0xca   : > { %1172 = vmatpush.bf16.msra.mxu0 %v1853_v39  ;;  %1185 = vmatpush.bf16.msra.mxu1 %v1976_v63  ;;  %v1062_v39 = vshll.u32 %v1796_v23, 16 }
  0xcb   : > { %1210 = vmatpush.bf16.msrb.mxu2 %v2082_v25  ;;  %v607_v49 = vpop.permute.xlu1 %606  ;;  %1196 = vmatpush.bf16.msra.mxu3 %v2025_v12 }
  0xcc   : > { %v628_v4 = vsel %vm617_vm5, %v602_v27, %v607_v49 }
  0xcd   : > { %1020 = vmatmul.bf16.vlgmr.msrb.gmra.mxu0 %v625_v30  ;;  %1033 = vmatmul.bf16.vlgmr.msrb.gmra.mxu1 %v628_v4 }
  0xce   : > { %1173 = vmatpush.bf16.msra.mxu0 %v1874_v43  ;;  %1186 = vmatpush.bf16.msra.mxu1 %v2005_v8  ;;  %v1065_v43 = vsel %vm1770_vm4, 0, %v1062_v39 }
  0xcf   : > { %1211 = vmatpush.bf16.msrb.mxu2 %v2110_v35  ;;  %1197 = vmatpush.bf16.msra.mxu3 %v2052_v18 }
  0xd2   : > { %1174 = vmatpush.bf16.msra.mxu0 %v1892_v48  ;;  %1187 = vmatpush.bf16.msra.mxu1 %v2036_v14 }
  0xd3   : > { %1212 = vmatpush.bf16.msrb.mxu2 %v2122_v31  ;;  %1198 = vmatpush.bf16.msra.mxu3 %v2077_v22  ;;  %v1052_v22 = vstv %s2228_s7 }
  0xd6   : > { %1175 = vmatpush.bf16.msra.mxu0 %v1918_v53  ;;  %1188 = vmatpush.bf16.msra.mxu1 %v2064_v20  ;;  %v1106_v33 = vpop.permute.xlu0 %1105 }
  0xd7   : > { %1213 = vmatpush.bf16.msrb.mxu2 %v1622_v37  ;;  %1199 = vmatpush.bf16.msra.mxu3 %v2105_v34 }
  0xda   : > { %1176 = vmatpush.bf16.msra.mxu0 %v1944_v58  ;;  %1189 = vmatpush.bf16.msra.mxu1 %v2088_v26 }
  0xdb   : > { %1214 = vmatpush.bf16.msrb.mxu2 %v1621_v41  ;;  %1200 = vmatpush.bf16.msra.mxu3 %v2117_v36 }
  0xde   : > { %1223 = vmatpush.bf16.msrb.mxu0 %v1956_v60 }
  0xdf   : > { %1215 = vmatpush.bf16.msrb.mxu2 %v1620_v42  ;;  %1201 = vmatpush.bf16.msra.mxu3 %v2133_v45 }
  0xe2   : > { %1224 = vmatpush.bf16.msrb.mxu0 %v1981_v0 }
  0xe3   : > { %v1103_v48 = vpop.permute.xlu2 %1102  ;;  %1202 = vmatpush.bf16.msra.mxu3 %v2143_v38 }
  0xe4   : > { %v1126_v53 = vsel %vm613_vm7, %v1103_v48, %v1106_v33  ;;  %v1123_v54 = vsel %vm608_vm6, %v1065_v43, %v1103_v48 }
  0xe5   : > { %1151 = vmatmul.bf16.vlgmr.msrb.gmra.mxu3 %v1123_v54  ;;  %1164 = vmatmul.bf16.vlgmr.msra.gmra.mxu2 %v1126_v53 }
  0xe6   : > { %1225 = vmatpush.bf16.msrb.mxu0 %v2012_v10  ;;  %v1112_v56 = vpop.permute.xlu0 %1111  ;;  %v1662_v10 = vld [vmem:[%s2251_s5] ss:$0 sm:$0xff] }
  0xe7   : > { %v1132_v23 = vsel %vm608_vm6, %v1801_v24, %v1112_v56  ;;  %v1095_v24 = vshrl.u32 %v1938_v57, 16 }
  0xe8   : > { %1190 = vmatmul.bf16.vlgmr.msra.gmra.mxu1 %v1132_v23 }
  0xe9   : > { %v1098_v0 = vsel %vm1770_vm4, %v1095_v24, 0 }
  0xea   : > { %1226 = vmatpush.bf16.msrb.mxu0 %v2044_v16 }
  0xeb   : > { %v1109_v58 = vpop.permute.xlu2 %1108 }
  0xec   : > { %v1129_v59 = vsel %vm617_vm5, %v1106_v33, %v1109_v58 }
  0xed   : > { %1177 = vmatmul.bf16.vlgmr.msra.gmra.mxu0 %v1129_v59 }
  0xee   : > { %1227 = vmatpush.bf16.msrb.mxu0 %v2070_v21  ;;  %v1115_v60 = vpop.permute.xlu1 %1114 }
  0xef   : > { %v1135_v61 = vsel %vm613_vm7, %v1112_v56, %v1115_v60 }
  0xf2   : > { %1228 = vmatpush.bf16.msrb.mxu0 %v2094_v32 }
  0xf3   : > { %v1120_v62 = vpop.permute.xlu2 %1119 }
  0xf4   : > { %v1138_v63 = vsel %vm617_vm5, %v1115_v60, %v1120_v62 }
  0xf5   : > { %1203 = vmatmul.bf16.vlgmr.msra.gmra.mxu3 %v1135_v61  ;;  %1216 = vmatmul.bf16.vlgmr.msrb.gmra.mxu2 %v1138_v63 }
  0xfd   : > { %1576 = vmatmul.msk.bf16.vlgmr.msrb.gmra.mxu0 %vm608_vm6, %v1098_v0 }
 0x123   : > { %v995_v1 = vpop.f32.mrf.mxu2 }
 0x12b   : > { %v997_v2 = vpop.f32.mrf.mxu2 }
 0x133   : > { %v1047_v7 = vpop.f32.mrf.mxu2 }
 0x13a   : > { %v969_v8 = vpop.f32.mrf.mxu0  ;;  %v982_v9 = vpop.f32.mrf.mxu1 }
 0x13b   : > { %v1049_v11 = vpop.f32.mrf.mxu2  ;;  %v970_v12 = vadd.f32 %v1662_v10, %v969_v8 }
 0x13d   : > { %v983_v15 = vadd.f32 %v982_v9, %v970_v12 }
 0x13f   : > { %v996_v5 = vadd.f32 %v995_v1, %v983_v15 }
 0x142   : > { %v971_v13 = vpop.f32.mrf.mxu0  ;;  %v984_v14 = vpop.f32.mrf.mxu1 }
 0x148   : > { %v1008_v57 = vpop.f32.mrf.mxu3 }
 0x149   : > { %v1009_v16 = vadd.f32 %v1008_v57, %v996_v5 }
 0x14a   : > { %v1021_v18 = vpop.f32.mrf.mxu0  ;;  %v1034_v19 = vpop.f32.mrf.mxu1 }
 0x14b   : > { %v1022_v20 = vadd.f32 %v1021_v18, %v1009_v16 }
 0x14d   : > { %v1035_v21 = vadd.f32 %v1034_v19, %v1022_v20 }
 0x14f   : > { %v1048_v25 = vadd.f32 %v1047_v7, %v1035_v21 }
 0x150   : > { %v1010_v26 = vpop.f32.mrf.mxu3 }
 0x151   : > { %vm1051_vm8 = vcmp.ge.f32.partialorder %v1048_v25, 0.0  ;;  %v1053_v28 = vmul.f32 %v1052_v22, %v1048_v25 }
 0x152   : > { %v1023_v29 = vpop.f32.mrf.mxu0  ;;  %v1036_v32 = vpop.f32.mrf.mxu1 }
 0x153   : > { %v1054_v34 = vsel %vm1051_vm8, %v1048_v25, %v1053_v28 }
 0x154   : > { %v1055_v35 = vpack.c.bf16 %v1054_v34, %v1054_v34 }
 0x156   : > { %1057 = vst.msk [vmem:[%s397_s13] sm:$0x1] %vm1056_vm9, %v1055_v35 }
 0x165   : > { %v1191_v36 = vpop.f32.mrf.mxu1 }
 0x168   : > { %v1152_v31 = vpop.f32.mrf.mxu3  ;;  %v1165_v40 = vpop.f32.mrf.mxu2 }
 0x169   : > { %v1153_v45 = vadd.f32 %v1662_v10, %v1152_v31 }
 0x16a   : > { %v1178_v44 = vpop.f32.mrf.mxu0 }
 0x16b   : > { %v1166_v38 = vadd.f32 %v1165_v40, %v1153_v45 }
 0x16d   : > { %v1193_v37 = vpop.f32.mrf.mxu1  ;;  %v1179_v6 = vadd.f32 %v1178_v44, %v1166_v38 }
 0x16f   : > { %v1192_v17 = vadd.f32 %v1191_v36, %v1179_v6 }
 0x170   : > { %v1154_v41 = vpop.f32.mrf.mxu3  ;;  %v1167_v50 = vpop.f32.mrf.mxu2 }
 0x172   : > { %v1180_v42 = vpop.f32.mrf.mxu0 }
 0x178   : > { %v1204_v46 = vpop.f32.mrf.mxu3  ;;  %v1217_v47 = vpop.f32.mrf.mxu2 }
 0x179   : > { %v1205_v51 = vadd.f32 %v1204_v46, %v1192_v17 }
 0x17a   : > { %v1230_v52 = vpop.f32.mrf.mxu0 }
 0x17b   : > { %v1218_v3 = vadd.f32 %v1217_v47, %v1205_v51 }
 0x17d   : > { %v1231_v55 = vadd.f32 %v1230_v52, %v1218_v3 }
 0x17f   : > { %vm1234_vm10 = vcmp.ge.f32.partialorder %v1231_v55, 0.0  ;;  %v1235_v27 = vmul.f32 %v1231_v55, %v1052_v22 }
 0x180   : > { %v1206_v30 = vpop.f32.mrf.mxu3  ;;  %v1219_v49 = vpop.f32.mrf.mxu2 }
 0x181   : > { %v1236_v4 = vsel %vm1234_vm10, %v1231_v55, %v1235_v27 }
 0x182   : > { %v1237_v33 = vpack.c.bf16 %v1236_v4, %v1236_v4  ;;  %v1232_v39 = vpop.f32.mrf.mxu0 }
 0x184   : > { %1577 = vst.msk [vmem:[%s397_s13 + $0x1] sm:$0x1] %vm1056_vm9, %v1237_v33 }
 0x185 PF: > { %s17_s25 = sadd.s32 1, %s1685_s25   ;;  %s2257_s23 = smov %s1681_s24 }
 0x186   : > { %p14_p5 = scmp.ge.s32.totalorder %s17_s25, 4   ;;  %s2258_s24 = smov %s2260_s0 }
 0x188   :  { %16 = sbr.rel (!%p14_p5) target bundleno = 2 (0x2), region = 82 }

</bundles_post_ra>
